<compile_context>
chip_gen: v7x
topology: tpu7x:2x2x1
jax: 0.10.0
libtpu: 0.0.40
codegen_flags: <defaults>
</compile_context>

<pallas_src>
import functools

import jax
import jax.numpy as jnp
from jax import lax
from jax.experimental import pallas as pl
from jax.experimental.pallas import tpu as pltpu


def convlstm_kernel(xh_ref, w_ref, b_ref, c_ref, wci_ref, wco_ref, hc_ref, *,
                    hid, height, width):
    """Full ConvLSTM cell update for ONE batch element (one grid step).

    xh_ref  : (1, H+2, W+2, Cin+HID) bf16  spatially padded concat([x, h])
    w_ref   : (9, Cin+HID, 4*HID)    bf16  per-tap fused conv weights (c-gate cols x2)
    b_ref   : (1, 4*HID)             f32   bias (forget_bias folded in, c-gate x2)
    c_ref   : (1, H*W, HID)          f32   cell state
    wci_ref : (H*W, HID)             f32   peephole w_ci (batch-invariant, resident)
    wco_ref : (H*W, HID)             f32   peephole w_co (batch-invariant, resident)
    hc_ref  : (1, H*W, 2*HID)        f32   fused output [h_new ; c_new]
    """
    hw = height * width
    cin_tot = xh_ref.shape[-1]

    # ---- 3x3 conv_x + conv_h as 9 accumulating MXU matmuls (im2col in VMEM) --
    acc = jnp.zeros((hw, 4 * hid), jnp.float32)
    tap = 0
    for ky in range(3):
        for kx in range(3):
            xs = xh_ref[0, ky:ky + height, kx:kx + width, :].reshape(hw, cin_tot)
            acc = acc + jnp.dot(xs, w_ref[tap],
                                preferred_element_type=jnp.float32)
            tap += 1

    c = c_ref[0]

    # ---- packed gate epilogue: 2 sigmoid passes instead of 5 narrow ones -----
    # Lane layout of z: [ i | f | 2*c_gate | o ]  (matches torch.split order).
    # i-gate peephole added full-width (other lanes get +0).
    peep_i = jnp.concatenate(
        [wci_ref[...] * c, jnp.zeros((hw, 3 * hid), jnp.float32)], axis=-1)
    z = acc + b_ref[...] + peep_i

    s = jax.nn.sigmoid(z)                           # one full-width EUP pass
    gate_i = s[:, 0:hid]
    gate_f = s[:, hid:2 * hid]                      # forget_bias already in bias
    tanh_gc = 2.0 * s[:, 2 * hid:3 * hid] - 1.0     # tanh(x) = 2*sigmoid(2x) - 1
    c_new = gate_f * c + gate_i * tanh_gc

    z2 = jnp.concatenate(
        [z[:, 3 * hid:4 * hid] + wco_ref[...] * c_new, 2.0 * c_new], axis=-1)
    s2 = jax.nn.sigmoid(z2)                         # one half-width EUP pass
    gate_o = s2[:, 0:hid]
    tanh_cn = 2.0 * s2[:, hid:2 * hid] - 1.0
    h_new = gate_o * tanh_cn

    hc_ref[0] = jnp.concatenate([h_new, c_new], axis=-1)


def conv_lstm_cell(x, h, c, wx, wh, bx, bh, w_ci, w_co, *, forget_bias=0.01):
    """NHWC ConvLSTM cell.

    x: (B, H, W, Cin); h, c: (B, H, W, HID)
    wx: (3,3,Cin,4*HID), wh: (3,3,HID,4*HID), bx/bh: (4*HID,)
    w_ci, w_co: (1, H, W, HID)
    returns (h_new, c_new), each (B, H, W, HID) f32
    """
    B, H, W, Cin = x.shape
    HID = h.shape[-1]
    HW = H * W
    C = Cin + HID

    # One light wrapper pass: cast to bf16 BEFORE concat/pad; no im2col in HBM.
    # (bf16 recurrent input is within tolerance for one step; for very long
    #  rollouts keep the h taps in f32 if drift matters.)
    xh = jnp.concatenate([x.astype(jnp.bfloat16), h.astype(jnp.bfloat16)],
                         axis=-1)
    xh_pad = jnp.pad(xh, ((0, 0), (1, 1), (1, 1), (0, 0)))     # (B, H+2, W+2, C)

    # Per-tap fused weights [wx_tap ; wh_tap], stacked over the 9 taps.
    w_fused = jnp.stack(
        [jnp.concatenate([wx[ky, kx], wh[ky, kx]], axis=0)
         for ky in range(3) for kx in range(3)], axis=0)       # (9, C, 4*HID)

    # Pre-scale the c-gate columns (and bias) by 2 so the kernel realizes
    # tanh(gc) = 2*sigmoid(2*gc) - 1 inside the packed sigmoid pass.
    gate_scale = jnp.concatenate([jnp.ones((2 * HID,), jnp.float32),
                                  jnp.full((HID,), 2.0, jnp.float32),
                                  jnp.ones((HID,), jnp.float32)])
    w_fused = (w_fused * gate_scale).astype(jnp.bfloat16)

    bias = (bx + bh).astype(jnp.float32)
    bias = bias.at[HID:2 * HID].add(forget_bias)               # fold forget_bias
    bias = (bias * gate_scale).reshape(1, 4 * HID)

    c_flat = c.reshape(B, HW, HID)
    wci_flat = w_ci.reshape(HW, HID)                           # no batch broadcast
    wco_flat = w_co.reshape(HW, HID)

    kernel = functools.partial(convlstm_kernel, hid=HID, height=H, width=W)

    hc = pl.pallas_call(
        kernel,
        out_shape=jax.ShapeDtypeStruct((B, HW, 2 * HID), jnp.float32),
        grid=(B,),
        in_specs=[
            pl.BlockSpec((1, H + 2, W + 2, C), lambda bb: (bb, 0, 0, 0)),  # xh (with halo)
            pl.BlockSpec((9, C, 4 * HID), lambda bb: (0, 0, 0)),           # weights (resident)
            pl.BlockSpec((1, 4 * HID), lambda bb: (0, 0)),                 # bias (resident)
            pl.BlockSpec((1, HW, HID), lambda bb: (bb, 0, 0)),             # cell state
            pl.BlockSpec((HW, HID), lambda bb: (0, 0)),                    # w_ci (resident)
            pl.BlockSpec((HW, HID), lambda bb: (0, 0)),                    # w_co (resident)
        ],
        out_specs=pl.BlockSpec((1, HW, 2 * HID), lambda bb: (bb, 0, 0)),
        compiler_params=pltpu.CompilerParams(
            dimension_semantics=("parallel",),
            vmem_limit_bytes=32 * 1024 * 1024),
    )(xh_pad, w_fused, bias, c_flat, wci_flat, wco_flat)

    h_new = hc[:, :, :HID].reshape(B, H, W, HID)
    c_new = hc[:, :, HID:].reshape(B, H, W, HID)
    return h_new, c_new


def reference_forward(x, h, c, wx, wh, bx, bh, w_ci, w_co, *, forget_bias=0.01):
    """Pure-JAX reference (mirrors the PyTorch forward, NHWC layout, f32)."""
    dn = ('NHWC', 'HWIO', 'NHWC')
    prec = lax.Precision.HIGHEST
    x_concat = lax.conv_general_dilated(x, wx, (1, 1), 'SAME',
                                        dimension_numbers=dn, precision=prec) + bx
    h_concat = lax.conv_general_dilated(h, wh, (1, 1), 'SAME',
                                        dimension_numbers=dn, precision=prec) + bh
    i_x, f_x, c_x, o_x = jnp.split(x_concat, 4, axis=-1)
    i_h, f_h, c_h, o_h = jnp.split(h_concat, 4, axis=-1)
    i = jax.nn.sigmoid(i_x + i_h + w_ci * c)
    f = jax.nn.sigmoid(f_x + f_h + forget_bias)
    c_new = f * c + i * jnp.tanh(c_x + c_h)
    o = jax.nn.sigmoid(o_x + o_h + w_co * c_new)
    h_new = o * jnp.tanh(c_new)
    return h_new, c_new


if __name__ == "__main__":
    B, H, W = 2, 16, 16
    C_IN, HID = 4, 32
    FORGET_BIAS = 0.01

    key = jax.random.PRNGKey(0)
    ks = jax.random.split(key, 9)

    # Deterministic synthetic parameters (shapes from the module __init__).
    # Conv weights stored directly in HWIO; torch would be (4*HID, Cin, 3, 3).
    wx = 0.1 * jax.random.normal(ks[0], (3, 3, C_IN, 4 * HID), jnp.float32)
    wh = 0.1 * jax.random.normal(ks[1], (3, 3, HID, 4 * HID), jnp.float32)
    bx = 0.1 * jax.random.normal(ks[2], (4 * HID,), jnp.float32)
    bh = 0.1 * jax.random.normal(ks[3], (4 * HID,), jnp.float32)
    # Peephole params are zeros in torch __init__; small random values here so
    # the w_ci*c / w_co*c paths are actually exercised.
    w_ci = 0.1 * jax.random.normal(ks[4], (1, H, W, HID), jnp.float32)
    w_co = 0.1 * jax.random.normal(ks[5], (1, H, W, HID), jnp.float32)

    # Inputs (NHWC).
    x = jax.random.normal(ks[6], (B, H, W, C_IN), jnp.float32)
    h0 = jax.random.normal(ks[7], (B, H, W, HID), jnp.float32)
    c0 = jax.random.normal(ks[8], (B, H, W, HID), jnp.float32)

    h_new, c_new = conv_lstm_cell(x, h0, c0, wx, wh, bx, bh, w_ci, w_co,
                                  forget_bias=FORGET_BIAS)
    jax.block_until_ready((h_new, c_new))
    assert h_new.shape == (B, H, W, HID) and c_new.shape == (B, H, W, HID)

    # Tight check: reference fed with bf16-rounded matmul operands (exactly the
    # values the kernel's MXU consumes); remaining diff is f32 accumulation
    # order and the tanh-via-sigmoid identity (ULP-level).
    q = lambda a: a.astype(jnp.bfloat16).astype(jnp.float32)
    h_q, c_q = reference_forward(q(x), q(h0), c0, q(wx), q(wh), bx, bh,
                                 w_ci, w_co, forget_bias=FORGET_BIAS)
    assert jnp.allclose(h_new, h_q, rtol=5e-4, atol=5e-4)
    assert jnp.allclose(c_new, c_q, rtol=5e-4, atol=5e-4)

    # Sanity check against the full-f32 reference (bf16 matmul inputs shift
    # results at the ~1e-3..1e-2 level).
    h_ref, c_ref = reference_forward(x, h0, c0, wx, wh, bx, bh, w_ci, w_co,
                                     forget_bias=FORGET_BIAS)
    assert float(jnp.max(jnp.abs(h_new - h_ref))) < 5e-2
    assert float(jnp.max(jnp.abs(c_new - c_ref))) < 5e-2

    print("KERNEL_OK")
</pallas_src>

<mosaic_0001>
module attributes {stable_mosaic.version = 11 : i64} {
  func.func @convlstm_kernel(%arg0: i32, %arg1: memref<1x18x18x36xbf16, #tpu.memory_space<vmem>>, %arg2: memref<9x36x128xbf16, #tpu.memory_space<vmem>>, %arg3: memref<1x128xf32, #tpu.memory_space<vmem>>, %arg4: memref<1x256x32xf32, #tpu.memory_space<vmem>>, %arg5: memref<256x32xf32, #tpu.memory_space<vmem>>, %arg6: memref<256x32xf32, #tpu.memory_space<vmem>>, %arg7: memref<1x256x64xf32, #tpu.memory_space<vmem>>) attributes {dimension_semantics = [#tpu.dimension_semantics<parallel>], iteration_bounds = array<i64: 2>, scalar_prefetch = 0 : i64, scratch_operands = 0 : i64, tpu.core_type = #tpu.core_type<tc>, window_params = [{transform_indices = @transform_0, window_bounds = array<i64: 1, 18, 18, 36>}, {pipeline_mode = #tpu.pipeline_mode<synchronous>, transform_indices = @transform_1, window_bounds = array<i64: 9, 36, 128>}, {pipeline_mode = #tpu.pipeline_mode<synchronous>, transform_indices = @transform_2, window_bounds = array<i64: 1, 128>}, {transform_indices = @transform_3, window_bounds = array<i64: 1, 256, 32>}, {pipeline_mode = #tpu.pipeline_mode<synchronous>, transform_indices = @transform_4, window_bounds = array<i64: 256, 32>}, {pipeline_mode = #tpu.pipeline_mode<synchronous>, transform_indices = @transform_5, window_bounds = array<i64: 256, 32>}, {transform_indices = @transform_6, window_bounds = array<i64: 1, 256, 64>}]} {
    %cst = arith.constant 0.000000e+00 : f32
    %0 = vector.broadcast %cst : f32 to vector<256x128xf32>
    %c0 = arith.constant 0 : index
    %c0_0 = arith.constant 0 : index
    %c0_1 = arith.constant 0 : index
    %c0_2 = arith.constant 0 : index
    %1 = vector.load %arg1[%c0, %c0_0, %c0_1, %c0_2] : memref<1x18x18x36xbf16, #tpu.memory_space<vmem>>, vector<1x16x16x36xbf16>
    %2 = vector.shape_cast %1 : vector<1x16x16x36xbf16> to vector<16x16x36xbf16>
    %3 = vector.shape_cast %2 : vector<16x16x36xbf16> to vector<256x36xbf16>
    %c0_3 = arith.constant 0 : index
    %c0_4 = arith.constant 0 : index
    %c0_5 = arith.constant 0 : index
    %4 = vector.load %arg2[%c0_3, %c0_4, %c0_5] : memref<9x36x128xbf16, #tpu.memory_space<vmem>>, vector<1x36x128xbf16>
    %5 = vector.shape_cast %4 : vector<1x36x128xbf16> to vector<36x128xbf16>
    %cst_6 = arith.constant dense<0.000000e+00> : vector<256x128xf32>
    %6 = tpu.matmul %3, %5, %cst_6 {dimension_numbers = #tpu.dot_dimension_numbers<[1], [0], [0], [1], [0, 0, 1, 1], [], []>} : vector<256x36xbf16>, vector<36x128xbf16>, vector<256x128xf32> -> vector<256x128xf32>
    %7 = arith.addf %0, %6 : vector<256x128xf32>
    %c0_7 = arith.constant 0 : index
    %c0_8 = arith.constant 0 : index
    %c1 = arith.constant 1 : index
    %c0_9 = arith.constant 0 : index
    %8 = vector.load %arg1[%c0_7, %c0_8, %c1, %c0_9] : memref<1x18x18x36xbf16, #tpu.memory_space<vmem>>, vector<1x16x16x36xbf16>
    %9 = vector.shape_cast %8 : vector<1x16x16x36xbf16> to vector<16x16x36xbf16>
    %10 = vector.shape_cast %9 : vector<16x16x36xbf16> to vector<256x36xbf16>
    %c1_10 = arith.constant 1 : index
    %c0_11 = arith.constant 0 : index
    %c0_12 = arith.constant 0 : index
    %11 = vector.load %arg2[%c1_10, %c0_11, %c0_12] : memref<9x36x128xbf16, #tpu.memory_space<vmem>>, vector<1x36x128xbf16>
    %12 = vector.shape_cast %11 : vector<1x36x128xbf16> to vector<36x128xbf16>
    %cst_13 = arith.constant dense<0.000000e+00> : vector<256x128xf32>
    %13 = tpu.matmul %10, %12, %cst_13 {dimension_numbers = #tpu.dot_dimension_numbers<[1], [0], [0], [1], [0, 0, 1, 1], [], []>} : vector<256x36xbf16>, vector<36x128xbf16>, vector<256x128xf32> -> vector<256x128xf32>
    %14 = arith.addf %7, %13 : vector<256x128xf32>
    %c0_14 = arith.constant 0 : index
    %c0_15 = arith.constant 0 : index
    %c2 = arith.constant 2 : index
    %c0_16 = arith.constant 0 : index
    %15 = vector.load %arg1[%c0_14, %c0_15, %c2, %c0_16] : memref<1x18x18x36xbf16, #tpu.memory_space<vmem>>, vector<1x16x16x36xbf16>
    %16 = vector.shape_cast %15 : vector<1x16x16x36xbf16> to vector<16x16x36xbf16>
    %17 = vector.shape_cast %16 : vector<16x16x36xbf16> to vector<256x36xbf16>
    %c2_17 = arith.constant 2 : index
    %c0_18 = arith.constant 0 : index
    %c0_19 = arith.constant 0 : index
    %18 = vector.load %arg2[%c2_17, %c0_18, %c0_19] : memref<9x36x128xbf16, #tpu.memory_space<vmem>>, vector<1x36x128xbf16>
    %19 = vector.shape_cast %18 : vector<1x36x128xbf16> to vector<36x128xbf16>
    %cst_20 = arith.constant dense<0.000000e+00> : vector<256x128xf32>
    %20 = tpu.matmul %17, %19, %cst_20 {dimension_numbers = #tpu.dot_dimension_numbers<[1], [0], [0], [1], [0, 0, 1, 1], [], []>} : vector<256x36xbf16>, vector<36x128xbf16>, vector<256x128xf32> -> vector<256x128xf32>
    %21 = arith.addf %14, %20 : vector<256x128xf32>
    %c0_21 = arith.constant 0 : index
    %c1_22 = arith.constant 1 : index
    %c0_23 = arith.constant 0 : index
    %c0_24 = arith.constant 0 : index
    %22 = vector.load %arg1[%c0_21, %c1_22, %c0_23, %c0_24] : memref<1x18x18x36xbf16, #tpu.memory_space<vmem>>, vector<1x16x16x36xbf16>
    %23 = vector.shape_cast %22 : vector<1x16x16x36xbf16> to vector<16x16x36xbf16>
    %24 = vector.shape_cast %23 : vector<16x16x36xbf16> to vector<256x36xbf16>
    %c3 = arith.constant 3 : index
    %c0_25 = arith.constant 0 : index
    %c0_26 = arith.constant 0 : index
    %25 = vector.load %arg2[%c3, %c0_25, %c0_26] : memref<9x36x128xbf16, #tpu.memory_space<vmem>>, vector<1x36x128xbf16>
    %26 = vector.shape_cast %25 : vector<1x36x128xbf16> to vector<36x128xbf16>
    %cst_27 = arith.constant dense<0.000000e+00> : vector<256x128xf32>
    %27 = tpu.matmul %24, %26, %cst_27 {dimension_numbers = #tpu.dot_dimension_numbers<[1], [0], [0], [1], [0, 0, 1, 1], [], []>} : vector<256x36xbf16>, vector<36x128xbf16>, vector<256x128xf32> -> vector<256x128xf32>
    %28 = arith.addf %21, %27 : vector<256x128xf32>
    %c0_28 = arith.constant 0 : index
    %c1_29 = arith.constant 1 : index
    %c1_30 = arith.constant 1 : index
    %c0_31 = arith.constant 0 : index
    %29 = vector.load %arg1[%c0_28, %c1_29, %c1_30, %c0_31] : memref<1x18x18x36xbf16, #tpu.memory_space<vmem>>, vector<1x16x16x36xbf16>
    %30 = vector.shape_cast %29 : vector<1x16x16x36xbf16> to vector<16x16x36xbf16>
    %31 = vector.shape_cast %30 : vector<16x16x36xbf16> to vector<256x36xbf16>
    %c4 = arith.constant 4 : index
    %c0_32 = arith.constant 0 : index
    %c0_33 = arith.constant 0 : index
    %32 = vector.load %arg2[%c4, %c0_32, %c0_33] : memref<9x36x128xbf16, #tpu.memory_space<vmem>>, vector<1x36x128xbf16>
    %33 = vector.shape_cast %32 : vector<1x36x128xbf16> to vector<36x128xbf16>
    %cst_34 = arith.constant dense<0.000000e+00> : vector<256x128xf32>
    %34 = tpu.matmul %31, %33, %cst_34 {dimension_numbers = #tpu.dot_dimension_numbers<[1], [0], [0], [1], [0, 0, 1, 1], [], []>} : vector<256x36xbf16>, vector<36x128xbf16>, vector<256x128xf32> -> vector<256x128xf32>
    %35 = arith.addf %28, %34 : vector<256x128xf32>
    %c0_35 = arith.constant 0 : index
    %c1_36 = arith.constant 1 : index
    %c2_37 = arith.constant 2 : index
    %c0_38 = arith.constant 0 : index
    %36 = vector.load %arg1[%c0_35, %c1_36, %c2_37, %c0_38] : memref<1x18x18x36xbf16, #tpu.memory_space<vmem>>, vector<1x16x16x36xbf16>
    %37 = vector.shape_cast %36 : vector<1x16x16x36xbf16> to vector<16x16x36xbf16>
    %38 = vector.shape_cast %37 : vector<16x16x36xbf16> to vector<256x36xbf16>
    %c5 = arith.constant 5 : index
    %c0_39 = arith.constant 0 : index
    %c0_40 = arith.constant 0 : index
    %39 = vector.load %arg2[%c5, %c0_39, %c0_40] : memref<9x36x128xbf16, #tpu.memory_space<vmem>>, vector<1x36x128xbf16>
    %40 = vector.shape_cast %39 : vector<1x36x128xbf16> to vector<36x128xbf16>
    %cst_41 = arith.constant dense<0.000000e+00> : vector<256x128xf32>
    %41 = tpu.matmul %38, %40, %cst_41 {dimension_numbers = #tpu.dot_dimension_numbers<[1], [0], [0], [1], [0, 0, 1, 1], [], []>} : vector<256x36xbf16>, vector<36x128xbf16>, vector<256x128xf32> -> vector<256x128xf32>
    %42 = arith.addf %35, %41 : vector<256x128xf32>
    %c0_42 = arith.constant 0 : index
    %c2_43 = arith.constant 2 : index
    %c0_44 = arith.constant 0 : index
    %c0_45 = arith.constant 0 : index
    %43 = vector.load %arg1[%c0_42, %c2_43, %c0_44, %c0_45] : memref<1x18x18x36xbf16, #tpu.memory_space<vmem>>, vector<1x16x16x36xbf16>
    %44 = vector.shape_cast %43 : vector<1x16x16x36xbf16> to vector<16x16x36xbf16>
    %45 = vector.shape_cast %44 : vector<16x16x36xbf16> to vector<256x36xbf16>
    %c6 = arith.constant 6 : index
    %c0_46 = arith.constant 0 : index
    %c0_47 = arith.constant 0 : index
    %46 = vector.load %arg2[%c6, %c0_46, %c0_47] : memref<9x36x128xbf16, #tpu.memory_space<vmem>>, vector<1x36x128xbf16>
    %47 = vector.shape_cast %46 : vector<1x36x128xbf16> to vector<36x128xbf16>
    %cst_48 = arith.constant dense<0.000000e+00> : vector<256x128xf32>
    %48 = tpu.matmul %45, %47, %cst_48 {dimension_numbers = #tpu.dot_dimension_numbers<[1], [0], [0], [1], [0, 0, 1, 1], [], []>} : vector<256x36xbf16>, vector<36x128xbf16>, vector<256x128xf32> -> vector<256x128xf32>
    %49 = arith.addf %42, %48 : vector<256x128xf32>
    %c0_49 = arith.constant 0 : index
    %c2_50 = arith.constant 2 : index
    %c1_51 = arith.constant 1 : index
    %c0_52 = arith.constant 0 : index
    %50 = vector.load %arg1[%c0_49, %c2_50, %c1_51, %c0_52] : memref<1x18x18x36xbf16, #tpu.memory_space<vmem>>, vector<1x16x16x36xbf16>
    %51 = vector.shape_cast %50 : vector<1x16x16x36xbf16> to vector<16x16x36xbf16>
    %52 = vector.shape_cast %51 : vector<16x16x36xbf16> to vector<256x36xbf16>
    %c7 = arith.constant 7 : index
    %c0_53 = arith.constant 0 : index
    %c0_54 = arith.constant 0 : index
    %53 = vector.load %arg2[%c7, %c0_53, %c0_54] : memref<9x36x128xbf16, #tpu.memory_space<vmem>>, vector<1x36x128xbf16>
    %54 = vector.shape_cast %53 : vector<1x36x128xbf16> to vector<36x128xbf16>
    %cst_55 = arith.constant dense<0.000000e+00> : vector<256x128xf32>
    %55 = tpu.matmul %52, %54, %cst_55 {dimension_numbers = #tpu.dot_dimension_numbers<[1], [0], [0], [1], [0, 0, 1, 1], [], []>} : vector<256x36xbf16>, vector<36x128xbf16>, vector<256x128xf32> -> vector<256x128xf32>
    %56 = arith.addf %49, %55 : vector<256x128xf32>
    %c0_56 = arith.constant 0 : index
    %c2_57 = arith.constant 2 : index
    %c2_58 = arith.constant 2 : index
    %c0_59 = arith.constant 0 : index
    %57 = vector.load %arg1[%c0_56, %c2_57, %c2_58, %c0_59] : memref<1x18x18x36xbf16, #tpu.memory_space<vmem>>, vector<1x16x16x36xbf16>
    %58 = vector.shape_cast %57 : vector<1x16x16x36xbf16> to vector<16x16x36xbf16>
    %59 = vector.shape_cast %58 : vector<16x16x36xbf16> to vector<256x36xbf16>
    %c8 = arith.constant 8 : index
    %c0_60 = arith.constant 0 : index
    %c0_61 = arith.constant 0 : index
    %60 = vector.load %arg2[%c8, %c0_60, %c0_61] : memref<9x36x128xbf16, #tpu.memory_space<vmem>>, vector<1x36x128xbf16>
    %61 = vector.shape_cast %60 : vector<1x36x128xbf16> to vector<36x128xbf16>
    %cst_62 = arith.constant dense<0.000000e+00> : vector<256x128xf32>
    %62 = tpu.matmul %59, %61, %cst_62 {dimension_numbers = #tpu.dot_dimension_numbers<[1], [0], [0], [1], [0, 0, 1, 1], [], []>} : vector<256x36xbf16>, vector<36x128xbf16>, vector<256x128xf32> -> vector<256x128xf32>
    %63 = arith.addf %56, %62 : vector<256x128xf32>
    %c0_63 = arith.constant 0 : index
    %c0_64 = arith.constant 0 : index
    %c0_65 = arith.constant 0 : index
    %64 = vector.load %arg4[%c0_63, %c0_64, %c0_65] : memref<1x256x32xf32, #tpu.memory_space<vmem>>, vector<1x256x32xf32>
    %65 = vector.shape_cast %64 : vector<1x256x32xf32> to vector<256x32xf32>
    %c0_66 = arith.constant 0 : index
    %c0_67 = arith.constant 0 : index
    %66 = vector.load %arg5[%c0_66, %c0_67] : memref<256x32xf32, #tpu.memory_space<vmem>>, vector<256x32xf32>
    %67 = arith.mulf %66, %65 : vector<256x32xf32>
    %cst_68 = arith.constant 0.000000e+00 : f32
    %68 = vector.broadcast %cst_68 : f32 to vector<256x96xf32>
    %69 = tpu.concatenate %67, %68 in 1 : vector<256x32xf32>, vector<256x96xf32> -> vector<256x128xf32>
    %c0_69 = arith.constant 0 : index
    %c0_70 = arith.constant 0 : index
    %70 = vector.load %arg3[%c0_69, %c0_70] : memref<1x128xf32, #tpu.memory_space<vmem>>, vector<1x128xf32>
    %71 = vector.broadcast %70 : vector<1x128xf32> to vector<256x128xf32>
    %72 = arith.addf %63, %71 : vector<256x128xf32>
    %73 = arith.addf %72, %69 : vector<256x128xf32>
    %74 = arith.negf %73 : vector<256x128xf32>
    %75 = math.exp %74 : vector<256x128xf32>
    %cst_71 = arith.constant 1.000000e+00 : f32
    %76 = vector.broadcast %cst_71 : f32 to vector<256x128xf32>
    %77 = arith.addf %76, %75 : vector<256x128xf32>
    %78 = arith.divf %76, %77 : vector<256x128xf32>
    %79 = vector.extract_strided_slice %78 {offsets = [0, 0], sizes = [256, 32], strides = [1, 1]} : vector<256x128xf32> to vector<256x32xf32>
    %80 = vector.extract_strided_slice %78 {offsets = [0, 32], sizes = [256, 32], strides = [1, 1]} : vector<256x128xf32> to vector<256x32xf32>
    %81 = vector.extract_strided_slice %78 {offsets = [0, 64], sizes = [256, 32], strides = [1, 1]} : vector<256x128xf32> to vector<256x32xf32>
    %cst_72 = arith.constant 2.000000e+00 : f32
    %82 = vector.broadcast %cst_72 : f32 to vector<256x32xf32>
    %83 = arith.mulf %82, %81 : vector<256x32xf32>
    %cst_73 = arith.constant 1.000000e+00 : f32
    %84 = vector.broadcast %cst_73 : f32 to vector<256x32xf32>
    %85 = arith.subf %83, %84 : vector<256x32xf32>
    %86 = arith.mulf %80, %65 : vector<256x32xf32>
    %87 = arith.mulf %79, %85 : vector<256x32xf32>
    %88 = arith.addf %86, %87 : vector<256x32xf32>
    %89 = vector.extract_strided_slice %73 {offsets = [0, 96], sizes = [256, 32], strides = [1, 1]} : vector<256x128xf32> to vector<256x32xf32>
    %c0_74 = arith.constant 0 : index
    %c0_75 = arith.constant 0 : index
    %90 = vector.load %arg6[%c0_74, %c0_75] : memref<256x32xf32, #tpu.memory_space<vmem>>, vector<256x32xf32>
    %91 = arith.mulf %90, %88 : vector<256x32xf32>
    %92 = arith.addf %89, %91 : vector<256x32xf32>
    %cst_76 = arith.constant 2.000000e+00 : f32
    %93 = vector.broadcast %cst_76 : f32 to vector<256x32xf32>
    %94 = arith.mulf %93, %88 : vector<256x32xf32>
    %95 = tpu.concatenate %92, %94 in 1 : vector<256x32xf32>, vector<256x32xf32> -> vector<256x64xf32>
    %96 = arith.negf %95 : vector<256x64xf32>
    %97 = math.exp %96 : vector<256x64xf32>
    %cst_77 = arith.constant 1.000000e+00 : f32
    %98 = vector.broadcast %cst_77 : f32 to vector<256x64xf32>
    %99 = arith.addf %98, %97 : vector<256x64xf32>
    %100 = arith.divf %98, %99 : vector<256x64xf32>
    %101 = vector.extract_strided_slice %100 {offsets = [0, 0], sizes = [256, 32], strides = [1, 1]} : vector<256x64xf32> to vector<256x32xf32>
    %102 = vector.extract_strided_slice %100 {offsets = [0, 32], sizes = [256, 32], strides = [1, 1]} : vector<256x64xf32> to vector<256x32xf32>
    %cst_78 = arith.constant 2.000000e+00 : f32
    %103 = vector.broadcast %cst_78 : f32 to vector<256x32xf32>
    %104 = arith.mulf %103, %102 : vector<256x32xf32>
    %cst_79 = arith.constant 1.000000e+00 : f32
    %105 = vector.broadcast %cst_79 : f32 to vector<256x32xf32>
    %106 = arith.subf %104, %105 : vector<256x32xf32>
    %107 = arith.mulf %101, %106 : vector<256x32xf32>
    %108 = tpu.concatenate %107, %88 in 1 : vector<256x32xf32>, vector<256x32xf32> -> vector<256x64xf32>
    %c0_80 = arith.constant 0 : index
    %c0_81 = arith.constant 0 : index
    %c0_82 = arith.constant 0 : index
    %109 = vector.load %arg7[%c0_80, %c0_81, %c0_82] : memref<1x256x64xf32, #tpu.memory_space<vmem>>, vector<1x256x64xf32>
    %110 = vector.shape_cast %109 : vector<1x256x64xf32> to vector<256x64xf32>
    %111 = vector.shape_cast %108 : vector<256x64xf32> to vector<1x256x64xf32>
    tpu.vector_store %arg7[%c0_80, %c0_81, %c0_82], %111 {strides = array<i32>} : memref<1x256x64xf32, #tpu.memory_space<vmem>>, vector<1x256x64xf32>,
    return
  }
  func.func @transform_0(%arg0: i32) -> (i32, i32, i32, i32) {
    %c0_i32 = arith.constant 0 : i32
    %c0_i32_0 = arith.constant 0 : i32
    %c0_i32_1 = arith.constant 0 : i32
    %c0_i32_2 = arith.constant 0 : i32
    return %arg0, %c0_i32, %c0_i32_0, %c0_i32_1 : i32, i32, i32, i32
  }
  func.func @transform_1(%arg0: i32) -> (i32, i32, i32) {
    %c0_i32 = arith.constant 0 : i32
    %c0_i32_0 = arith.constant 0 : i32
    %c0_i32_1 = arith.constant 0 : i32
    %c0_i32_2 = arith.constant 0 : i32
    return %c0_i32, %c0_i32_0, %c0_i32_1 : i32, i32, i32
  }
  func.func @transform_2(%arg0: i32) -> (i32, i32) {
    %c0_i32 = arith.constant 0 : i32
    %c0_i32_0 = arith.constant 0 : i32
    %c0_i32_1 = arith.constant 0 : i32
    return %c0_i32, %c0_i32_0 : i32, i32
  }
  func.func @transform_3(%arg0: i32) -> (i32, i32, i32) {
    %c0_i32 = arith.constant 0 : i32
    %c0_i32_0 = arith.constant 0 : i32
    %c0_i32_1 = arith.constant 0 : i32
    return %arg0, %c0_i32, %c0_i32_0 : i32, i32, i32
  }
  func.func @transform_4(%arg0: i32) -> (i32, i32) {
    %c0_i32 = arith.constant 0 : i32
    %c0_i32_0 = arith.constant 0 : i32
    %c0_i32_1 = arith.constant 0 : i32
    return %c0_i32, %c0_i32_0 : i32, i32
  }
  func.func @transform_5(%arg0: i32) -> (i32, i32) {
    %c0_i32 = arith.constant 0 : i32
    %c0_i32_0 = arith.constant 0 : i32
    %c0_i32_1 = arith.constant 0 : i32
    return %c0_i32, %c0_i32_0 : i32, i32
  }
  func.func @transform_6(%arg0: i32) -> (i32, i32, i32) {
    %c0_i32 = arith.constant 0 : i32
    %c0_i32_0 = arith.constant 0 : i32
    %c0_i32_1 = arith.constant 0 : i32
    return %arg0, %c0_i32, %c0_i32_0 : i32, i32, i32
  }
}

</mosaic_0001>

<bundles_post_ra>
// kernel: tpu_custom_call.1
= control target key start
LH: loop header
LB: loop body
LE: loop exit
PB: predicated region body
PF: predicated region fallthrough
CT: control target
= control target key end

     0   :  { %s9017_s21 = smov 0   ;;  %s12371_s0 = inlined_call_operand.vmem [shape: bf16[2,18,18,36], index: 0, kind: input, shape index: {}]   ;;  %s12372_s1 = inlined_call_operand.vmem [shape: bf16[9,36,128], index: 1, kind: input, shape index: {}]   ;;  %s12373_s2 = inlined_call_operand.vmem [shape: f32[1,128], index: 2, kind: input, shape index: {}]   ;;  %s12374_s3 = inlined_call_operand.vmem [shape: f32[2,256,32], index: 3, kind: input, shape index: {}]   ;;  %s12375_s4 = inlined_call_operand.vmem [shape: f32[256,32], index: 4, kind: input, shape index: {}]   ;;  %s12376_s5 = inlined_call_operand.vmem [shape: f32[256,32], index: 5, kind: input, shape index: {}]   ;;  %s12377_s6 = inlined_call_operand.vmem [shape: f32[2,256,64], index: 6, kind: output, shape index: {}]  }
   0x1 LB: > { %s7031_s22 = sadd.s32 4294967295, %s8977_s21   ;;  %p7035_p0 = scmp.ge.s32.totalorder %s8977_s21, 1  ;;  %s8977_s21 = sphi %s9017_s21, %s16_s21  }
   0x2   : > { %p222_p1 = scmp.lt.s32.totalorder %s8977_s21, 3 }
   0x4   : > { %p223_p2 = pnand %p7035_p0, %p222_p1 }
   0x6   : > { %226 = sbr.rel (%p223_p2) target bundleno = 1370 (0x55a), region = 44 }
   0xd   : > { %v8566_v0 = vld [vmem:[%s12372_s1 + $0x14] sm:$0xff]   ;;  %p257_p3 = scmp.lt.s32.totalorder %s7031_s22, 1  ;;  %v8568_v2 = vld [vmem:[%s12372_s1 + $0x1c] sm:$0xff]   ;;  %vm831_vm0 = vcmask 1041408   ;;  %vm326_vm1 = vsmask.f32 3328 }
   0xe   : > { %v8567_v1 = vld [vmem:[%s12372_s1 + $0x50] sm:$0xff]   ;;  %7940 = vmatprep.subr.bf16.mxu1 %v8566_v0  ;;  %v8569_v3 = vld [vmem:[%s12372_s1 + $0x58] sm:$0xff]   ;;  %v8570_v4 = vld [vmem:[%s12372_s1 + $0x24] ss:$0 sps:$4 sm:$0x33]   ;;  %vm782_vm4 = vcmask 293888  }
   0xf   : > { %8092 = vmatprep.subr.bf16.mxu0 %v8567_v1  ;;  %7941 = vmatpush3.bf16.msra.mxu1 %v8566_v0  ;;  %s12625_s22 = smov (!%p257_p3, %s7031_s22), 1  ;;  %v8571_v5 = vld [vmem:[%s12372_s1 + $0x60] ss:$0 sps:$4 sm:$0x33]   ;;  %v833_v6 = vsel %vm831_vm0, %v8570_v4, 0  ;;  %v9063_v9 = vld [vmem:[%s12372_s1 + $0x64] sm:$0xff]  }
  0x10   : > { %8093 = vmatpush3.bf16.msra.mxu0 %v8567_v1  ;;  %7942 = vmatprep.subr.bf16.mxu1 %v8568_v2  ;;  %s8554_s11 = smul.u32 216, %s12625_s22  ;;  %vm327_vm2 = vsmask.f32 7440  ;;  %v9050_v7 = vld [vmem:[%s12372_s1] sm:$0xff]   ;;  %v9053_v8 = vsel %vm831_vm0, %v8571_v5, 0  ;;  %vm1351_vm5 = vcmask 1042432  }
  0x11   : > { %8094 = vmatprep.subr.bf16.mxu0 %v8569_v3  ;;  %12440 = vst [vmem:[#allocation2_spill] sm:$0xff] %v9053_v8  ;;  %vm9086_vm3 = vmor %vm326_vm1, %vm327_vm2  ;;  %vm1352_vm6 = vcmask 1046532   ;;  %s7767_s12 = sshll.u32 %s12625_s22, 8  ;;  %s8979_s17 = smov 32   ;;  %vm5099_vm8 = vcmask 261120   ;;  %vm6931_vm9 = vcmask 523264  }
  0x12   : > { %s9058_s16 = scalar_lea.vmem %s12371_s0, %s8554_s11  ;;  %vm9328_vm7 = vmor %vm1351_vm5, %vm1352_vm6  ;;  %s10198_s15 = scalar_lea.vmem %s12374_s3, %s7767_s12 }
  0x13   : > { %7943 = vmatpush3.bf16.msra.mxu1 %v8568_v2  ;;  %v273_v10 = vld [vmem:[%s9058_s16] sm:$0xf]  ;;  %v274_v11 = vld [vmem:[%s9058_s16 + $0x4] sm:$0xf]  ;;  %v310_v12 = vld [vmem:[%s9058_s16 + $0x8] sm:$0x1]  ;;  %s12206_s25 = scalar_lea.vmem %s12377_s6, %s7767_s12 }
  0x14   : > { %8095 = vmatpush3.bf16.msra.mxu0 %v8569_v3  ;;  %8544 = vmatprep.subr.msk.bf16.mxu1 %vm831_vm0, %v8570_v4  ;;  %v330_v13 = vshrl.u32 %v273_v10, 16  ;;  %v333_v14 = vshll.u32 %v273_v10, 16  ;;  %v339_v15 = vshll.u32 %v274_v11, 16  ;;  %v343_v16 = vshrl.u32 %v274_v11, 16  ;;  %v7244_v17 = vld [vmem:[%s9058_s16 + $0xc] sm:$0xf] }
  0x15   : > { %8548 = vmatprep.subr.msk.bf16.mxu0 %vm831_vm0, %v8571_v5  ;;  %v349_v18 = vshll.u32 %v310_v12, 16  ;;  %v9072_v19 = vld [vmem:[%s9058_s16 + $0x10] sm:$0xf]  ;;  %v9075_v20 = vld [vmem:[%s9058_s16 + $0x14] sm:$0x1]  ;;  %v2206_v26 = vshrl.u32 %v7244_v17, 16 }
  0x16   : > { %v332_v21 = vrot.slane %v330_v13, 4  ;;  %v335_v22 = vrot.slane %v333_v14, 5  ;;  %v341_v23 = vrot.slane %v339_v15, 5  ;;  %v345_v24 = vrot.slane %v343_v16, 4  ;;  %v275_v33 = vld [vmem:[%s9058_s16 + $0xc] sm:$0xf] }
  0x17   : > { %7945 = vmatpush3.bf16.msra.mxu1 %v833_v6  ;;  %v351_v25 = vrot.slane %v349_v18, 5  ;;  %v2209_v27 = vshll.u32 %v7244_v17, 16  ;;  %v2215_v28 = vshll.u32 %v9072_v19, 16  ;;  %v2219_v31 = vshrl.u32 %v9072_v19, 16  ;;  %v276_v38 = vld [vmem:[%s9058_s16 + $0x10] sm:$0xf] }
  0x18   : > { %8097 = vmatpush3.bf16.msra.mxu0 %v9053_v8  ;;  %7978 = vmatprep.subr.bf16.mxu1 %v9050_v7  ;;  %v336_v29 = vor.u32 %v335_v22, %v332_v21  ;;  %v346_v30 = vor.u32 %v345_v24, %v341_v23  ;;  %v2225_v32 = vshll.u32 %v9075_v20, 16  ;;  %v2208_v35 = vrot.slane %v2206_v26, 4  ;;  %v311_v44 = vld [vmem:[%s9058_s16 + $0x14] sm:$0x1]  ;;  %v7247_v55 = vld [vmem:[%s9058_s16 + $0x18] sm:$0xf] }
  0x19   : > { %8130 = vmatprep.subr.bf16.mxu0 %v9063_v9  ;;  %v2211_v36 = vrot.slane %v2209_v27, 5  ;;  %v2217_v37 = vrot.slane %v2215_v28, 5  ;;  %v2221_v41 = vrot.slane %v2219_v31, 4  ;;  %v354_v45 = vshrl.u32 %v275_v33, 16  ;;  %v9098_v60 = vld [vmem:[%s9058_s16 + $0x1c] sm:$0xf] }
  0x1a   : > { %v337_v39 = vrot.slane %v336_v29, 4  ;;  %v347_v40 = vrot.slane %v346_v30, 4  ;;  %v2227_v43 = vrot.slane %v2225_v32, 5  ;;  %v357_v46 = vshll.u32 %v275_v33, 16  ;;  %v9106_v1 = vld [vmem:[%s9058_s16 + $0x20] sm:$0x1] }
  0x1b   : > { %v2212_v42 = vor.u32 %v2211_v36, %v2208_v35  ;;  %v2222_v49 = vor.u32 %v2221_v41, %v2217_v37  ;;  %v363_v50 = vshll.u32 %v276_v38, 16  ;;  %v356_v53 = vrot.slane %v354_v45, 4  ;;  %v277_v17 = vld [vmem:[%s9058_s16 + $0x18] sm:$0xf]  ;;  %v278_v24 = vld [vmem:[%s9058_s16 + $0x1c] sm:$0xf] }
  0x1c   : > { %v342_v47 = vsel %vm9086_vm3, %v337_v39, %v341_v23  ;;  %v352_v48 = vsel %vm9086_vm3, %v347_v40, %v351_v25  ;;  %v359_v54 = vrot.slane %v357_v46, 5  ;;  %v367_v58 = vshrl.u32 %v276_v38, 16  ;;  %v312_v29 = vld [vmem:[%s9058_s16 + $0x20] sm:$0x1]  ;;  %v7250_v35 = vld [vmem:[%s9058_s16 + $0x24] sm:$0xf] }
  0x1d   : > { %v7046_v51 = vcombine.low %v342_v47, %v352_v48  ;;  %v2213_v52 = vrot.slane %v2212_v42, 4  ;;  %v2223_v56 = vrot.slane %v2222_v49, 4  ;;  %v365_v57 = vrot.slane %v363_v50, 5  ;;  %v9129_v40 = vld [vmem:[%s9058_s16 + $0x28] sm:$0xf]  ;;  %v10953_v34 = vld [vmem:[%s10198_s15 + $0xf8] sm:$0xff] }
  0x1e   : > { %v373_v59 = vshll.u32 %v311_v44, 16  ;;  %v2968_v62 = vrot.slane %v9072_v19, 5  ;;  %v2971_v63 = vrot.slane %v9075_v20, 5  ;;  %v360_v0 = vor.u32 %v359_v54, %v356_v53  ;;  %v8575_v45 = vld [vmem:[%s12372_s1 + $0x8] sm:$0xff]   ;;  %s8980_s28 = smov 64   ;;  %s8981_s11 = smov 96  }
  0x1f   : > { %7946 = vmatprep.mubr.msk.bf16.mxu1 %vm782_vm4, %v7046_v51  ;;  %v2218_v61 = vsel %vm9086_vm3, %v2213_v52, %v2217_v37  ;;  %v2228_v2 = vsel %vm9086_vm3, %v2223_v56, %v2227_v43  ;;  %v369_v3 = vrot.slane %v367_v58, 4  ;;  %v2230_v5 = vshrl.u32 %v7247_v55, 16  ;;  %v9138_v52 = vld [vmem:[%s9058_s16 + $0x2c] sm:$0x1] }
  0x20   : > { %v375_v4 = vrot.slane %v373_v59, 5  ;;  %v7297_v6 = vcombine.low %v2218_v61, %v2228_v2  ;;  %v361_v10 = vrot.slane %v360_v0, 4  ;;  %v2233_v11 = vshll.u32 %v7247_v55, 16  ;;  %v279_v59 = vld [vmem:[%s9058_s16 + $0x24] sm:$0xf] }
  0x21   : > { %v2239_v12 = vshll.u32 %v9098_v60, 16  ;;  %v370_v13 = vor.u32 %v369_v3, %v365_v57  ;;  %v2232_v14 = vrot.slane %v2230_v5, 4  ;;  %v2243_v15 = vshrl.u32 %v9098_v60, 16  ;;  %v8574_v5 = vld [vmem:[%s12372_s1 + $0x6c] sm:$0xff]  }
  0x22   : > { %v2249_v16 = vshll.u32 %v9106_v1, 16  ;;  %8098 = vmatprep.mubr.msk.bf16.mxu0 %vm782_vm4, %v7297_v6  ;;  %v366_v18 = vsel %vm9086_vm3, %v361_v10, %v365_v57  ;;  %v2235_v21 = vrot.slane %v2233_v11, 5  ;;  %v2975_v23 = vrot.slane %v9098_v60, 5  ;;  %v8579_v60 = vld [vmem:[%s12372_s1 + $0x80] sm:$0xff]  }
  0x23   : > { %v2241_v22 = vrot.slane %v2239_v12, 5  ;;  %v371_v25 = vrot.slane %v370_v13, 4  ;;  %v2245_v26 = vrot.slane %v2243_v15, 4  ;;  %v2978_v28 = vrot.slane %v9106_v1, 5 }
  0x24   : > { %v2251_v27 = vrot.slane %v2249_v16, 5  ;;  %v2236_v30 = vor.u32 %v2235_v21, %v2232_v14  ;;  %v9123_v31 = vrot.slane %v2975_v23, 4  ;;  %v378_v32 = vshrl.u32 %v277_v17, 16  ;;  %v313_v14 = vld [vmem:[%s9058_s16 + $0x2c] sm:$0x1] }
  0x25   : > { %v381_v33 = vshll.u32 %v277_v17, 16  ;;  %v376_v36 = vsel %vm9086_vm3, %v371_v25, %v375_v4  ;;  %v2246_v37 = vor.u32 %v2245_v26, %v2241_v22  ;;  %v387_v38 = vshll.u32 %v278_v24, 16  ;;  %v280_v4 = vld [vmem:[%s9058_s16 + $0x28] sm:$0xf] }
  0x26   : > { %v391_v39 = vshrl.u32 %v278_v24, 16  ;;  %v7047_v41 = vcombine.low %v366_v18, %v376_v36  ;;  %v2237_v42 = vrot.slane %v2236_v30, 4  ;;  %v380_v43 = vrot.slane %v378_v32, 4  ;;  %v7253_v24 = vld [vmem:[%s9058_s16 + $0x30] sm:$0xf] }
  0x27   : > { %v383_v44 = vrot.slane %v381_v33, 5  ;;  %v2247_v46 = vrot.slane %v2246_v37, 4  ;;  %v389_v47 = vrot.slane %v387_v38, 5  ;;  %v397_v49 = vshll.u32 %v312_v29, 16  ;;  %v9160_v30 = vld [vmem:[%s9058_s16 + $0x34] sm:$0xf] }
  0x28   : > { %v393_v48 = vrot.slane %v391_v39, 4  ;;  %7947 = vmatmul.mubr.msk.bf16.vlgmr.msra.gmra.mrb[0].mxu1 %vm782_vm4, %v7047_v41  ;;  %v2242_v50 = vsel %vm9086_vm3, %v2237_v42, %v2241_v22  ;;  %v2254_v53 = vshrl.u32 %v7250_v35, 16  ;;  %v2257_v54 = vshll.u32 %v7250_v35, 16  ;;  %v9163_v36 = vld [vmem:[%s9058_s16 + $0x38] sm:$0x1] }
  0x29   : > { %v384_v51 = vor.u32 %v383_v44, %v380_v43  ;;  %7979 = vmatpush3.bf16.msra.mxu1 %v9050_v7  ;;  %v2252_v55 = vsel %vm9086_vm3, %v2247_v46, %v2251_v27  ;;  %v399_v57 = vrot.slane %v397_v49, 5  ;;  %v2263_v58 = vshll.u32 %v9129_v40, 16  ;;  %v281_v42 = vld [vmem:[%s9058_s16 + $0x30] sm:$0xf] }
  0x2a   : > { %v394_v56 = vor.u32 %v393_v48, %v389_v47  ;;  %v7298_v61 = vcombine.low %v2242_v50, %v2252_v55  ;;  %v2256_v2 = vrot.slane %v2254_v53, 4  ;;  %v2259_v3 = vrot.slane %v2257_v54, 5  ;;  %7980 = vmatprep.subr.bf16.mxu1 %v8575_v45 }
  0x2b   : > { %v385_v0 = vrot.slane %v384_v51, 4  ;;  %v2265_v6 = vrot.slane %v2263_v58, 5  ;;  %v2267_v10 = vshrl.u32 %v9129_v40, 16  ;;  %v2273_v11 = vshll.u32 %v9138_v52, 16  ;;  %v282_v51 = vld [vmem:[%s9058_s16 + $0x34] sm:$0xf] }
  0x2c   : > { %v395_v7 = vrot.slane %v394_v56, 4  ;;  %8099 = vmatmul.mubr.msk.bf16.vlgmr.msra.gmra.mrb[0].mxu0 %vm782_vm4, %v7298_v61  ;;  %v2260_v13 = vor.u32 %v2259_v3, %v2256_v2  ;;  %v402_v15 = vshrl.u32 %v279_v59, 16  ;;  %v405_v16 = vshll.u32 %v279_v59, 16  ;;  %v314_v2 = vld [vmem:[%s9058_s16 + $0x38] sm:$0x1] }
  0x2d   : > { %v390_v12 = vsel %vm9086_vm3, %v385_v0, %v389_v47  ;;  %8131 = vmatpush3.bf16.msra.mxu0 %v9063_v9  ;;  %v2269_v18 = vrot.slane %v2267_v10, 4  ;;  %v2275_v21 = vrot.slane %v2273_v11, 5  ;;  %v411_v22 = vshll.u32 %v280_v4, 16  ;;  %7981 = vmatpush3.bf16.msra.mxu1 %v8575_v45 }
  0x2e   : > { %v400_v17 = vsel %vm9086_vm3, %v395_v7, %v399_v57  ;;  %v2261_v26 = vrot.slane %v2260_v13, 4  ;;  %v404_v27 = vrot.slane %v402_v15, 4  ;;  %v407_v29 = vrot.slane %v405_v16, 5  ;;  %8132 = vmatprep.subr.bf16.mxu0 %v8574_v5  ;;  %v9178_v57 = vld [vmem:[%s12372_s1 + $0x74] ss:$0 sps:$4 sm:$0x33]  }
  0x2f   : > { %v7048_v25 = vcombine.low %v390_v12, %v400_v17  ;;  %v2270_v32 = vor.u32 %v2269_v18, %v2265_v6  ;;  %v413_v33 = vrot.slane %v411_v22, 5  ;;  %v415_v9 = vshrl.u32 %v280_v4, 16  ;;  %v7256_v13 = vld [vmem:[%s9058_s16 + $0x3c] sm:$0xf]  ;;  %v9190_v18 = vld [vmem:[%s9058_s16 + $0x40] sm:$0xf] }
  0x30   : > { %v421_v35 = vshll.u32 %v313_v14, 16  ;;  %v2266_v37 = vsel %vm9086_vm3, %v2261_v26, %v2265_v6  ;;  %v408_v38 = vor.u32 %v407_v29, %v404_v27  ;;  %v2278_v39 = vshrl.u32 %v7253_v24, 16 }
  0x31   : > { %7950 = vmatprep.mubr.msk.bf16.mxu1 %vm782_vm4, %v7048_v25  ;;  %v2281_v41 = vshll.u32 %v7253_v24, 16  ;;  %v2271_v43 = vrot.slane %v2270_v32, 4  ;;  %v417_v44 = vrot.slane %v415_v9, 4  ;;  %v2287_v46 = vshll.u32 %v9160_v30, 16  ;;  %8133 = vmatpush3.bf16.msra.mxu0 %v8574_v5  ;;  %v9195_v32 = vld [vmem:[%s9058_s16 + $0x44] sm:$0x1] }
  0x32   : > { %v423_v45 = vrot.slane %v421_v35, 5  ;;  %v409_v47 = vrot.slane %v408_v38, 4  ;;  %v2280_v48 = vrot.slane %v2278_v39, 4  ;;  %v2291_v50 = vshrl.u32 %v9160_v30, 16  ;;  %8550 = vmatprep.subr.msk.bf16.mxu0 %vm831_vm0, %v9178_v57  ;;  %v283_v39 = vld [vmem:[%s9058_s16 + $0x3c] sm:$0xf] }
  0x33   : > { %v2283_v49 = vrot.slane %v2281_v41, 5  ;;  %v2276_v53 = vsel %vm9086_vm3, %v2271_v43, %v2275_v21  ;;  %v418_v54 = vor.u32 %v417_v44, %v413_v33  ;;  %v2289_v55 = vrot.slane %v2287_v46, 5 }
  0x34   : > { %v2297_v56 = vshll.u32 %v9163_v36, 16  ;;  %v7299_v58 = vcombine.low %v2266_v37, %v2276_v53  ;;  %v414_v59 = vsel %vm9086_vm3, %v409_v47, %v413_v33  ;;  %v2293_v0 = vrot.slane %v2291_v50, 4  ;;  %v315_v53 = vld [vmem:[%s9058_s16 + $0x44] sm:$0x1] }
  0x35   : > { %v2284_v61 = vor.u32 %v2283_v49, %v2280_v48  ;;  %v419_v3 = vrot.slane %v418_v54, 4  ;;  %v426_v5 = vshrl.u32 %v281_v42, 16  ;;  %v429_v7 = vshll.u32 %v281_v42, 16 }
  0x36   : > { %v2299_v4 = vrot.slane %v2297_v56, 5  ;;  %8102 = vmatprep.mubr.msk.bf16.mxu0 %vm782_vm4, %v7299_v58  ;;  %v2294_v10 = vor.u32 %v2293_v0, %v2289_v55  ;;  %v435_v11 = vshll.u32 %v282_v51, 16  ;;  %v439_v12 = vshrl.u32 %v282_v51, 16  ;;  %v7259_v0 = vld [vmem:[%s9058_s16 + $0x48] sm:$0xf] }
  0x37   : > { %v2285_v6 = vrot.slane %v2284_v61, 4  ;;  %v424_v14 = vsel %vm9086_vm3, %v419_v3, %v423_v45  ;;  %v428_v15 = vrot.slane %v426_v5, 4  ;;  %v431_v16 = vrot.slane %v429_v7, 5  ;;  %v284_v45 = vld [vmem:[%s9058_s16 + $0x40] sm:$0xf] }
  0x38   : > { %v445_v17 = vshll.u32 %v314_v2, 16  ;;  %v7049_v21 = vcombine.low %v414_v59, %v424_v14  ;;  %v2295_v24 = vrot.slane %v2294_v10, 4  ;;  %v437_v25 = vrot.slane %v435_v11, 5  ;;  %v9211_v2 = vld [vmem:[%s9058_s16 + $0x4c] sm:$0xf] }
  0x39   : > { %v2290_v22 = vsel %vm9086_vm3, %v2285_v6, %v2289_v55  ;;  %v432_v26 = vor.u32 %v431_v16, %v428_v15  ;;  %v441_v27 = vrot.slane %v439_v12, 4  ;;  %v2302_v33 = vshrl.u32 %v7256_v13, 16 }
  0x3a   : > { %v447_v29 = vrot.slane %v445_v17, 5  ;;  %7951 = vmatmul.mubr.msk.bf16.gmra.mrb[4].mxu1 %vm782_vm4, %v7049_v21  ;;  %v2300_v9 = vsel %vm9086_vm3, %v2295_v24, %v2299_v4  ;;  %v2305_v35 = vshll.u32 %v7256_v13, 16  ;;  %v2311_v37 = vshll.u32 %v9190_v18, 16 }
  0x3b   : > { %v2315_v38 = vshrl.u32 %v9190_v18, 16  ;;  %v7300_v41 = vcombine.low %v2290_v22, %v2300_v9  ;;  %v433_v42 = vrot.slane %v432_v26, 4  ;;  %v442_v43 = vor.u32 %v441_v27, %v437_v25  ;;  %v9221_v22 = vld [vmem:[%s9058_s16 + $0x50] sm:$0x1]  ;;  %v285_v9 = vld [vmem:[%s9058_s16 + $0x48] sm:$0xf] }
  0x3c   : > { %v2304_v44 = vrot.slane %v2302_v33, 4  ;;  %v2307_v46 = vrot.slane %v2305_v35, 5  ;;  %v2313_v47 = vrot.slane %v2311_v37, 5  ;;  %v2321_v49 = vshll.u32 %v9195_v32, 16  ;;  %v9228_v35 = vld [vmem:[%s12372_s1 + $0x78] sm:$0xff]  }
  0x3d   : > { %v2317_v48 = vrot.slane %v2315_v38, 4  ;;  %8103 = vmatmul.mubr.msk.bf16.gmra.mrb[4].mxu0 %vm782_vm4, %v7300_v41  ;;  %v438_v50 = vsel %vm9086_vm3, %v433_v42, %v437_v25  ;;  %v443_v51 = vrot.slane %v442_v43, 4  ;;  %v450_v54 = vshrl.u32 %v283_v39, 16  ;;  %v9232_v42 = vld [vmem:[%s9058_s16 + $0x4c] sm:$0xf] }
  0x3e   : > { %v453_v55 = vshll.u32 %v283_v39, 16  ;;  %v2308_v56 = vor.u32 %v2307_v46, %v2304_v44  ;;  %v2323_v59 = vrot.slane %v2321_v49, 5  ;;  %v459_v61 = vshll.u32 %v284_v45, 16  ;;  %v316_v49 = vld [vmem:[%s9058_s16 + $0x50] sm:$0x1] }
  0x3f   : > { %v2318_v58 = vor.u32 %v2317_v48, %v2313_v47  ;;  %v448_v3 = vsel %vm9086_vm3, %v443_v51, %v447_v29  ;;  %v452_v4 = vrot.slane %v450_v54, 4  ;;  %v463_v7 = vshrl.u32 %v284_v45, 16 }
  0x40   : > { %v455_v5 = vrot.slane %v453_v55, 5  ;;  %v7050_v6 = vcombine.low %v438_v50, %v448_v3  ;;  %v2309_v10 = vrot.slane %v2308_v56, 4  ;;  %v461_v12 = vrot.slane %v459_v61, 5  ;;  %v9248_v3 = vld [vmem:[%s9058_s16 + $0x58] sm:$0xf] }
  0x41   : > { %v2319_v11 = vrot.slane %v2318_v58, 4  ;;  %v465_v14 = vrot.slane %v463_v7, 4  ;;  %v469_v15 = vshll.u32 %v315_v53, 16  ;;  %v2326_v16 = vshrl.u32 %v7259_v0, 16  ;;  %v7262_v58 = vld [vmem:[%s9058_s16 + $0x54] sm:$0xf] }
  0x42   : > { %v456_v13 = vor.u32 %v455_v5, %v452_v4  ;;  %7954 = vmatprep.mubr.msk.bf16.mxu1 %vm782_vm4, %v7050_v6  ;;  %v2314_v17 = vsel %vm9086_vm3, %v2309_v10, %v2313_v47  ;;  %v2329_v24 = vshll.u32 %v7259_v0, 16  ;;  %v2335_v25 = vshll.u32 %v9211_v2, 16  ;;  %v9251_v10 = vld [vmem:[%s9058_s16 + $0x5c] sm:$0x1] }
  0x43   : > { %v2324_v21 = vsel %vm9086_vm3, %v2319_v11, %v2323_v59  ;;  %v466_v29 = vor.u32 %v465_v14, %v461_v12  ;;  %v471_v33 = vrot.slane %v469_v15, 5  ;;  %v2328_v37 = vrot.slane %v2326_v16, 4  ;;  %v9254_v11 = vld [vmem:[%s9058_s16 + $0x54] sm:$0xf] }
  0x44   : > { %v7301_v26 = vcombine.low %v2314_v17, %v2324_v21  ;;  %v457_v27 = vrot.slane %v456_v13, 4  ;;  %v2331_v38 = vrot.slane %v2329_v24, 5  ;;  %v2337_v39 = vrot.slane %v2335_v25, 5  ;;  %v9263_v25 = vld [vmem:[%s12372_s1 + $0x10] ss:$0 sps:$4 sm:$0x33]  }
  0x45   : > { %v2339_v41 = vshrl.u32 %v9211_v2, 16  ;;  %v467_v44 = vrot.slane %v466_v29, 4  ;;  %v2345_v45 = vshll.u32 %v9221_v22, 16  ;;  %v3196_v46 = vsel %vm831_vm0, %v9178_v57, 0  ;;  %8545 = vmatprep.subr.msk.bf16.mxu1 %vm831_vm0, %v9263_v25 }
  0x46   : > { %8106 = vmatprep.mubr.msk.bf16.mxu0 %vm782_vm4, %v7301_v26  ;;  %v462_v43 = vsel %vm9086_vm3, %v457_v27, %v461_v12  ;;  %v2332_v47 = vor.u32 %v2331_v38, %v2328_v37  ;;  %8135 = vmatpush3.bf16.msra.mxu0 %v3196_v46  ;;  %v474_v50 = vshrl.u32 %v285_v9, 16  ;;  %v477_v51 = vshll.u32 %v285_v9, 16  ;;  %v9269_v9 = vld [vmem:[%s9058_s16 + $0x58] sm:$0xf] }
  0x47   : > { %v2341_v48 = vrot.slane %v2339_v41, 4  ;;  %v472_v53 = vsel %vm9086_vm3, %v467_v44, %v471_v33  ;;  %v2347_v54 = vrot.slane %v2345_v45, 5  ;;  %v483_v55 = vshll.u32 %v9232_v42, 16  ;;  %8168 = vmatprep.subr.bf16.mxu0 %v9228_v35 }
  0x48   : > { %v487_v56 = vshrl.u32 %v9232_v42, 16  ;;  %v7051_v57 = vcombine.low %v462_v43, %v472_v53  ;;  %v2333_v59 = vrot.slane %v2332_v47, 4  ;;  %v476_v0 = vrot.slane %v474_v50, 4  ;;  %v7265_v53 = vld [vmem:[%s9058_s16 + $0x60] sm:$0xf] }
  0x49   : > { %v2342_v61 = vor.u32 %v2341_v48, %v2337_v39  ;;  %v479_v4 = vrot.slane %v477_v51, 5  ;;  %v485_v5 = vrot.slane %v483_v55, 5  ;;  %v493_v6 = vshll.u32 %v316_v49, 16  ;;  %v317_v49 = vld [vmem:[%s9058_s16 + $0x5c] sm:$0x1] }
  0x4a   : > { %v489_v7 = vrot.slane %v487_v56, 4  ;;  %7955 = vmatmul.mubr.msk.bf16.gmra.mrb[8].mxu1 %vm782_vm4, %v7051_v57  ;;  %v2338_v12 = vsel %vm9086_vm3, %v2333_v59, %v2337_v39  ;;  %v2350_v14 = vshrl.u32 %v7262_v58, 16  ;;  %v2353_v15 = vshll.u32 %v7262_v58, 16  ;;  %v9285_v57 = vld [vmem:[%s9058_s16 + $0x64] sm:$0xf] }
  0x4b   : > { %v2343_v13 = vrot.slane %v2342_v61, 4  ;;  %v480_v16 = vor.u32 %v479_v4, %v476_v0  ;;  %v495_v21 = vrot.slane %v493_v6, 5  ;;  %v2359_v24 = vshll.u32 %v9248_v3, 16 }
  0x4c   : > { %v490_v17 = vor.u32 %v489_v7, %v485_v5  ;;  %v2352_v27 = vrot.slane %v2350_v14, 4  ;;  %v2355_v29 = vrot.slane %v2353_v15, 5  ;;  %v2363_v33 = vshrl.u32 %v9248_v3, 16  ;;  %v9292_v7 = vld [vmem:[%s9058_s16 + $0x60] sm:$0xf] }
  0x4d   : > { %v2348_v26 = vsel %vm9086_vm3, %v2343_v13, %v2347_v54  ;;  %v481_v38 = vrot.slane %v480_v16, 4  ;;  %v2361_v41 = vrot.slane %v2359_v24, 5  ;;  %v2369_v45 = vshll.u32 %v9251_v10, 16 }
  0x4e   : > { %v7302_v37 = vcombine.low %v2338_v12, %v2348_v26  ;;  %v491_v39 = vrot.slane %v490_v17, 4  ;;  %v2356_v43 = vor.u32 %v2355_v29, %v2352_v27  ;;  %v2365_v44 = vrot.slane %v2363_v33, 4 }
  0x4f   : > { %v498_v46 = vshrl.u32 %v9254_v11, 16  ;;  %v486_v47 = vsel %vm9086_vm3, %v481_v38, %v485_v5  ;;  %v501_v50 = vshll.u32 %v9254_v11, 16  ;;  %v507_v51 = vshll.u32 %v9269_v9, 16  ;;  %v9289_v5 = vld [vmem:[%s9058_s16 + $0x68] sm:$0x1] }
  0x50   : > { %8107 = vmatmul.mubr.msk.bf16.gmra.mrb[8].mxu0 %vm782_vm4, %v7302_v37  ;;  %v496_v48 = vsel %vm9086_vm3, %v491_v39, %v495_v21  ;;  %v2357_v55 = vrot.slane %v2356_v43, 4  ;;  %v2366_v56 = vor.u32 %v2365_v44, %v2361_v41  ;;  %v2371_v58 = vrot.slane %v2369_v45, 5 }
  0x51   : > { %v7052_v54 = vcombine.low %v486_v47, %v496_v48  ;;  %v500_v59 = vrot.slane %v498_v46, 4  ;;  %v503_v61 = vrot.slane %v501_v50, 5  ;;  %v509_v0 = vrot.slane %v507_v51, 5  ;;  %v318_v50 = vld [vmem:[%s9058_s16 + $0x68] sm:$0x1] }
  0x52   : > { %v511_v4 = vshrl.u32 %v9269_v9, 16  ;;  %v2362_v6 = vsel %vm9086_vm3, %v2357_v55, %v2361_v41  ;;  %v2367_v12 = vrot.slane %v2366_v56, 4  ;;  %v517_v13 = vshll.u32 %v317_v49, 16  ;;  %v9302_v41 = vld [vmem:[%s9058_s16 + $0x64] sm:$0xf] }
  0x53   : > { %7958 = vmatprep.mubr.msk.bf16.mxu1 %vm782_vm4, %v7052_v54  ;;  %v2374_v14 = vshrl.u32 %v7265_v53, 16  ;;  %v504_v15 = vor.u32 %v503_v61, %v500_v59  ;;  %v2377_v17 = vshll.u32 %v7265_v53, 16  ;;  %v2383_v21 = vshll.u32 %v9285_v57, 16 }
  0x54   : > { %v513_v16 = vrot.slane %v511_v4, 4  ;;  %v2372_v24 = vsel %vm9086_vm3, %v2367_v12, %v2371_v58  ;;  %v519_v26 = vrot.slane %v517_v13, 5  ;;  %v2387_v29 = vshrl.u32 %v9285_v57, 16  ;;  %v7332_v58 = vld [vmem:[%s9058_s16 + $0xc] sm:$0xe] }
  0x55   : > { %v2376_v27 = vrot.slane %v2374_v14, 4  ;;  %v7303_v33 = vcombine.low %v2362_v6, %v2372_v24  ;;  %v505_v37 = vrot.slane %v504_v15, 4  ;;  %v2379_v39 = vrot.slane %v2377_v17, 5  ;;  %v9322_v24 = vld [vmem:[%s9058_s16 + $0x70] sm:$0xf] }
  0x56   : > { %v514_v38 = vor.u32 %v513_v16, %v509_v0  ;;  %v2385_v43 = vrot.slane %v2383_v21, 5  ;;  %v2389_v44 = vrot.slane %v2387_v29, 4  ;;  %v2393_v45 = vshll.u32 %v9289_v5, 16 }
  0x57   : > { %v522_v46 = vshrl.u32 %v9292_v7, 16  ;;  %8110 = vmatprep.mubr.msk.bf16.mxu0 %vm782_vm4, %v7303_v33  ;;  %v510_v47 = vsel %vm9086_vm3, %v505_v37, %v509_v0  ;;  %v2380_v49 = vor.u32 %v2379_v39, %v2376_v27  ;;  %v525_v51 = vshll.u32 %v9292_v7, 16  ;;  %v9317_v0 = vld [vmem:[%s9058_s16 + $0x6c] sm:$0xf] }
  0x58   : > { %v515_v48 = vrot.slane %v514_v38, 4  ;;  %v2390_v53 = vor.u32 %v2389_v44, %v2385_v43  ;;  %v2395_v54 = vrot.slane %v2393_v45, 5  ;;  %v531_v56 = vshll.u32 %v9302_v41, 16  ;;  %v319_v44 = vld [vmem:[%s9058_s16 + $0x74] sm:$0x1] }
  0x59   : > { %v524_v55 = vrot.slane %v522_v46, 4  ;;  %v2381_v61 = vrot.slane %v2380_v49, 4  ;;  %v527_v4 = vrot.slane %v525_v51, 5  ;;  %v535_v6 = vshrl.u32 %v9302_v41, 16  ;;  %v9348_v51 = vld [vmem:[%s9058_s16 + $0x78] sm:$0xf] }
  0x5a   : > { %v520_v59 = vsel %vm9086_vm3, %v515_v48, %v519_v26  ;;  %v2391_v13 = vrot.slane %v2390_v53, 4  ;;  %v533_v14 = vrot.slane %v531_v56, 5  ;;  %v541_v15 = vshll.u32 %v318_v50, 16  ;;  %v7333_v50 = vld [vmem:[%s9058_s16 + $0x18] sm:$0xe] }
  0x5b   : > { %v7053_v12 = vcombine.low %v510_v47, %v520_v59  ;;  %v2386_v16 = vsel %vm9086_vm3, %v2381_v61, %v2385_v43  ;;  %v528_v17 = vor.u32 %v527_v4, %v524_v55  ;;  %v537_v21 = vrot.slane %v535_v6, 4  ;;  %v320_v6 = vld [vmem:[%s9058_s16 + $0x80] sm:$0x1] }
  0x5c   : > { %v2396_v26 = vsel %vm9086_vm3, %v2391_v13, %v2395_v54  ;;  %v543_v27 = vrot.slane %v541_v15, 5  ;;  %v12443_v29 = vmov 0  ;;  %v7348_v33 = vrot.slane %v7332_v58, 9  ;;  %v9355_v58 = vld [vmem:[%s9058_s16 + $0x7c] sm:$0xf] }
  0x5d   : > { %7959 = vmatmul.mubr.msk.bf16.gmra.mrb[12].mxu1 %vm782_vm4, %v7053_v12  ;;  %v12444_v29 = vsel %vm9328_vm7, 4294967295, %v12443_v29  ;;  %v2970_v37 = vrot.slane %v2968_v62, 4  ;;  %v7304_v38 = vcombine.low %v2386_v16, %v2396_v26  ;;  %v529_v39 = vrot.slane %v528_v17, 4  ;;  %v7334_v17 = vld [vmem:[%s9058_s16 + $0x24] sm:$0xe] }
  0x5e   : > { %12445 = vst [vmem:[#allocation3_spill] sm:$0xff] %v12444_v29  ;;  %v538_v43 = vor.u32 %v537_v21, %v533_v14  ;;  %v546_v45 = vshrl.u32 %v9317_v0, 16  ;;  %v2969_v46 = vsel %vm9328_vm7, %v7348_v33, %v2968_v62  ;;  %v549_v48 = vshll.u32 %v9317_v0, 16 }
  0x5f   : > { %v2972_v47 = vsel %vm9328_vm7, %v2970_v37, %v2971_v63  ;;  %v555_v49 = vshll.u32 %v9322_v24, 16  ;;  %8111 = vmatmul.mubr.msk.bf16.gmra.mrb[12].mxu0 %vm782_vm4, %v7304_v38  ;;  %v534_v19 = vsel %vm9086_vm3, %v529_v39, %v533_v14  ;;  %v559_v63 = vshrl.u32 %v9322_v24, 16  ;;  %v9377_v38 = vld [vmem:[%s9058_s16 + $0x84] sm:$0xf] }
  0x60   : > { %v539_v53 = vrot.slane %v538_v43, 4  ;;  %v7369_v62 = vcombine.low %v2969_v46, %v2972_v47  ;;  %v548_v54 = vrot.slane %v546_v45, 4  ;;  %v551_v20 = vrot.slane %v549_v48, 5  ;;  %v9383_v45 = vld [vmem:[%s9058_s16 + $0x88] sm:$0xf] }
  0x61   : > { %v557_v55 = vrot.slane %v555_v49, 5  ;;  %v565_v56 = vshll.u32 %v319_v44, 16  ;;  %v7349_v61 = vrot.slane %v7333_v50, 9  ;;  %v2979_v4 = vsel %vm9328_vm7, %v9123_v31, %v2978_v28  ;;  %v321_v50 = vld [vmem:[%s9058_s16 + $0x8c] sm:$0x1] }
  0x62   : > { %v544_v59 = vsel %vm9086_vm3, %v539_v53, %v543_v27  ;;  %8136 = vmatprep.mubr.msk.bf16.mxu0 %vm782_vm4, %v7369_v62  ;;  %v570_v12 = vshrl.u32 %v9348_v51, 16  ;;  %v552_v14 = vor.u32 %v551_v20, %v548_v54  ;;  %v561_v15 = vrot.slane %v559_v63, 4  ;;  %v7335_v20 = vld [vmem:[%s9058_s16 + $0x30] sm:$0xe] }
  0x63   : > { %v7054_v13 = vcombine.low %v534_v19, %v544_v59  ;;  %v567_v16 = vrot.slane %v565_v56, 5  ;;  %v2976_v21 = vsel %vm9328_vm7, %v7349_v61, %v2975_v23  ;;  %v573_v26 = vshll.u32 %v9348_v51, 16  ;;  %v9401_v59 = vld [vmem:[%s12372_s1 + $0x88] ss:$0 sps:$4 sm:$0x33]  }
  0x64   : > { %v572_v1 = vrot.slane %v570_v12, 4  ;;  %v579_v28 = vshll.u32 %v9355_v58, 16  ;;  %v553_v31 = vrot.slane %v552_v14, 4  ;;  %v562_v27 = vor.u32 %v561_v15, %v557_v55 }
  0x65   : > { %7962 = vmatprep.mubr.msk.bf16.mxu1 %vm782_vm4, %v7054_v13  ;;  %v7370_v33 = vcombine.low %v2976_v21, %v2979_v4  ;;  %v583_v37 = vshrl.u32 %v9355_v58, 16  ;;  %v575_v23 = vrot.slane %v573_v26, 5  ;;  %v589_v43 = vshll.u32 %v320_v6, 16 }
  0x66   : > { %v581_v39 = vrot.slane %v579_v28, 5  ;;  %v7350_v44 = vrot.slane %v7334_v17, 9  ;;  %v558_v46 = vsel %vm9086_vm3, %v553_v31, %v557_v55  ;;  %v563_v47 = vrot.slane %v562_v27, 4 }
  0x67   : > { %v585_v48 = vrot.slane %v583_v37, 4  ;;  %v2982_v49 = vrot.slane %v9129_v40, 5  ;;  %8137 = vmatmul.mubr.msk.bf16.vlgmr.msra.gmra.mrb[0].mxu0 %vm782_vm4, %v7370_v33  ;;  %v576_v19 = vor.u32 %v575_v23, %v572_v1  ;;  %v591_v53 = vrot.slane %v589_v43, 5  ;;  %v9412_v1 = vld [vmem:[%s9058_s16 + $0x90] sm:$0xf]  ;;  %v9419_v33 = vld [vmem:[%s12372_s1 + $0x28] sm:$0xff]  }
  0x68   : > { %v2985_v62 = vrot.slane %v9138_v52, 5  ;;  %v594_v54 = vshrl.u32 %v9377_v38, 16  ;;  %v568_v63 = vsel %vm9086_vm3, %v563_v47, %v567_v16  ;;  %8169 = vmatpush3.bf16.msra.mxu0 %v9228_v35  ;;  %v597_v6 = vshll.u32 %v9377_v38, 16 }
  0x69   : > { %v586_v55 = vor.u32 %v585_v48, %v581_v39  ;;  %v2983_v56 = vsel %vm9328_vm7, %v7350_v44, %v2982_v49  ;;  %v2984_v40 = vrot.slane %v2982_v49, 4  ;;  %v7055_v52 = vcombine.low %v558_v46, %v568_v63  ;;  %8170 = vmatprep.subr.bf16.mxu0 %v8579_v60  ;;  %v9424_v44 = vld [vmem:[%s9058_s16 + $0x94] sm:$0xf]  ;;  %v322_v46 = vld [vmem:[%s9058_s16 + $0x98] sm:$0x1] }
  0x6a   : > { %v577_v61 = vrot.slane %v576_v19, 4  ;;  %v596_v4 = vrot.slane %v594_v54, 4  ;;  %v603_v13 = vshll.u32 %v9383_v45, 16  ;;  %v607_v14 = vshrl.u32 %v9383_v45, 16  ;;  %v9439_v54 = vld [vmem:[%s9058_s16 + $0x9c] sm:$0xf] }
  0x6b   : > { %v587_v12 = vrot.slane %v586_v55, 4  ;;  %v2986_v35 = vsel %vm9328_vm7, %v2984_v40, %v2985_v62  ;;  %7963 = vmatmul.mubr.msk.bf16.gmra.mrb[16].mxu1 %vm782_vm4, %v7055_v52  ;;  %v599_v17 = vrot.slane %v597_v6, 5  ;;  %v613_v21 = vshll.u32 %v321_v50, 16  ;;  %v7336_v50 = vld [vmem:[%s9058_s16 + $0x3c] sm:$0xe] }
  0x6c   : > { %v582_v15 = vsel %vm9086_vm3, %v577_v61, %v581_v39  ;;  %v7371_v16 = vcombine.low %v2983_v56, %v2986_v35  ;;  %v605_v28 = vrot.slane %v603_v13, 5  ;;  %v609_v31 = vrot.slane %v607_v14, 4  ;;  %8171 = vmatpush3.bf16.msra.mxu0 %v8579_v60  ;;  %v9444_v55 = vld [vmem:[%s9058_s16 + $0xa0] sm:$0xf] }
  0x6d   : > { %v592_v26 = vsel %vm9086_vm3, %v587_v12, %v591_v53  ;;  %v7351_v27 = vrot.slane %v7335_v20, 9  ;;  %v600_v23 = vor.u32 %v599_v17, %v596_v4  ;;  %v615_v39 = vrot.slane %v613_v21, 5  ;;  %8551 = vmatprep.subr.msk.bf16.mxu0 %vm831_vm0, %v9401_v59  ;;  %v323_v17 = vld [vmem:[%s9058_s16 + $0xa4] sm:$0x1]  ;;  %v7337_v21 = vld [vmem:[%s9058_s16 + $0x48] sm:$0xe] }
  0x6e   : > { %v7056_v37 = vcombine.low %v582_v15, %v592_v26  ;;  %8140 = vmatprep.mubr.msk.bf16.mxu0 %vm782_vm4, %v7371_v16  ;;  %v2989_v43 = vrot.slane %v9160_v30, 5  ;;  %v610_v60 = vor.u32 %v609_v31, %v605_v28  ;;  %v2992_v47 = vrot.slane %v9163_v36, 5 }
  0x6f   : > { %v1140_v48 = vsel %vm831_vm0, %v9263_v25, 0  ;;  %v618_v49 = vshrl.u32 %v9412_v1, 16  ;;  %v601_v19 = vrot.slane %v600_v23, 4  ;;  %v621_v62 = vshll.u32 %v9412_v1, 16 }
  0x70   : > { %7966 = vmatprep.mubr.msk.bf16.mxu1 %vm782_vm4, %v7056_v37  ;;  %v2990_v30 = vsel %vm9328_vm7, %v7351_v27, %v2989_v43  ;;  %v2991_v53 = vrot.slane %v2989_v43, 4  ;;  %7983 = vmatpush3.bf16.msra.mxu1 %v1140_v48  ;;  %v611_v20 = vrot.slane %v610_v60, 4  ;;  %v627_v63 = vshll.u32 %v9424_v44, 16  ;;  %v9469_v48 = vld [vmem:[%s9058_s16 + $0xac] sm:$0xf] }
  0x71   : > { %v620_v36 = vrot.slane %v618_v49, 4  ;;  %v631_v25 = vshrl.u32 %v9424_v44, 16  ;;  %8016 = vmatprep.subr.bf16.mxu1 %v9419_v33  ;;  %v606_v56 = vsel %vm9086_vm3, %v601_v19, %v605_v28  ;;  %v623_v52 = vrot.slane %v621_v62, 5 }
  0x72   : > { %v2993_v40 = vsel %vm9328_vm7, %v2991_v53, %v2992_v47  ;;  %v637_v61 = vshll.u32 %v322_v46, 16  ;;  %v616_v4 = vsel %vm9086_vm3, %v611_v20, %v615_v39  ;;  %v629_v12 = vrot.slane %v627_v63, 5  ;;  %v9464_v46 = vld [vmem:[%s9058_s16 + $0xa8] sm:$0xf] }
  0x73   : > { %v7372_v6 = vcombine.low %v2990_v30, %v2993_v40  ;;  %v633_v35 = vrot.slane %v631_v25, 4  ;;  %v7057_v13 = vcombine.low %v606_v56, %v616_v4  ;;  %v624_v14 = vor.u32 %v623_v52, %v620_v36  ;;  %v324_v52 = vld [vmem:[%s9058_s16 + $0xb0] sm:$0x1] }
  0x74   : > { %v639_v15 = vrot.slane %v637_v61, 5  ;;  %v7352_v16 = vrot.slane %v7336_v50, 9  ;;  %v2996_v28 = vrot.slane %v9190_v18, 5  ;;  %v2999_v31 = vrot.slane %v9195_v32, 5 }
  0x75   : > { %8141 = vmatmul.mubr.msk.bf16.gmra.mrb[4].mxu0 %vm782_vm4, %v7372_v6  ;;  %v634_v26 = vor.u32 %v633_v35, %v629_v12  ;;  %v642_v27 = vshrl.u32 %v9439_v54, 16  ;;  %7967 = vmatmul.mubr.msk.bf16.gmra.mrb[20].mxu1 %vm782_vm4, %v7057_v13  ;;  %v625_v37 = vrot.slane %v624_v14, 4  ;;  %v645_v23 = vshll.u32 %v9439_v54, 16  ;;  %v7338_v35 = vld [vmem:[%s9058_s16 + $0x54] sm:$0xe] }
  0x76   : > { %v651_v39 = vshll.u32 %v9444_v55, 16  ;;  %v655_v43 = vshrl.u32 %v9444_v55, 16  ;;  %v2997_v47 = vsel %vm9328_vm7, %v7352_v16, %v2996_v28  ;;  %v2998_v18 = vrot.slane %v2996_v28, 4 }
  0x77   : > { %v635_v60 = vrot.slane %v634_v26, 4  ;;  %v644_v32 = vrot.slane %v642_v27, 4  ;;  %v630_v49 = vsel %vm9086_vm3, %v625_v37, %v629_v12  ;;  %v647_v50 = vrot.slane %v645_v23, 5  ;;  %v9497_v23 = vld [vmem:[%s9058_s16 + $0xb8] sm:$0xf] }
  0x78   : > { %v653_v19 = vrot.slane %v651_v39, 5  ;;  %v657_v30 = vrot.slane %v655_v43, 4  ;;  %v3000_v62 = vsel %vm9328_vm7, %v2998_v18, %v2999_v31  ;;  %v661_v20 = vshll.u32 %v323_v17, 16  ;;  %v9487_v17 = vld [vmem:[%s9058_s16 + $0xb4] sm:$0xf] }
  0x79   : > { %v640_v53 = vsel %vm9086_vm3, %v635_v60, %v639_v15  ;;  %v7353_v36 = vrot.slane %v7337_v21, 9  ;;  %v7373_v25 = vcombine.low %v2997_v47, %v3000_v62  ;;  %v648_v56 = vor.u32 %v647_v50, %v644_v32  ;;  %v325_v18 = vld [vmem:[%s9058_s16 + $0xbc] sm:$0x1] }
  0x7a   : > { %v7058_v63 = vcombine.low %v630_v49, %v640_v53  ;;  %v658_v40 = vor.u32 %v657_v30, %v653_v19  ;;  %v663_v61 = vrot.slane %v661_v20, 5  ;;  %v3003_v4 = vrot.slane %v9211_v2, 5 }
  0x7b   : > { %v3006_v6 = vrot.slane %v9221_v22, 5  ;;  %v666_v12 = vshrl.u32 %v9464_v46, 16  ;;  %8144 = vmatprep.mubr.msk.bf16.mxu0 %vm782_vm4, %v7373_v25  ;;  %v649_v13 = vrot.slane %v648_v56, 4  ;;  %v669_v15 = vshll.u32 %v9464_v46, 16 }
  0x7c   : > { %7970 = vmatprep.mubr.msk.bf16.mxu1 %vm782_vm4, %v7058_v63  ;;  %v659_v14 = vrot.slane %v658_v40, 4  ;;  %v675_v16 = vshll.u32 %v9469_v48, 16  ;;  %v3004_v2 = vsel %vm9328_vm7, %v7353_v36, %v3003_v4  ;;  %v3005_v22 = vrot.slane %v3003_v4, 4  ;;  %v7339_v36 = vld [vmem:[%s9058_s16 + $0x60] sm:$0xe] }
  0x7d   : > { %v668_v21 = vrot.slane %v666_v12, 4  ;;  %v679_v26 = vshrl.u32 %v9469_v48, 16  ;;  %v654_v28 = vsel %vm9086_vm3, %v649_v13, %v653_v19  ;;  %v671_v27 = vrot.slane %v669_v15, 5  ;;  %v7269_v4 = vld [vmem:[%s9058_s16 + $0x70] sm:$0xf] }
  0x7e   : > { %v664_v31 = vsel %vm9086_vm3, %v659_v14, %v663_v61  ;;  %v677_v37 = vrot.slane %v675_v16, 5  ;;  %v3007_v43 = vsel %vm9328_vm7, %v3005_v22, %v3006_v6  ;;  %v685_v47 = vshll.u32 %v324_v52, 16  ;;  %v7340_v14 = vld [vmem:[%s9058_s16 + $0x6c] sm:$0xe] }
  0x7f   : > { %v7059_v39 = vcombine.low %v654_v28, %v664_v31  ;;  %v681_v60 = vrot.slane %v679_v26, 4  ;;  %v7374_v32 = vcombine.low %v3004_v2, %v3007_v43  ;;  %v672_v49 = vor.u32 %v671_v27, %v668_v21  ;;  %v7270_v21 = vld [vmem:[%s9058_s16 + $0x74] sm:$0x1] }
  0x80   : > { %v7354_v50 = vrot.slane %v7338_v35, 9  ;;  %v3010_v19 = vrot.slane %v9248_v3, 5  ;;  %v687_v53 = vrot.slane %v685_v47, 5  ;;  %v3013_v62 = vrot.slane %v9251_v10, 5 }
  0x81   : > { %7971 = vmatmul.mubr.msk.bf16.gmra.mrb[24].mxu1 %vm782_vm4, %v7059_v39  ;;  %v682_v30 = vor.u32 %v681_v60, %v677_v37  ;;  %v690_v20 = vshrl.u32 %v9487_v17, 16  ;;  %8145 = vmatmul.mubr.msk.bf16.gmra.mrb[8].mxu0 %vm782_vm4, %v7374_v32  ;;  %v673_v63 = vrot.slane %v672_v49, 4  ;;  %v693_v3 = vshll.u32 %v9487_v17, 16  ;;  %v9527_v49 = vld [vmem:[%s9058_s16 + $0x7c] sm:$0xf] }
  0x82   : > { %v3011_v25 = vsel %vm9328_vm7, %v7354_v50, %v3010_v19  ;;  %v3012_v56 = vrot.slane %v3010_v19, 4  ;;  %v699_v61 = vshll.u32 %v9497_v23, 16  ;;  %v703_v10 = vshrl.u32 %v9497_v23, 16 }
  0x83   : > { %v683_v40 = vrot.slane %v682_v30, 4  ;;  %v692_v52 = vrot.slane %v690_v20, 4  ;;  %v678_v6 = vsel %vm9086_vm3, %v673_v63, %v677_v37  ;;  %v695_v35 = vrot.slane %v693_v3, 5  ;;  %v9532_v30 = vld [vmem:[%s9058_s16 + $0x80] sm:$0x1] }
  0x84   : > { %v3014_v12 = vsel %vm9328_vm7, %v3012_v56, %v3013_v62  ;;  %v709_v13 = vshll.u32 %v325_v18, 16  ;;  %v701_v2 = vrot.slane %v699_v61, 5  ;;  %v705_v22 = vrot.slane %v703_v10, 4  ;;  %v8897_v56 = vld [vmem:[%s9058_s16] sm:$0xf] }
  0x85   : > { %v688_v15 = vsel %vm9086_vm3, %v683_v40, %v687_v53  ;;  %v7375_v16 = vcombine.low %v3011_v25, %v3014_v12  ;;  %v696_v28 = vor.u32 %v695_v35, %v692_v52  ;;  %v7355_v27 = vrot.slane %v7339_v36, 9  ;;  %v7275_v36 = vld [vmem:[%s9058_s16 + $0x88] sm:$0xf]  ;;  %v9546_v3 = vld [vmem:[%s9058_s16 + $0x4] sm:$0xf] }
  0x86   : > { %v7060_v26 = vcombine.low %v678_v6, %v688_v15  ;;  %v711_v31 = vrot.slane %v709_v13, 5  ;;  %v706_v37 = vor.u32 %v705_v22, %v701_v2  ;;  %v3017_v39 = vrot.slane %v9285_v57, 5  ;;  %v7276_v52 = vld [vmem:[%s9058_s16 + $0x8c] sm:$0x1]  ;;  %v7342_v61 = vld [vmem:[%s9058_s16 + $0x84] sm:$0xe] }
  0x87   : > { %8148 = vmatprep.mubr.msk.bf16.mxu0 %vm782_vm4, %v7375_v16  ;;  %v3020_v43 = vrot.slane %v9289_v5, 5  ;;  %v7356_v60 = vrot.slane %v7340_v14, 9  ;;  %v697_v47 = vrot.slane %v696_v28, 4  ;;  %v3024_v18 = vrot.slane %v7269_v4, 5  ;;  %v7341_v5 = vld [vmem:[%s9058_s16 + $0x78] sm:$0xe] }
  0x88   : > { %7974 = vmatprep.mubr.msk.bf16.mxu1 %vm782_vm4, %v7060_v26  ;;  %v3027_v32 = vrot.slane %v7270_v21, 5  ;;  %v707_v50 = vrot.slane %v706_v37, 4  ;;  %v3018_v19 = vsel %vm9328_vm7, %v7355_v27, %v3017_v39  ;;  %v3019_v57 = vrot.slane %v3017_v39, 4  ;;  %v7278_v12 = vld [vmem:[%s9058_s16 + $0x94] sm:$0xf] }
  0x89   : > { %v702_v53 = vsel %vm9086_vm3, %v697_v47, %v701_v2  ;;  %v3025_v62 = vsel %vm9328_vm7, %v7356_v60, %v3024_v18  ;;  %v3026_v20 = vrot.slane %v3024_v18, 4  ;;  %v7081_v40 = vcombine.low %v8897_v56, %v9546_v3  ;;  %v7343_v15 = vld [vmem:[%s9058_s16 + $0x90] sm:$0xe]  ;;  %v7279_v22 = vld [vmem:[%s9058_s16 + $0x98] sm:$0x1] }
  0x8a   : > { %v712_v63 = vsel %vm9086_vm3, %v707_v50, %v711_v31  ;;  %v3021_v25 = vsel %vm9328_vm7, %v3019_v57, %v3020_v43  ;;  %v7357_v13 = vrot.slane %v7341_v5, 9  ;;  %v3031_v14 = vrot.slane %v9527_v49, 5  ;;  %v7281_v21 = vld [vmem:[%s9058_s16 + $0xa0] sm:$0xf]  ;;  %v7282_v39 = vld [vmem:[%s9058_s16 + $0xa4] sm:$0x1] }
  0x8b   : > { %v7061_v10 = vcombine.low %v702_v53, %v712_v63  ;;  %v7376_v4 = vcombine.low %v3018_v19, %v3021_v25  ;;  %v3028_v6 = vsel %vm9328_vm7, %v3026_v20, %v3027_v32  ;;  %v3034_v16 = vrot.slane %v9532_v30, 5  ;;  %v7344_v43 = vld [vmem:[%s9058_s16 + $0x9c] sm:$0xe]  ;;  %v9570_v60 = vld [vmem:[%s12372_s1 + $0x8c] sm:$0xff]   ;;  %v8901_v53 = vld [vmem:[%s9058_s16 + $0x18] sm:$0xf] }
  0x8c   : > { %v7377_v35 = vcombine.low %v3025_v62, %v3028_v6  ;;  %v7358_v2 = vrot.slane %v7342_v61, 9  ;;  %v3032_v26 = vsel %vm9328_vm7, %v7357_v13, %v3031_v14  ;;  %v3033_v28 = vrot.slane %v3031_v14, 4  ;;  %v8899_v47 = vld [vmem:[%s9058_s16 + $0xc] sm:$0xf]  ;;  %v9574_v18 = vld [vmem:[%s9058_s16 + $0x10] sm:$0xf] }
  0x8d   : > { %7975 = vmatmul.mubr.msk.bf16.gmra.mrb[28].mxu1 %vm782_vm4, %v7061_v10  ;;  %8149 = vmatmul.mubr.msk.bf16.gmra.mrb[12].mxu0 %vm782_vm4, %v7376_v4  ;;  %v3038_v31 = vrot.slane %v7275_v36, 5  ;;  %v3041_v27 = vrot.slane %v7276_v52, 5  ;;  %v3045_v37 = vrot.slane %v7278_v12, 5  ;;  %v7082_v32 = vcombine.low %v8899_v47, %v9574_v18  ;;  %v9583_v62 = vld [vmem:[%s9058_s16 + $0x1c] sm:$0xf]  ;;  %v8588_v10 = vld [vmem:[%s12372_s1 + $0x30] sm:$0xff]  }
  0x8e   : > { %7984 = vmatprep.mubr.msk.bf16.mxu1 %vm782_vm4, %v7081_v40  ;;  %8152 = vmatprep.mubr.msk.bf16.mxu0 %vm782_vm4, %v7377_v35  ;;  %v3035_v50 = vsel %vm9328_vm7, %v3033_v28, %v3034_v16  ;;  %v7083_v20 = vcombine.low %v8901_v53, %v9583_v62  ;;  %v7359_v36 = vrot.slane %v7343_v15, 9  ;;  %v3574_v63 = vsel %vm831_vm0, %v9401_v59, 0  ;;  %v7284_v61 = vld [vmem:[%s9058_s16 + $0xac] sm:$0xf]  ;;  %v7287_v35 = vld [vmem:[%s9058_s16 + $0xb8] sm:$0xf] }
  0x8f   : > { %v3039_v19 = vsel %vm9328_vm7, %v7358_v2, %v3038_v31  ;;  %v3040_v57 = vrot.slane %v3038_v31, 4  ;;  %v7378_v5 = vcombine.low %v3032_v26, %v3035_v50  ;;  %v3047_v56 = vrot.slane %v3045_v37, 4  ;;  %8173 = vmatpush3.bf16.msra.mxu0 %v3574_v63  ;;  %v7285_v15 = vld [vmem:[%s9058_s16 + $0xb0] sm:$0x1]  ;;  %v7288_v28 = vld [vmem:[%s9058_s16 + $0xbc] sm:$0x1] }
  0x90   : > { %v3048_v40 = vrot.slane %v7279_v22, 5  ;;  %v3052_v52 = vrot.slane %v7281_v21, 5  ;;  %v7360_v6 = vrot.slane %v7344_v43, 9  ;;  %v3055_v12 = vrot.slane %v7282_v39, 5  ;;  %8206 = vmatprep.subr.bf16.mxu0 %v9570_v60  ;;  %v7345_v22 = vld [vmem:[%s9058_s16 + $0xa8] sm:$0xe] }
  0x91   : > { %v3042_v25 = vsel %vm9328_vm7, %v3040_v57, %v3041_v27  ;;  %v3046_v13 = vsel %vm9328_vm7, %v7359_v36, %v3045_v37  ;;  %v3059_v16 = vrot.slane %v7284_v61, 5  ;;  %v3066_v21 = vrot.slane %v7287_v35, 5  ;;  %v8600_v26 = vld [vmem:[%s12372_s1 + $0x38] ss:$0 sps:$4 sm:$0x33]  }
  0x92   : > { %v7379_v4 = vcombine.low %v3039_v19, %v3042_v25  ;;  %v3054_v59 = vrot.slane %v3052_v52, 4  ;;  %v3049_v14 = vsel %vm9328_vm7, %v3047_v56, %v3048_v40  ;;  %v3053_v2 = vsel %vm9328_vm7, %v7360_v6, %v3052_v52  ;;  %v7346_v31 = vld [vmem:[%s9058_s16 + $0xb4] sm:$0xe]  ;;  %v8903_v27 = vld [vmem:[%s9058_s16 + $0x24] sm:$0xf]  ;;  %v9632_v40 = vld [vmem:[%s12372_s1 + $0x3c] sm:$0xff]  }
  0x93   : > { %v9618_v37 = vld [vmem:[%s9058_s16 + $0x28] sm:$0xf]  ;;  %v7380_v43 = vcombine.low %v3046_v13, %v3049_v14  ;;  %v8905_v47 = vld [vmem:[%s9058_s16 + $0x30] sm:$0xf]  ;;  %v7361_v57 = vrot.slane %v7345_v22, 9  ;;  %v3062_v53 = vrot.slane %v7285_v15, 5 }
  0x94   : > { %v7084_v39 = vcombine.low %v8903_v27, %v9618_v37  ;;  %v3068_v36 = vrot.slane %v3066_v21, 4  ;;  %v3069_v63 = vrot.slane %v7288_v28, 5  ;;  %v7290_v25 = vld [vmem:[%s9058_s16 + $0xc4] sm:$0xf]  ;;  %v1584_v56 = vsel %vm831_vm0, %v8600_v26, 0 }
  0x95   : > { %7985 = vmatmul.mubr.msk.bf16.vlgmr.msra.gmra.mrb[0].mxu1 %vm782_vm4, %v7082_v32  ;;  %8153 = vmatmul.mubr.msk.bf16.gmra.mrb[16].mxu0 %vm782_vm4, %v7378_v5  ;;  %v9623_v32 = vld [vmem:[%s9058_s16 + $0x34] sm:$0xf]  ;;  %v3061_v5 = vrot.slane %v3059_v16, 4  ;;  %v3060_v52 = vsel %vm9328_vm7, %v7361_v57, %v3059_v16  ;;  %v8907_v35 = vld [vmem:[%s9058_s16 + $0x3c] sm:$0xf]  ;;  %v2431_v28 = vshll.u32 %v9527_v49, 16 }
  0x96   : > { %8017 = vmatpush3.bf16.msra.mxu1 %v9419_v33  ;;  %7988 = vmatprep.mubr.msk.bf16.mxu1 %vm782_vm4, %v7083_v20  ;;  %v3056_v33 = vsel %vm9328_vm7, %v3054_v59, %v3055_v12  ;;  %v7085_v50 = vcombine.low %v8905_v47, %v9623_v32  ;;  %v7362_v20 = vrot.slane %v7346_v31, 9  ;;  %v3070_v6 = vsel %vm9328_vm7, %v3068_v36, %v3069_v63  ;;  %v7291_v12 = vld [vmem:[%s9058_s16 + $0xc8] sm:$0x1]  ;;  %v7347_v59 = vld [vmem:[%s9058_s16 + $0xc0] sm:$0xe] }
  0x97   : > { %8156 = vmatprep.mubr.msk.bf16.mxu0 %vm782_vm4, %v7379_v4  ;;  %8018 = vmatprep.subr.bf16.mxu1 %v8588_v10  ;;  %v7381_v19 = vcombine.low %v3053_v2, %v3056_v33  ;;  %v3063_v61 = vsel %vm9328_vm7, %v3061_v5, %v3062_v53  ;;  %v9651_v13 = vld [vmem:[%s9058_s16 + $0x40] sm:$0xf]  ;;  %v8909_v16 = vld [vmem:[%s9058_s16 + $0x48] sm:$0xf]  ;;  %v7363_v22 = vrot.slane %v7347_v59, 9  ;;  %v2435_v31 = vshrl.u32 %v9527_v49, 16 }
  0x98   : > { %v3067_v4 = vsel %vm9328_vm7, %v7362_v20, %v3066_v21  ;;  %v7086_v14 = vcombine.low %v8907_v35, %v9651_v13  ;;  %v7382_v15 = vcombine.low %v3060_v52, %v3063_v61  ;;  %v7087_v2 = vcombine.low %v8909_v16, %v9232_v42  ;;  %v1304_v20 = vld [vmem:[%s9058_s16 + $0xc] sm:$0xe]  ;;  %v9680_v36 = vld [vmem:[%s9058_s16 + $0x8] sm:$0x1]  ;;  %v1306_v59 = vld [vmem:[%s9058_s16 + $0x24] sm:$0xe] }
  0x99   : > { %v7383_v33 = vcombine.low %v3067_v4, %v3070_v6  ;;  %v2437_v49 = vrot.slane %v2435_v31, 4  ;;  %v2441_v5 = vshll.u32 %v9532_v30, 16  ;;  %v1363_v53 = vrot.slane %v9574_v18, 5  ;;  %v8595_v4 = vld [vmem:[%s9058_s16 + $0x24] sm:$0xff]  }
  0x9a   : > { %8019 = vmatpush3.bf16.msra.mxu1 %v8588_v10  ;;  %v3073_v10 = vrot.slane %v7290_v25, 5  ;;  %v1356_v63 = vrot.slane %v9546_v3, 5  ;;  %v1305_v25 = vld [vmem:[%s9058_s16 + $0x18] sm:$0xe]  ;;  %v7117_v52 = vrot.slane %v1304_v20, 9  ;;  %v7091_v6 = vcombine.low %v9348_v51, %v9355_v58 }
  0x9b   : > { %8546 = vmatprep.subr.msk.bf16.mxu1 %vm831_vm0, %v8600_v26  ;;  %v3076_v26 = vrot.slane %v7291_v12, 5  ;;  %v9689_v18 = vrot.slane %v2441_v5, 5  ;;  %v1365_v61 = vrot.slane %v1363_v53, 4  ;;  %v7092_v12 = vcombine.low %v9377_v38, %v9383_v45  ;;  %v8615_v51 = vld [vmem:[%s12372_s1 + $0x9c] ss:$0 sps:$4 sm:$0x33]  }
  0x9c   : > { %v3075_v21 = vrot.slane %v3073_v10, 4  ;;  %v3074_v42 = vsel %vm9328_vm7, %v7363_v22, %v3073_v10  ;;  %v1370_v10 = vrot.slane %v9583_v62, 5  ;;  %v7093_v3 = vcombine.low %v9412_v1, %v9424_v44  ;;  %v1307_v58 = vld [vmem:[%s9058_s16 + $0x30] sm:$0xe]  ;;  %v8915_v20 = vld [vmem:[%s9058_s16 + $0x4c] sm:$0xf] }
  0x9d   : > { %7989 = vmatmul.mubr.msk.bf16.gmra.mrb[4].mxu1 %vm782_vm4, %v7084_v39  ;;  %8157 = vmatmul.mubr.msk.bf16.gmra.mrb[20].mxu0 %vm782_vm4, %v7380_v43  ;;  %v9666_v39 = vrot.slane %v2431_v28, 5  ;;  %v7088_v43 = vcombine.low %v9254_v11, %v9269_v9  ;;  %v1359_v11 = vrot.slane %v9680_v36, 5  ;;  %v1303_v9 = vld [vmem:[%s9058_s16] sm:$0xe]  ;;  %12448 = vst [vmem:[#allocation6_spill] sm:$0xff] %v9689_v18  ;;  %v1377_v35 = vrot.slane %v9618_v37, 5 }
  0x9e   : > { %7992 = vmatprep.mubr.msk.bf16.mxu1 %vm782_vm4, %v7085_v50  ;;  %8160 = vmatprep.mubr.msk.bf16.mxu0 %vm782_vm4, %v7381_v19  ;;  %v3077_v27 = vsel %vm9328_vm7, %v3075_v21, %v3076_v26  ;;  %v7089_v50 = vcombine.low %v9292_v7, %v9302_v41  ;;  %v8592_v19 = vld [vmem:[%s9058_s16 + $0x18] sm:$0xff]   ;;  %v8911_v7 = vld [vmem:[%s9058_s16 + $0x14] sm:$0x1]  ;;  %v7116_v62 = vrot.slane %v1303_v9, 9  ;;  %v1358_v16 = vrot.slane %v1356_v63, 4 }
  0x9f   : > { %8021 = vmatpush3.bf16.msra.mxu1 %v1584_v56  ;;  %12446 = vst [vmem:[#allocation4_spill] sm:$0xff] %v9666_v39  ;;  %v7384_v47 = vcombine.low %v3074_v42, %v3077_v27  ;;  %v2438_v57 = vor.u32 %v2437_v49, %v9666_v39  ;;  %v1366_v41 = vrot.slane %v8911_v7, 5  ;;  %v7090_v56 = vcombine.low %v9317_v0, %v9322_v24  ;;  %v8605_v37 = vld [vmem:[%s12372_s1 + $0x94] sm:$0xff]   ;;  %v1308_v42 = vld [vmem:[%s9058_s16 + $0x3c] sm:$0xe] }
  0xa0   : > { %8054 = vmatprep.subr.bf16.mxu1 %v9632_v40  ;;  %v7094_v0 = vcombine.low %v9439_v54, %v9444_v55  ;;  %v7095_v24 = vcombine.low %v9464_v46, %v9469_v48  ;;  %v1391_v21 = vrot.slane %v9651_v13, 5  ;;  %v9722_v26 = vsel %vm9328_vm7, %v7117_v52, %v1363_v53  ;;  %v8913_v49 = vld [vmem:[%s9058_s16 + $0x2c] sm:$0x1]  ;;  %v7479_v38 = vld [vmem:[%s9058_s16 + $0x24] sm:$0xf] }
  0xa1   : > { %v9687_v30 = vrot.slane %v2438_v57, 4  ;;  %v1372_v28 = vrot.slane %v1370_v10, 4  ;;  %v7119_v31 = vrot.slane %v1306_v59, 9  ;;  %v1379_v27 = vrot.slane %v1377_v35, 4  ;;  %v8921_v1 = vld [vmem:[%s9058_s16 + $0x68] sm:$0x1] }
  0xa2   : > { %v7120_v13 = vrot.slane %v1307_v58, 9  ;;  %v9740_v5 = vsel %vm9328_vm7, %v7116_v62, %v1356_v63  ;;  %v1398_v36 = vrot.slane %v8915_v20, 5  ;;  %v7121_v9 = vrot.slane %v1308_v42, 9  ;;  %v8917_v58 = vld [vmem:[%s9058_s16 + $0x50] sm:$0x1] }
  0xa3   : > { %12447 = vst [vmem:[#allocation5_spill] sm:$0xff] %v9687_v30  ;;  %v1393_v7 = vrot.slane %v1391_v21, 4  ;;  %v9751_v63 = vsel %vm9328_vm7, %v1358_v16, %v1359_v11  ;;  %v9765_v59 = vsel %vm9328_vm7, %v7119_v31, %v1377_v35  ;;  %v1310_v16 = vld [vmem:[%s9058_s16 + $0x54] sm:$0xe]  ;;  %v8919_v42 = vld [vmem:[%s9058_s16 + $0x64] sm:$0xf] }
  0xa4   : > { %v1400_v35 = vrot.slane %v1398_v36, 4  ;;  %v9785_v31 = vsel %vm9328_vm7, %v7121_v9, %v1391_v21  ;;  %v7123_v20 = vrot.slane %v1310_v16, 9  ;;  %v8920_v9 = vld [vmem:[%s9058_s16 + $0x5c] sm:$0x1]  ;;  %v1415_v44 = vrot.slane %v8921_v1, 5 }
  0xa5   : > { %7993 = vmatmul.mubr.msk.bf16.gmra.mrb[8].mxu1 %vm782_vm4, %v7086_v14  ;;  %8161 = vmatmul.mubr.msk.bf16.gmra.mrb[24].mxu0 %vm782_vm4, %v7382_v15  ;;  %v1384_v14 = vrot.slane %v9623_v32, 5  ;;  %v8597_v15 = vld [vmem:[%s9058_s16 + $0x30] sm:$0xff]   ;;  %v9726_v32 = vsel %vm9328_vm7, %v1365_v61, %v1366_v41  ;;  %v8916_v41 = vld [vmem:[%s9058_s16 + $0x44] sm:$0x1]  ;;  %v4319_v61 = vsel %vm831_vm0, %v8615_v51, 0 }
  0xa6   : > { %7996 = vmatprep.mubr.msk.bf16.mxu1 %vm782_vm4, %v7087_v2  ;;  %8164 = vmatprep.mubr.msk.bf16.mxu0 %vm782_vm4, %v7383_v33  ;;  %v7118_v2 = vrot.slane %v1305_v25, 9  ;;  %v8912_v33 = vld [vmem:[%s9058_s16 + $0x20] sm:$0x1]  ;;  %v1394_v25 = vrot.slane %v8916_v41, 5  ;;  %v7483_v1 = vld [vmem:[%s9058_s16 + $0x34] sm:$0xf] }
  0xa7   : > { %v1373_v22 = vrot.slane %v8912_v33, 5  ;;  %v1386_v53 = vrot.slane %v1384_v14, 4  ;;  %v7478_v41 = vld [vmem:[%s9058_s16 + $0x20] sm:$0x1]  ;;  %v7485_v21 = vld [vmem:[%s9058_s16 + $0x3c] sm:$0xf] }
  0xa8   : > { %v3875_v55 = vshll.u32 %v7483_v1, 16  ;;  %v3893_v46 = vshll.u32 %v7485_v21, 16 }
  0xa9   : > { %v9757_v52 = vsel %vm9328_vm7, %v1372_v28, %v1373_v22  ;;  %v8918_v22 = vld [vmem:[%s9058_s16 + $0x58] sm:$0xf] }
  0xaa   : > { %v1405_v28 = vrot.slane %v8918_v22, 5  ;;  %v3895_v57 = vrot.slane %v3893_v46, 5  ;;  %v12450_v46 = vcombine.low %v9740_v5, %v9751_v63 }
  0xad   : > { %7997 = vmatmul.mubr.msk.bf16.gmra.mrb[12].mxu1 %vm782_vm4, %v7088_v43  ;;  %8165 = vmatmul.mubr.msk.bf16.gmra.mrb[28].mxu0 %vm782_vm4, %v7384_v47  ;;  %v1380_v43 = vrot.slane %v8913_v49, 5  ;;  %v8914_v47 = vld [vmem:[%s9058_s16 + $0x38] sm:$0x1] }
  0xae   : > { %8000 = vmatprep.mubr.msk.bf16.mxu1 %vm782_vm4, %v7089_v50  ;;  %8174 = vmatprep.mubr.msk.bf16.mxu0 %vm782_vm4, %v8592_v19  ;;  %v1387_v50 = vrot.slane %v8914_v47, 5  ;;  %v1309_v19 = vld [vmem:[%s9058_s16 + $0x48] sm:$0xe] }
  0xaf   : > { %v9769_v11 = vsel %vm9328_vm7, %v1379_v27, %v1380_v43  ;;  %v7122_v62 = vrot.slane %v1309_v19, 9  ;;  %v1412_v27 = vrot.slane %v8919_v42, 5  ;;  %v3837_v42 = vshll.u32 %v7478_v41, 16  ;;  %v7481_v43 = vld [vmem:[%s9058_s16 + $0x2c] sm:$0x1] }
  0xb0   : > { %v9779_v33 = vsel %vm9328_vm7, %v1386_v53, %v1387_v50  ;;  %v9803_v50 = vld [vmem:[%s12372_s1 + $0xa0] sm:$0xff]  }
  0xb1   : > { %v9814_v53 = vsel %vm9328_vm7, %v7122_v62, %v1398_v36  ;;  %v1407_v36 = vrot.slane %v1405_v28, 4  ;;  %v1414_v62 = vrot.slane %v1412_v27, 4 }
  0xb5   : > { %8001 = vmatmul.mubr.msk.bf16.gmra.mrb[16].mxu1 %vm782_vm4, %v7090_v56  ;;  %8175 = vmatmul.mubr.msk.bf16.vlgmr.msra.gmra.mrb[0].mxu0 %vm782_vm4, %v8595_v4  ;;  %v8599_v4 = vld [vmem:[%s9058_s16 + $0x3c] sm:$0xff]  }
  0xb6   : > { %8207 = vmatpush3.bf16.msra.mxu0 %v9570_v60  ;;  %8004 = vmatprep.mubr.msk.bf16.mxu1 %vm782_vm4, %v7091_v6  ;;  %v9746_v60 = vsel %vm9328_vm7, %v7118_v2, %v1370_v10  ;;  %v7476_v10 = vld [vmem:[%s9058_s16 + $0x18] sm:$0xf]  ;;  %v8602_v6 = vld [vmem:[%s9058_s16 + $0x48] sm:$0xff]   ;;  %v9775_v2 = vsel %vm9328_vm7, %v7120_v13, %v1384_v14  ;;  %v1311_v14 = vld [vmem:[%s9058_s16 + $0x60] sm:$0xe] }
  0xb7   : > { %8178 = vmatprep.mubr.msk.bf16.mxu0 %vm782_vm4, %v8597_v15  ;;  %8208 = vmatprep.subr.bf16.mxu0 %v8605_v37  ;;  %v1401_v15 = vrot.slane %v8917_v58, 5  ;;  %v3818_v49 = vshrl.u32 %v7476_v10, 16  ;;  %v7477_v13 = vld [vmem:[%s9058_s16 + $0x1c] sm:$0xf]  ;;  %v3821_v47 = vshll.u32 %v7476_v10, 16 }
  0xb8   : > { %v7480_v10 = vld [vmem:[%s9058_s16 + $0x28] sm:$0xf]  ;;  %v3827_v58 = vshll.u32 %v7477_v13, 16  ;;  %v3831_v22 = vshrl.u32 %v7477_v13, 16 }
  0xb9   : > { %v3823_v16 = vrot.slane %v3821_v47, 5  ;;  %v3851_v45 = vshll.u32 %v7480_v10, 16  ;;  %v3855_v19 = vshrl.u32 %v7480_v10, 16  ;;  %v9841_v47 = vsel %vm9328_vm7, %v7123_v20, %v1405_v28  ;;  %v8923_v28 = vld [vmem:[%s9058_s16 + $0x74] sm:$0x1] }
  0xba   : > { %8209 = vmatpush3.bf16.msra.mxu0 %v8605_v37  ;;  %v9789_v37 = vsel %vm9328_vm7, %v1393_v7, %v1394_v25  ;;  %v1408_v7 = vrot.slane %v8920_v9, 5  ;;  %v7124_v25 = vrot.slane %v1311_v14, 9  ;;  %v3842_v9 = vshrl.u32 %v7479_v38, 16 }
  0xbb   : > { %8552 = vmatprep.subr.msk.bf16.mxu0 %vm831_vm0, %v8615_v51  ;;  %v9855_v10 = vsel %vm9328_vm7, %v1414_v62, %v1415_v44  ;;  %v1422_v20 = vrot.slane %v8923_v28, 5  ;;  %v3833_v56 = vrot.slane %v3831_v22, 4  ;;  %v9870_v44 = vrot.slane %v3851_v45, 5  ;;  %v1313_v22 = vld [vmem:[%s9058_s16 + $0x78] sm:$0xe] }
  0xbc   : > { %v9845_v13 = vsel %vm9328_vm7, %v1407_v36, %v1408_v7  ;;  %v9849_v41 = vsel %vm9328_vm7, %v7124_v25, %v1412_v27  ;;  %v9861_v7 = vrot.slane %v3837_v42, 5  ;;  %v7486_v27 = vld [vmem:[%s9058_s16 + $0x40] sm:$0xf]  ;;  %v3844_v25 = vrot.slane %v3842_v9, 4  ;;  %v8609_v42 = vld [vmem:[%s9058_s16 + $0x6c] sm:$0xff]  }
  0xbd   : > { %8005 = vmatmul.mubr.msk.bf16.gmra.mrb[20].mxu1 %vm782_vm4, %v7092_v12  ;;  %8179 = vmatmul.mubr.msk.bf16.gmra.mrb[4].mxu0 %vm782_vm4, %v8599_v4  ;;  %v9828_v12 = vsel %vm9328_vm7, %v1400_v35, %v1401_v15  ;;  %v8604_v4 = vld [vmem:[%s9058_s16 + $0x54] sm:$0xff]   ;;  %v1312_v15 = vld [vmem:[%s9058_s16 + $0x6c] sm:$0xe]  ;;  %v8922_v35 = vld [vmem:[%s9058_s16 + $0x70] sm:$0xf]  ;;  %v3890_v45 = vshrl.u32 %v7485_v21, 16 }
  0xbe   : > { %8008 = vmatprep.mubr.msk.bf16.mxu1 %vm782_vm4, %v7093_v3  ;;  %8182 = vmatprep.mubr.msk.bf16.mxu0 %vm782_vm4, %v8602_v6  ;;  %v3820_v3 = vrot.slane %v3818_v49, 4  ;;  %v8607_v6 = vld [vmem:[%s9058_s16 + $0x60] sm:$0xff]   ;;  %v1419_v14 = vrot.slane %v8922_v35, 5  ;;  %v9857_v35 = vrot.slane %v3827_v58, 5  ;;  %v7125_v49 = vrot.slane %v1312_v15, 9 }
  0xbf   : > { %8211 = vmatpush3.bf16.msra.mxu0 %v4319_v61  ;;  %v3845_v61 = vshll.u32 %v7479_v38, 16  ;;  %v7482_v38 = vld [vmem:[%s9058_s16 + $0x30] sm:$0xf]  ;;  %v3857_v58 = vrot.slane %v3855_v19, 4  ;;  %v3861_v9 = vshll.u32 %v7481_v43, 16  ;;  %v9898_v19 = vrot.slane %v3875_v55, 5 }
  0xc0   : > { %8244 = vmatprep.subr.bf16.mxu0 %v9803_v50  ;;  %v3824_v51 = vor.u32 %v3823_v16, %v3820_v3  ;;  %v1421_v36 = vrot.slane %v1419_v14, 4  ;;  %v3866_v3 = vshrl.u32 %v7482_v38, 16  ;;  %v3869_v54 = vshll.u32 %v7482_v38, 16 }
  0xc1   : > { %v3847_v62 = vrot.slane %v3845_v61, 5  ;;  %v3899_v61 = vshll.u32 %v7486_v27, 16  ;;  %v3903_v38 = vshrl.u32 %v7486_v27, 16  ;;  %v3858_v21 = vor.u32 %v3857_v58, %v9870_v44 }
  0xc2   : > { %v9881_v48 = vrot.slane %v3824_v51, 4  ;;  %v9890_v16 = vsel %vm9328_vm7, %v1421_v36, %v1422_v20  ;;  %v8611_v51 = vld [vmem:[%s9058_s16 + $0x78] sm:$0xff]   ;;  %v3871_v28 = vrot.slane %v3869_v54, 5  ;;  %v1314_v36 = vld [vmem:[%s9058_s16 + $0x84] sm:$0xe]  ;;  %v12449_v54 = vcombine.low %v9487_v17, %v9497_v23 }
  0xc3   : > { %v3848_v15 = vor.u32 %v3847_v62, %v3844_v25  ;;  %v8925_v62 = vld [vmem:[%s9058_s16 + $0x88] sm:$0xf]  ;;  %v3859_v17 = vrot.slane %v3858_v21, 4  ;;  %v3863_v23 = vrot.slane %v3861_v9, 5  ;;  %v7127_v63 = vrot.slane %v1314_v36, 9  ;;  %v8613_v9 = vld [vmem:[%s9058_s16 + $0x90] sm:$0xff]  }
  0xc4   : > { %v3830_v43 = vsel %vm9086_vm3, %v9881_v48, %v9857_v35  ;;  %v1433_v58 = vrot.slane %v8925_v62, 5  ;;  %v8612_v62 = vld [vmem:[%s9058_s16 + $0x84] sm:$0xff]   ;;  %v8927_v21 = vld [vmem:[%s9058_s16 + $0x8c] sm:$0x1]  ;;  %v10069_v25 = vld [vmem:[%s9058_s16 + $0x70] sm:$0xf] }
  0xc5   : > { %8009 = vmatmul.mubr.msk.bf16.gmra.mrb[24].mxu1 %vm782_vm4, %v7094_v0  ;;  %8183 = vmatmul.mubr.msk.bf16.gmra.mrb[8].mxu0 %vm782_vm4, %v8604_v4  ;;  %v3879_v0 = vshrl.u32 %v7483_v1, 16  ;;  %v3892_v4 = vrot.slane %v3890_v45, 4  ;;  %v3849_v55 = vrot.slane %v3848_v15, 4  ;;  %v3905_v45 = vrot.slane %v3903_v38, 4  ;;  %12458 = vst [vmem:[#allocation10_spill] sm:$0xff] %v10069_v25 }
  0xc6   : > { %8012 = vmatprep.mubr.msk.bf16.mxu1 %vm782_vm4, %v7095_v24  ;;  %8186 = vmatprep.mubr.msk.bf16.mxu0 %vm782_vm4, %v8607_v6  ;;  %v3834_v24 = vor.u32 %v3833_v56, %v9857_v35  ;;  %v9886_v6 = vsel %vm9328_vm7, %v7125_v49, %v1419_v14  ;;  %v8924_v56 = vld [vmem:[%s9058_s16 + $0x7c] sm:$0xf]  ;;  %v7484_v14 = vld [vmem:[%s9058_s16 + $0x38] sm:$0x1]  ;;  %v3868_v49 = vrot.slane %v3866_v3, 4  ;;  %v9914_v35 = vrot.slane %v3899_v61, 5 }
  0xc7   : > { %v1426_v1 = vrot.slane %v8924_v56, 5  ;;  %v3881_v20 = vrot.slane %v3879_v0, 4  ;;  %v7487_v3 = vld [vmem:[%s9058_s16 + $0x44] sm:$0x1]  ;;  %v7126_v0 = vrot.slane %v1313_v22, 9  ;;  %v3885_v61 = vshll.u32 %v7484_v14, 16 }
  0xc8   : > { %v3835_v27 = vrot.slane %v3834_v24, 4  ;;  %v8926_v24 = vld [vmem:[%s9058_s16 + $0x80] sm:$0x1]  ;;  %v3872_v15 = vor.u32 %v3871_v28, %v3868_v49  ;;  %v3896_v38 = vor.u32 %v3895_v57, %v3892_v4  ;;  %v7488_v56 = vld [vmem:[%s9058_s16 + $0x48] sm:$0xf]  ;;  %v3854_v57 = vsel %vm9086_vm3, %v3849_v55, %v9870_v44 }
  0xc9   : > { %v1428_v48 = vrot.slane %v1426_v1, 4  ;;  %v3882_v22 = vor.u32 %v3881_v20, %v9898_v19  ;;  %v8618_v49 = vld [vmem:[%s12372_s1 + $0x44] sm:$0xff]   ;;  %v9938_v4 = vsel %vm9328_vm7, %v7126_v0, %v1426_v1  ;;  %v3909_v14 = vshll.u32 %v7487_v3, 16  ;;  %v9942_v28 = vld [vmem:[%s9058_s16 + $0x4c] sm:$0xf] }
  0xca   : > { %v3840_v5 = vsel %vm9086_vm3, %v3835_v27, %v9861_v7  ;;  %v3906_v7 = vor.u32 %v3905_v45, %v9914_v35  ;;  %v3864_v20 = vsel %vm9086_vm3, %v3859_v17, %v3863_v23  ;;  %v3914_v27 = vshrl.u32 %v7488_v56, 16  ;;  %v1315_v0 = vld [vmem:[%s9058_s16 + $0x90] sm:$0xe] }
  0xcb   : > { %v3873_v44 = vrot.slane %v3872_v15, 4  ;;  %v3883_v55 = vrot.slane %v3882_v22, 4  ;;  %v3897_v1 = vrot.slane %v3896_v38, 4  ;;  %v9953_v3 = vsel %vm9328_vm7, %v7127_v63, %v1433_v58  ;;  %v8622_v22 = vld [vmem:[%s12372_s1 + $0x4c] ss:$0 sps:$4 sm:$0x33]  }
  0xcc   : > { %v3923_v17 = vshll.u32 %v9942_v28, 16  ;;  %v3927_v23 = vshrl.u32 %v9942_v28, 16  ;;  %v3911_v15 = vrot.slane %v3909_v14, 5  ;;  %v7128_v63 = vrot.slane %v1315_v0, 9  ;;  %v8614_v14 = vld [vmem:[%s9058_s16 + $0x9c] sm:$0xff]  }
  0xcd   : > { %8013 = vmatmul.mubr.msk.bf16.gmra.mrb[28].mxu1 %vm782_vm4, %v12449_v54  ;;  %8187 = vmatmul.mubr.msk.bf16.gmra.mrb[12].mxu0 %vm782_vm4, %v8609_v42  ;;  %v1429_v42 = vrot.slane %v8926_v24, 5  ;;  %v1436_v54 = vrot.slane %v8927_v21, 5  ;;  %v3887_v24 = vrot.slane %v3885_v61, 5  ;;  %v8928_v61 = vld [vmem:[%s9058_s16 + $0x94] sm:$0xf]  ;;  %v3902_v21 = vsel %vm9086_vm3, %v3897_v1, %v9914_v35 }
  0xce   : > { %8022 = vmatprep.mubr.msk.bf16.mxu1 %vm782_vm4, %v12450_v46  ;;  %8190 = vmatprep.mubr.msk.bf16.mxu0 %vm782_vm4, %v8611_v51  ;;  %v1435_v51 = vrot.slane %v1433_v58, 4  ;;  %v3917_v46 = vshll.u32 %v7488_v56, 16  ;;  %v3907_v58 = vrot.slane %v3906_v7, 4  ;;  %v1440_v38 = vrot.slane %v8928_v61, 5  ;;  %v7494_v7 = vld [vmem:[%s9058_s16 + $0x60] sm:$0xf] }
  0xcf   : > { %v9948_v36 = vsel %vm9328_vm7, %v1428_v48, %v1429_v42  ;;  %v12451_v48 = vcombine.low %v9722_v26, %v9726_v32  ;;  %v9966_v42 = vcombine.low %v3830_v43, %v3840_v5  ;;  %v12452_v26 = vcombine.low %v9746_v60, %v9757_v52  ;;  %v7491_v5 = vld [vmem:[%s9058_s16 + $0x54] sm:$0xf]  ;;  %v1316_v0 = vld [vmem:[%s9058_s16 + $0x9c] sm:$0xe]  ;;  %v8934_v52 = vld [vmem:[%s9058_s16 + $0xb0] sm:$0x1] }
  0xd0   : > { %v9957_v45 = vsel %vm9328_vm7, %v1435_v51, %v1436_v54  ;;  %v9977_v32 = vcombine.low %v3854_v57, %v3864_v20  ;;  %v3916_v56 = vrot.slane %v3914_v27, 4  ;;  %v3888_v60 = vsel %vm9086_vm3, %v3883_v55, %v3887_v24  ;;  %v9991_v51 = vld [vmem:[%s9058_s16 + $0x58] sm:$0xf]  ;;  %v8616_v24 = vld [vmem:[%s9058_s16 + $0xa8] sm:$0xff]  }
  0xd1   : > { %v8929_v54 = vld [vmem:[%s9058_s16 + $0x98] sm:$0x1]  ;;  %v9997_v57 = vrot.slane %v3923_v17, 5  ;;  %v3912_v20 = vsel %vm9086_vm3, %v3907_v58, %v3911_v15  ;;  %v1442_v27 = vrot.slane %v1440_v38, 4  ;;  %v3941_v55 = vshll.u32 %v7491_v5, 16 }
  0xd2   : > { %v1962_v35 = vsel %vm831_vm0, %v8622_v22, 0  ;;  %v3947_v17 = vshll.u32 %v9991_v51, 16  ;;  %v10016_v58 = vsel %vm9328_vm7, %v7128_v63, %v1440_v38  ;;  %v3962_v15 = vshrl.u32 %v7494_v7, 16 }
  0xd3   : > { %v3965_v61 = vshll.u32 %v7494_v7, 16  ;;  %v1457_v43 = vrot.slane %v8934_v52, 5  ;;  %v1318_v52 = vld [vmem:[%s9058_s16 + $0xb4] sm:$0xe] }
  0xd5   : > { %8023 = vmatmul.mubr.msk.bf16.vlgmr.msra.gmra.mrb[0].mxu1 %vm782_vm4, %v12451_v48  ;;  %8191 = vmatmul.mubr.msk.bf16.gmra.mrb[16].mxu0 %vm782_vm4, %v8612_v62  ;;  %v3919_v62 = vrot.slane %v3917_v46, 5  ;;  %v10004_v46 = vld [vmem:[%s9058_s16 + $0x50] sm:$0x1] }
  0xd6   : > { %8055 = vmatpush3.bf16.msra.mxu1 %v9632_v40  ;;  %8026 = vmatprep.mubr.msk.bf16.mxu1 %vm782_vm4, %v12452_v26  ;;  %v3878_v40 = vsel %vm9086_vm3, %v3873_v44, %v9898_v19  ;;  %v3929_v19 = vrot.slane %v3927_v23, 4  ;;  %v3938_v44 = vshrl.u32 %v7491_v5, 16  ;;  %v3951_v23 = vshrl.u32 %v9991_v51, 16 }
  0xd7   : > { %8194 = vmatprep.mubr.msk.bf16.mxu0 %vm782_vm4, %v8613_v9  ;;  %8056 = vmatprep.subr.bf16.mxu1 %v8618_v49  ;;  %v1443_v9 = vrot.slane %v8929_v54, 5  ;;  %v3920_v1 = vor.u32 %v3919_v62, %v3916_v56  ;;  %v10011_v48 = vcombine.low %v3878_v40, %v3888_v60  ;;  %v3933_v56 = vshll.u32 %v10004_v46, 16  ;;  %v8930_v62 = vld [vmem:[%s9058_s16 + $0xa0] sm:$0xf]  ;;  %v10024_v40 = vld [vmem:[%s9058_s16 + $0x64] sm:$0xf] }
  0xd8   : > { %v3930_v26 = vor.u32 %v3929_v19, %v9997_v57  ;;  %v1447_v5 = vrot.slane %v8930_v62, 5  ;;  %12453 = vst [vmem:[#allocation7_spill] sm:$0xff] %v10024_v40  ;;  %v7129_v60 = vrot.slane %v1316_v0, 9  ;;  %v3940_v63 = vrot.slane %v3938_v44, 4  ;;  %v8932_v0 = vld [vmem:[%s9058_s16 + $0xa4] sm:$0x1] }
  0xd9   : > { %v10033_v38 = vsel %vm9328_vm7, %v1442_v27, %v1443_v9  ;;  %v12455_v54 = vcombine.low %v9775_v2, %v9779_v33  ;;  %v10043_v19 = vrot.slane %v3947_v17, 5  ;;  %v3953_v7 = vrot.slane %v3951_v23, 4  ;;  %v8931_v9 = vld [vmem:[%s9058_s16 + $0xac] sm:$0xf]  ;;  %v8617_v23 = vld [vmem:[%s9058_s16 + $0xb4] sm:$0xff]  }
  0xda   : > { %8057 = vmatpush3.bf16.msra.mxu1 %v8618_v49  ;;  %v10018_v49 = vcombine.low %v3902_v21, %v3912_v20  ;;  %v3943_v21 = vrot.slane %v3941_v55, 5  ;;  %v1317_v20 = vld [vmem:[%s9058_s16 + $0xa8] sm:$0xe]  ;;  %v3964_v27 = vrot.slane %v3962_v15, 4  ;;  %v3967_v44 = vrot.slane %v3965_v61, 5 }
  0xdb   : > { %8547 = vmatprep.subr.msk.bf16.mxu1 %vm831_vm0, %v8622_v22  ;;  %v12454_v22 = vcombine.low %v9765_v59, %v9769_v11  ;;  %v3921_v59 = vrot.slane %v3920_v1, 4  ;;  %v10041_v11 = vld [vmem:[%s9058_s16 + $0x5c] sm:$0x1]  ;;  %v3971_v2 = vshll.u32 %v10024_v40, 16  ;;  %v3975_v33 = vshrl.u32 %v10024_v40, 16 }
  0xdc   : > { %12456 = vst [vmem:[#allocation8_spill] sm:$0xff] %v10041_v11  ;;  %v3931_v55 = vrot.slane %v3930_v26, 4  ;;  %v1449_v1 = vrot.slane %v1447_v5, 4  ;;  %v1450_v17 = vrot.slane %v8932_v0, 5  ;;  %v10061_v61 = vsel %vm9328_vm7, %v7129_v60, %v1447_v5  ;;  %v7497_v62 = vld [vmem:[%s9058_s16 + $0x6c] sm:$0xf] }
  0xdd   : > { %8027 = vmatmul.mubr.msk.bf16.gmra.mrb[4].mxu1 %vm782_vm4, %v12454_v22  ;;  %8195 = vmatmul.mubr.msk.bf16.gmra.mrb[20].mxu0 %vm782_vm4, %v8614_v14  ;;  %v1454_v14 = vrot.slane %v8931_v9, 5  ;;  %v3944_v26 = vor.u32 %v3943_v21, %v3940_v63  ;;  %v8619_v22 = vld [vmem:[%s9058_s16 + $0xc0] sm:$0xff]   ;;  %v7130_v9 = vrot.slane %v1317_v20, 9  ;;  %v3926_v5 = vsel %vm9086_vm3, %v3921_v59, %v9997_v57  ;;  %v10083_v20 = vld [vmem:[%s9058_s16 + $0x68] sm:$0x1]  ;;  %v5006_v40 = vld [vmem:[%s10198_s15 + $0x18] sm:$0xff] }
  0xde   : > { %8030 = vmatprep.mubr.msk.bf16.mxu1 %vm782_vm4, %v12455_v54  ;;  %8198 = vmatprep.mubr.msk.bf16.mxu0 %vm782_vm4, %v8616_v24  ;;  %v3935_v24 = vrot.slane %v3933_v56, 5  ;;  %v3957_v56 = vshll.u32 %v10041_v11, 16  ;;  %v3954_v54 = vor.u32 %v3953_v7, %v10043_v19  ;;  %v3968_v60 = vor.u32 %v3967_v44, %v3964_v27  ;;  %12459 = vst [vmem:[#allocation11_spill] sm:$0xff] %v10083_v20  ;;  %v8935_v27 = vld [vmem:[%s9058_s16 + $0xb8] sm:$0xf] }
  0xdf   : > { %8059 = vmatpush3.bf16.msra.mxu1 %v1962_v35  ;;  %v10053_v35 = vld [vmem:[%s12372_s1 + $0x50] sm:$0xff]   ;;  %v1456_v0 = vrot.slane %v1454_v14, 4  ;;  %v10074_v63 = vrot.slane %v3971_v2, 5  ;;  %v3977_v21 = vrot.slane %v3975_v33, 4  ;;  %v10080_v7 = vsel %vm9328_vm7, %v1449_v1, %v1450_v17  ;;  %v7500_v17 = vld [vmem:[%s9058_s16 + $0x78] sm:$0xf] }
  0xe0   : > { %12457 = vst [vmem:[#allocation9_spill] sm:$0xff] %v10053_v35  ;;  %8282 = vmatprep.subr.bf16.mxu1 %v10053_v35  ;;  %v3936_v15 = vsel %vm9086_vm3, %v3931_v55, %v3935_v24  ;;  %v3986_v8 = vshrl.u32 %v7497_v62, 16  ;;  %v3989_v39 = vshll.u32 %v7497_v62, 16  ;;  %v12460_v57 = vcombine.low %v9785_v31, %v9789_v37 }
  0xe1   : > { %v10091_v59 = vrot.slane %v3957_v56, 5  ;;  %v1461_v44 = vrot.slane %v8935_v27, 5  ;;  %v3995_v2 = vshll.u32 %v10069_v25, 16  ;;  %v3999_v33 = vshrl.u32 %v10069_v25, 16  ;;  %v8620_v56 = vld [vmem:[%s9058_s16 + $0xcc] sm:$0xff]  }
  0xe2   : > { %v12461_v55 = vcombine.low %v9814_v53, %v9828_v12  ;;  %v10101_v31 = vrot.slane %v3944_v26, 4  ;;  %v10103_v37 = vrot.slane %v3954_v54, 4  ;;  %v10107_v24 = vsel %vm9328_vm7, %v7130_v9, %v1454_v14  ;;  %v8936_v14 = vld [vmem:[%s9058_s16 + $0xbc] sm:$0x1]  ;;  %v7503_v27 = vld [vmem:[%s9058_s16 + $0x84] sm:$0xf] }
  0xe3   : > { %12462 = vst [vmem:[#allocation12_spill] sm:$0xff] %v10107_v24  ;;  %v10111_v1 = vsel %vm9328_vm7, %v1456_v0, %v1457_v43  ;;  %v3978_v53 = vor.u32 %v3977_v21, %v10074_v63  ;;  %v3981_v12 = vshll.u32 %v10083_v20, 16  ;;  %v7131_v26 = vrot.slane %v1318_v52, 9  ;;  %v10127_v21 = vld [vmem:[%s9058_s16 + $0x7c] sm:$0xf] }
  0xe4   : > { %12463 = vst [vmem:[#allocation13_spill] sm:$0xff] %v10111_v1  ;;  %v10119_v62 = vcombine.low %v3926_v5, %v3936_v15  ;;  %v3988_v54 = vrot.slane %v3986_v8, 4  ;;  %v3991_v9 = vrot.slane %v3989_v39, 5  ;;  %v1463_v43 = vrot.slane %v1461_v44, 4  ;;  %12464 = vst [vmem:[#allocation14_spill] sm:$0xff] %v10127_v21 }
  0xe5   : > { %8031 = vmatmul.mubr.msk.bf16.gmra.mrb[8].mxu1 %vm782_vm4, %v12460_v57  ;;  %8199 = vmatmul.mubr.msk.bf16.gmra.mrb[24].mxu0 %vm782_vm4, %v8617_v23  ;;  %v10114_v23 = vrot.slane %v3968_v60, 4  ;;  %v10122_v0 = vrot.slane %v3995_v2, 5  ;;  %v10124_v60 = vrot.slane %v3999_v33, 4  ;;  %v4010_v57 = vshrl.u32 %v7500_v17, 16  ;;  %v10142_v5 = vld [vmem:[%s9058_s16 + $0x74] sm:$0x1] }
  0xe6   : > { %8034 = vmatprep.mubr.msk.bf16.mxu1 %vm782_vm4, %v12461_v55  ;;  %8202 = vmatprep.mubr.msk.bf16.mxu0 %vm782_vm4, %v8619_v22  ;;  %v1464_v22 = vrot.slane %v8936_v14, 5  ;;  %12465 = vst [vmem:[#allocation15_spill] sm:$0xff] %v10142_v5  ;;  %v10149_v33 = vrot.slane %v3978_v53, 4  ;;  %v10151_v55 = vrot.slane %v3981_v12, 5  ;;  %v10155_v14 = vsel %vm9328_vm7, %v7131_v26, %v1461_v44  ;;  %v10158_v52 = vld [vmem:[%s9058_s16 + $0x88] sm:$0xf] }
  0xe7   : > { %12466 = vst [vmem:[#allocation16_spill] sm:$0xff] %v10158_v52  ;;  %v7506_v15 = vld [vmem:[%s9058_s16 + $0x90] sm:$0xf]  ;;  %v3992_v8 = vor.u32 %v3991_v9, %v3988_v54  ;;  %v4013_v39 = vshll.u32 %v7500_v17, 16  ;;  %v4019_v35 = vshll.u32 %v10127_v21, 16  ;;  %v4023_v30 = vshrl.u32 %v10127_v21, 16 }
  0xe8   : > { %v10164_v53 = vld [vmem:[%s9058_s16 + $0x94] sm:$0xf]  ;;  %v12468_v12 = vcombine.low %v9841_v47, %v9845_v13  ;;  %v10173_v44 = vsel %vm9328_vm7, %v1463_v43, %v1464_v22  ;;  %v4005_v26 = vshll.u32 %v10142_v5, 16  ;;  %v10178_v54 = vrot.slane %v4010_v57, 4  ;;  %v7509_v9 = vld [vmem:[%s9058_s16 + $0x9c] sm:$0xf] }
  0xe9   : > { %12467 = vst [vmem:[#allocation17_spill] sm:$0xff] %v10164_v53  ;;  %v12469_v47 = vcombine.low %v9849_v41, %v9855_v10  ;;  %v4034_v13 = vshrl.u32 %v7503_v27, 16  ;;  %v4043_v22 = vshll.u32 %v10158_v52, 16  ;;  %v4047_v43 = vshrl.u32 %v10158_v52, 16  ;;  %v10201_v41 = vld [vmem:[%s9058_s16 + $0x80] sm:$0x1] }
  0xea   : > { %v4058_v10 = vshrl.u32 %v7506_v15, 16  ;;  %v4067_v57 = vshll.u32 %v10164_v53, 16  ;;  %v5005_v2 = vld [vmem:[%s10198_s15 + $0x10] sm:$0xff]  ;;  %v10207_v17 = vrot.slane %v3992_v8, 4  ;;  %v4015_v52 = vrot.slane %v4013_v39, 5  ;;  %v5004_v8 = vld [vmem:[%s10198_s15 + $0x8] sm:$0xff] }
  0xeb   : > { %v10209_v18 = vrot.slane %v4019_v35, 5  ;;  %v4025_v21 = vrot.slane %v4023_v30, 4  ;;  %v10212_v5 = vld [vmem:[%s9058_s16 + $0x8c] sm:$0x1]  ;;  %5495 = vrot.lane.b32.xlu1 %v5005_v2, %s8979_s17  ;;  %v4085_v25 = vshll.u32 %v7509_v9, 16  ;;  %v4036_v39 = vrot.slane %v4034_v13, 4 }
  0xec   : > { %v10220_v1 = vrot.slane %v4043_v22, 5  ;;  %v4049_v30 = vrot.slane %v4047_v43, 4  ;;  %v4060_v24 = vrot.slane %v4058_v10, 4  ;;  %v4029_v13 = vshll.u32 %v10201_v41, 16  ;;  %v10232_v22 = vld [vmem:[%s9058_s16 + $0x98] sm:$0x1] }
  0xed   : > { %8035 = vmatmul.mubr.msk.bf16.gmra.mrb[12].mxu1 %vm782_vm4, %v12468_v12  ;;  %8203 = vmatmul.mubr.msk.bf16.gmra.mrb[28].mxu0 %vm782_vm4, %v8620_v56  ;;  %v4037_v56 = vshll.u32 %v7503_v27, 16  ;;  %v10191_v12 = vld [vmem:[%s9058_s16 + $0xa0] sm:$0xf]  ;;  %v4071_v27 = vshrl.u32 %v10164_v53, 16  ;;  %v4026_v29 = vor.u32 %v4025_v21, %v10209_v18  ;;  %v12471_v43 = vcombine.low %v9886_v6, %v9890_v16 }
  0xee   : > { %8038 = vmatprep.mubr.msk.bf16.mxu1 %vm782_vm4, %v12469_v47  ;;  %8212 = vmatprep.mubr.msk.bf16.mxu0 %vm782_vm4, %v9966_v42  ;;  %12470 = vst [vmem:[#allocation18_spill] sm:$0xff] %v10191_v12  ;;  %v4061_v42 = vshll.u32 %v7506_v15, 16  ;;  %v5003_v47 = vld [vmem:[%s10198_s15] sm:$0xff]  ;;  %v4082_v15 = vshrl.u32 %v7509_v9, 16  ;;  %v4091_v53 = vshll.u32 %v10191_v12, 16  ;;  %v4095_v20 = vshrl.u32 %v10191_v12, 16 }
  0xef   : > { %5491 = vrot.lane.b32.xlu0 %v5003_v47, %s8979_s17  ;;  %v4039_v35 = vrot.slane %v4037_v56, 5  ;;  %v8623_v47 = vld [vmem:[%s12372_s1 + $0xa8] sm:$0xff]   ;;  %v10225_v9 = vrot.slane %v4067_v57, 5  ;;  %v4073_v11 = vrot.slane %v4071_v27, 4  ;;  %v4016_v12 = vor.u32 %v4015_v52, %v10178_v54  ;;  %5497 = vrot.lane.b32.xlu1 %v5006_v40, %s8979_s17 }
  0xf0   : > { %v4063_v2 = vrot.slane %v4061_v42, 5  ;;  %v4053_v56 = vshll.u32 %v10212_v5, 16  ;;  %v4084_v21 = vrot.slane %v4082_v15, 4  ;;  %v4087_v52 = vrot.slane %v4085_v25, 5  ;;  %v5007_v42 = vld [vmem:[%s10198_s15 + $0x20] sm:$0xff]  ;;  %v5008_v57 = vld [vmem:[%s10198_s15 + $0x28] sm:$0xff] }
  0xf1   : > { %v10242_v54 = vrot.slane %v4091_v53, 5  ;;  %v4097_v10 = vrot.slane %v4095_v20, 4  ;;  %v12472_v40 = vcombine.low %v9938_v4, %v9948_v36  ;;  %v3984_v6 = vsel %vm9086_vm3, %v10149_v33, %v10151_v55  ;;  %v10259_v20 = vld [vmem:[%s9058_s16 + $0xa4] sm:$0x1]  ;;  %v7512_v15 = vld [vmem:[%s9058_s16 + $0xa8] sm:$0xf] }
  0xf2   : > { %v10255_v16 = vrot.slane %v4005_v26, 5  ;;  %v4040_v25 = vor.u32 %v4039_v35, %v4036_v39  ;;  %v12473_v4 = vor.u32 %v10124_v60, %v10122_v0  ;;  %v4064_v53 = vor.u32 %v4063_v2, %v4060_v24  ;;  %v10281_v2 = vld [vmem:[%s9058_s16 + $0xac] sm:$0xf] }
  0xf3   : > { %5493 = vrot.lane.b32.xlu0 %v5004_v8, %s8979_s17  ;;  %v4074_v26 = vor.u32 %v4073_v11, %v10225_v9  ;;  %v4077_v27 = vshll.u32 %v10232_v22, 16  ;;  %v3998_v8 = vsel %vm9086_vm3, %v10207_v17, %v10122_v0  ;;  %v4027_v39 = vrot.slane %v4026_v29, 4  ;;  %5501 = vrot.lane.b32.xlu1 %v5008_v57, %s8979_s17 }
  0xf4   : > { %v4003_v36 = vrot.slane %v12473_v4, 4  ;;  %v4031_v35 = vrot.slane %v4029_v13, 5  ;;  %v4055_v60 = vrot.slane %v4053_v56, 5  ;;  %v4088_v24 = vor.u32 %v4087_v52, %v4084_v21 }
  0xf5   : > { %8039 = vmatmul.mubr.msk.bf16.gmra.mrb[16].mxu1 %vm782_vm4, %v12471_v43  ;;  %8213 = vmatmul.mubr.msk.bf16.vlgmr.msra.gmra.mrb[0].mxu0 %vm782_vm4, %v9977_v32  ;;  %v4050_v32 = vor.u32 %v4049_v30, %v10220_v1  ;;  %v4098_v30 = vor.u32 %v4097_v10, %v10242_v54  ;;  %v4101_v11 = vshll.u32 %v10259_v20, 16  ;;  %v5009_v43 = vld [vmem:[%s10198_s15 + $0x30] sm:$0xff]  ;;  %v4041_v4 = vrot.slane %v4040_v25, 4 }
  0xf6   : > { %8245 = vmatpush3.bf16.msra.mxu0 %v9803_v50  ;;  %8042 = vmatprep.mubr.msk.bf16.mxu1 %vm782_vm4, %v12472_v40  ;;  %v8628_v50 = vld [vmem:[%s12372_s1 + $0xb0] ss:$0 sps:$4 sm:$0x33]   ;;  %v5010_v40 = vld [vmem:[%s10198_s15 + $0x38] sm:$0xff]  ;;  %v4106_v17 = vshrl.u32 %v7512_v15, 16  ;;  %v4109_v29 = vshll.u32 %v7512_v15, 16  ;;  %v12474_v57 = vcombine.low %v9953_v3, %v9957_v45 }
  0xf7   : > { %8216 = vmatprep.mubr.msk.bf16.mxu0 %vm782_vm4, %v10011_v48  ;;  %8246 = vmatprep.subr.bf16.mxu0 %v8623_v47  ;;  %v4017_v48 = vrot.slane %v4016_v12, 4  ;;  %v4051_v0 = vrot.slane %v4050_v32, 4  ;;  %v4008_v12 = vsel %vm9086_vm3, %v4003_v36, %v10255_v16  ;;  %v4065_v13 = vrot.slane %v4064_v53, 4  ;;  %v5012_v36 = vld [vmem:[%s10198_s15 + $0x48] sm:$0xff] }
  0xf8   : > { %5499 = vrot.lane.b32.xlu0 %v5007_v42, %s8979_s17  ;;  %v4075_v56 = vrot.slane %v4074_v26, 4  ;;  %v4079_v21 = vrot.slane %v4077_v27, 5  ;;  %v4115_v10 = vshll.u32 %v10281_v2, 16  ;;  %v4119_v42 = vshrl.u32 %v10281_v2, 16  ;;  %5505 = vrot.lane.b32.xlu1 %v5010_v40, %s8979_s17  ;;  %v7570_v40 = vld [vmem:[%s9058_s16 + $0x60] sm:$0xe] }
  0xf9   : > { %v4022_v52 = vsel %vm9086_vm3, %v4017_v48, %v10209_v18  ;;  %v4032_v18 = vsel %vm9086_vm3, %v4027_v39, %v4031_v35  ;;  %v4089_v16 = vrot.slane %v4088_v24, 4  ;;  %v4099_v25 = vrot.slane %v4098_v30, 4  ;;  %v7515_v35 = vld [vmem:[%s9058_s16 + $0xb4] sm:$0xf] }
  0xfa   : > { %8247 = vmatpush3.bf16.msra.mxu0 %v8623_v47  ;;  %v4808_v47 = vsel %vm831_vm0, %v8628_v50, 0  ;;  %v4103_v32 = vrot.slane %v4101_v11, 5  ;;  %v12475_v53 = vcombine.low %v10016_v58, %v10033_v38  ;;  %v4046_v3 = vsel %vm9086_vm3, %v4041_v4, %v10220_v1  ;;  %v10379_v4 = vld [vmem:[%s9058_s16 + $0xb8] sm:$0xf] }
  0xfb   : > { %8553 = vmatprep.subr.msk.bf16.mxu0 %vm831_vm0, %v8628_v50  ;;  %v5011_v50 = vld [vmem:[%s10198_s15 + $0x40] sm:$0xff]  ;;  %v4056_v45 = vsel %vm9086_vm3, %v4051_v0, %v4055_v60  ;;  %v4111_v26 = vrot.slane %v4109_v29, 5  ;;  %v12476_v58 = vsel %vm9086_vm3, %v10103_v37, %v10091_v59  ;;  %v12477_v38 = vsel %vm9086_vm3, %v10101_v31, %v10043_v19  ;;  %v10336_v59 = vld [vmem:[%s9058_s16 + $0xb0] sm:$0x1]  ;;  %v7568_v37 = vld [vmem:[%s9058_s16 + $0x48] sm:$0xe] }
  0xfc   : > { %5503 = vrot.lane.b32.xlu0 %v5009_v43, %s8979_s17  ;;  %v7152_v1 = vcombine.low %v10155_v14, %v10173_v44  ;;  %v4070_v27 = vsel %vm9086_vm3, %v4065_v13, %v10225_v9  ;;  %v4080_v15 = vsel %vm9086_vm3, %v4075_v56, %v4079_v21  ;;  %v12478_v19 = vsel %vm9086_vm3, %v10114_v23, %v10074_v63  ;;  %v7569_v60 = vld [vmem:[%s9058_s16 + $0x54] sm:$0xe] }
  0xfd   : > { %8043 = vmatmul.mubr.msk.bf16.gmra.mrb[20].mxu1 %vm782_vm4, %v12474_v57  ;;  %8217 = vmatmul.mubr.msk.bf16.gmra.mrb[4].mxu0 %vm782_vm4, %v10018_v49  ;;  %v4108_v49 = vrot.slane %v4106_v17, 4  ;;  %v7535_v31 = vcombine.low %v12478_v19, %v3984_v6  ;;  %v10349_v9 = vcombine.low %v3998_v8, %v4008_v12  ;;  %v10351_v48 = vrot.slane %v4115_v10, 5  ;;  %v10369_v6 = vld [vmem:[%s10198_s15 + $0x50] sm:$0xff]  ;;  %v10372_v8 = vld [vmem:[%s10198_s15 + $0x58] sm:$0xff] }
  0xfe   : > { %8046 = vmatprep.mubr.msk.bf16.mxu1 %vm782_vm4, %v12475_v53  ;;  %8220 = vmatprep.mubr.msk.bf16.mxu0 %vm782_vm4, %v10119_v62  ;;  %v7534_v62 = vcombine.low %v12477_v38, %v12476_v58  ;;  %v10353_v39 = vrot.slane %v4119_v42, 4  ;;  %v10359_v33 = vcombine.low %v4022_v52, %v4032_v18  ;;  %v10361_v55 = vcombine.low %v4046_v3, %v4056_v45  ;;  %v7571_v52 = vld [vmem:[%s9058_s16 + $0x6c] sm:$0xe]  ;;  %v12481_v10 = vld [vmem:[#allocation8_spill] sm:$0xff]  ;;  %v10404_v18 = vld [vmem:[%s10198_s15 + $0x60] sm:$0xff] }
  0xff   : > { %8249 = vmatpush3.bf16.msra.mxu0 %v4808_v47  ;;  %5509 = vrot.lane.b32.xlu1 %v5012_v36, %s8979_s17  ;;  %v4094_v63 = vsel %vm9086_vm3, %v4089_v16, %v10242_v54  ;;  %v4104_v23 = vsel %vm9086_vm3, %v4099_v25, %v4103_v32  ;;  %v10374_v24 = vcombine.low %v4070_v27, %v4080_v15  ;;  %v4125_v11 = vshll.u32 %v10336_v59, 16  ;;  %v10407_v16 = vld [vmem:[%s10198_s15 + $0x68] sm:$0xff]  ;;  %v12482_v25 = vld [vmem:[#allocation12_spill] sm:$0xff]  ;;  %v10431_v27 = vld [vmem:[%s9058_s16 + $0xc0] sm:$0xf] }
 0x100   : > { %5507 = vrot.lane.b32.xlu0 %v5011_v50, %s8979_s17  ;;  %v4112_v30 = vor.u32 %v4111_v26, %v4108_v49  ;;  %v7584_v43 = vrot.slane %v7568_v37, 9  ;;  %v4130_v0 = vshrl.u32 %v7515_v35, 16  ;;  %v4608_v54 = vrot.slane %v9942_v28, 5  ;;  %v12485_v53 = vld [vmem:[#allocation7_spill] sm:$0xff] }
 0x101   : > { %v4611_v17 = vrot.slane %v10004_v46, 5  ;;  %v7585_v29 = vrot.slane %v7569_v60, 9  ;;  %v10383_v12 = vcombine.low %v4094_v63, %v4104_v23  ;;  %v4122_v13 = vor.u32 %v10353_v39, %v10351_v48  ;;  %v12486_v26 = vld [vmem:[#allocation11_spill] sm:$0xff]  ;;  %v12487_v60 = vld [vmem:[#allocation10_spill] sm:$0xff] }
 0x102   : > { %v4133_v56 = vshll.u32 %v7515_v35, 16  ;;  %v4615_v21 = vrot.slane %v9991_v51, 5  ;;  %v12479_v28 = vcombine.low %v10061_v61, %v10080_v7  ;;  %v10400_v47 = vsel %vm9328_vm7, %v7584_v43, %v4608_v54  ;;  %v12483_v61 = vld [vmem:[#allocation13_spill] sm:$0xff]  ;;  %v12488_v23 = vld [vmem:[#allocation15_spill] sm:$0xff]  ;;  %v10454_v43 = vld [vmem:[%s10198_s15 + $0x70] sm:$0xff] }
 0x103   : > { %5513 = vrot.lane.b32.xlu1 %v10372_v8, %s8979_s17  ;;  %v4610_v51 = vrot.slane %v4608_v54, 4  ;;  %v4618_v42 = vrot.slane %v12481_v10, 5  ;;  %v7586_v57 = vrot.slane %v7570_v40, 9  ;;  %v12484_v7 = vcombine.low %v12482_v25, %v12483_v61  ;;  %v10457_v40 = vld [vmem:[%s10198_s15 + $0x78] sm:$0xff]  ;;  %v8624_v54 = vld [vmem:[%s9058_s16 + $0xc] sm:$0xff]  }
 0x104   : > { %5511 = vrot.lane.b32.xlu0 %v10369_v6, %s8979_s17  ;;  %v4139_v32 = vshll.u32 %v10379_v4, 16  ;;  %v10417_v50 = vsel %vm9328_vm7, %v7585_v29, %v4615_v21  ;;  %v4617_v36 = vrot.slane %v4615_v21, 4  ;;  %v4622_v3 = vrot.slane %v12485_v53, 5  ;;  %v12489_v53 = vld [vmem:[#allocation14_spill] sm:$0xff]  ;;  %v10548_v10 = vld [vmem:[%s10198_s15 + $0x90] sm:$0xff] }
 0x105   : > { %8047 = vmatmul.mubr.msk.bf16.gmra.mrb[24].mxu1 %vm782_vm4, %v12479_v28  ;;  %8221 = vmatmul.mubr.msk.bf16.gmra.mrb[8].mxu0 %vm782_vm4, %v7534_v62  ;;  %v10420_v45 = vrot.slane %v4112_v30, 4  ;;  %v10424_v49 = vsel %vm9328_vm7, %v4610_v51, %v4611_v17  ;;  %v4625_v58 = vrot.slane %v12486_v26, 5  ;;  %v7587_v38 = vrot.slane %v7571_v52, 9  ;;  %v10428_v62 = vld [vmem:[%s9058_s16 + $0xbc] sm:$0x1]  ;;  %12493 = vst [vmem:[#allocation3_spill] sm:$0xff] %v10548_v10 }
 0x106   : > { %8050 = vmatprep.mubr.msk.bf16.mxu1 %vm782_vm4, %v12484_v7  ;;  %8224 = vmatprep.mubr.msk.bf16.mxu0 %vm782_vm4, %v7535_v31  ;;  %v10437_v37 = vsel %vm9328_vm7, %v4617_v36, %v4618_v42  ;;  %v10441_v19 = vsel %vm9328_vm7, %v7586_v57, %v4622_v3  ;;  %v4624_v31 = vrot.slane %v4622_v3, 4  ;;  %v10447_v39 = vrot.slane %v4125_v11, 5  ;;  %v7572_v52 = vld [vmem:[%s9058_s16 + $0x78] sm:$0xe]  ;;  %v10473_v51 = vld [vmem:[%s9058_s16 + $0xc4] sm:$0xf] }
 0x107   : > { %5517 = vrot.lane.b32.xlu1 %v10407_v16, %s8979_s17  ;;  %v4629_v63 = vrot.slane %v12487_v60, 5  ;;  %v4632_v30 = vrot.slane %v12488_v23, 5  ;;  %v10460_v17 = vrot.slane %v4130_v0, 4  ;;  %v10462_v29 = vrot.slane %v4133_v56, 5  ;;  %v7271_v42 = vld [vmem:[%s9058_s16 + $0x78] sm:$0xf] }
 0x108   : > { %5515 = vrot.lane.b32.xlu0 %v10404_v18, %s8979_s17  ;;  %v4143_v11 = vshrl.u32 %v10379_v4, 16  ;;  %v10467_v21 = vsel %vm9328_vm7, %v4624_v31, %v4625_v58  ;;  %v10470_v28 = vrot.slane %v4122_v13, 4  ;;  %v10486_v13 = vrot.slane %v4139_v32, 5  ;;  %v7573_v7 = vld [vmem:[%s9058_s16 + $0x84] sm:$0xe] }
 0x109   : > { %v10479_v0 = vsel %vm9328_vm7, %v7587_v38, %v4629_v63  ;;  %v4631_v56 = vrot.slane %v4629_v63, 4  ;;  %v4154_v61 = vshrl.u32 %v10431_v27, 16  ;;  %v7588_v36 = vrot.slane %v7572_v52, 9  ;;  %v10508_v58 = vld [vmem:[%s10198_s15 + $0x80] sm:$0xff]  ;;  %v10511_v38 = vld [vmem:[%s10198_s15 + $0x88] sm:$0xff]  ;;  %v12491_v52 = vld [vmem:[#allocation5_spill] sm:$0xff] }
 0x10a   : > { %v4636_v3 = vrot.slane %v12489_v53, 5  ;;  %v4639_v26 = vrot.slane %v10201_v41, 5  ;;  %v4157_v14 = vshll.u32 %v10431_v27, 16  ;;  %v4163_v44 = vshll.u32 %v10473_v51, 16  ;;  %v7574_v57 = vld [vmem:[%s9058_s16 + $0x90] sm:$0xe] }
 0x10b   : > { %5521 = vrot.lane.b32.xlu1 %v10457_v40, %s8979_s17  ;;  %v10503_v32 = vsel %vm9328_vm7, %v4631_v56, %v4632_v30  ;;  %v2425_v27 = vshll.u32 %v7271_v42, 16  ;;  %v4145_v63 = vrot.slane %v4143_v11, 4  ;;  %v10528_v23 = vrot.slane %v4154_v61, 4  ;;  %v10531_v30 = vld [vmem:[%s9058_s16 + $0xcc] sm:$0xf] }
 0x10c   : > { %5519 = vrot.lane.b32.xlu0 %v10454_v43, %s8979_s17  ;;  %v10526_v31 = vsel %vm9328_vm7, %v7588_v36, %v4636_v3  ;;  %v4638_v60 = vrot.slane %v4636_v3, 4  ;;  %v7589_v53 = vrot.slane %v7573_v7, 9  ;;  %v12492_v3 = vld [vmem:[#allocation16_spill] sm:$0xff]  ;;  %v8626_v7 = vld [vmem:[%s9058_s16 + $0x24] sm:$0xff]   ;;  %v10554_v35 = vrot.slane %v4163_v44, 5 }
 0x10d   : > { %8051 = vmatmul.mubr.msk.bf16.gmra.mrb[28].mxu1 %vm782_vm4, %v7152_v1  ;;  %8225 = vmatmul.mubr.msk.bf16.gmra.mrb[12].mxu0 %vm782_vm4, %v10349_v9  ;;  %v4167_v1 = vshrl.u32 %v10473_v51, 16  ;;  %v10522_v9 = vld [vmem:[%s9058_s16 + $0xc8] sm:$0x1]  ;;  %v2427_v36 = vrot.slane %v2425_v27, 5  ;;  %v4643_v41 = vrot.slane %v12492_v3, 5  ;;  %v4646_v25 = vrot.slane %v10212_v5, 5 }
 0x10e   : > { %8060 = vmatprep.mubr.msk.bf16.mxu1 %vm782_vm4, %v8624_v54  ;;  %8228 = vmatprep.mubr.msk.bf16.mxu0 %vm782_vm4, %v10359_v33  ;;  %v2422_v33 = vshrl.u32 %v7271_v42, 16  ;;  %v12490_v54 = vld [vmem:[#allocation6_spill] sm:$0xff]  ;;  %v8625_v42 = vld [vmem:[%s9058_s16 + $0x18] sm:$0xff]   ;;  %v10544_v11 = vsel %vm9328_vm7, %v4638_v60, %v4639_v26  ;;  %v10561_v60 = vld [vmem:[%s9058_s16 + $0xd0] sm:$0xf]  ;;  %v4136_v5 = vor.u32 %v10462_v29, %v10460_v17  ;;  %v4146_v44 = vor.u32 %v4145_v63, %v10486_v13 }
 0x10f   : > { %v2444_v56 = vsel %vm9086_vm3, %v12491_v52, %v12490_v54  ;;  %5525 = vrot.lane.b32.xlu1 %v10511_v38, %s8979_s17  ;;  %v10551_v54 = vld [vmem:[%s10198_s15 + $0x98] sm:$0xff]  ;;  %v4159_v52 = vrot.slane %v4157_v14, 5  ;;  %v4169_v26 = vrot.slane %v4167_v1, 4  ;;  %v10565_v27 = vsel %vm9328_vm7, %v7589_v53, %v4643_v41  ;;  %v10591_v63 = vld [vmem:[%s10198_s15 + $0xa8] sm:$0xff] }
 0x110   : > { %5523 = vrot.lane.b32.xlu0 %v10508_v58, %s8979_s17  ;;  %v2424_v61 = vrot.slane %v2422_v33, 4  ;;  %12494 = vst [vmem:[#allocation8_spill] sm:$0xff] %v10551_v54  ;;  %v4645_v3 = vrot.slane %v4643_v41, 4  ;;  %v4128_v14 = vsel %vm9086_vm3, %v10470_v28, %v10447_v39  ;;  %v4173_v1 = vshll.u32 %v10522_v9, 16  ;;  %v10588_v41 = vld [vmem:[%s10198_s15 + $0xa0] sm:$0xff]  ;;  %12496 = vst [vmem:[#allocation13_spill] sm:$0xff] %v10591_v63 }
 0x111   : > { %v4178_v39 = vshrl.u32 %v10531_v30, 16  ;;  %v7590_v29 = vrot.slane %v7574_v57, 9  ;;  %12495 = vst [vmem:[#allocation12_spill] sm:$0xff] %v10588_v41  ;;  %v12497_v53 = vld [vmem:[#allocation9_spill] sm:$0xff]  ;;  %v12506_v46 = vcombine.low %v10400_v47, %v10424_v49 }
 0x112   : > { %v2428_v33 = vor.u32 %v2427_v36, %v2424_v61  ;;  %v10585_v17 = vsel %vm9328_vm7, %v4645_v3, %v4646_v25  ;;  %v4191_v61 = vshrl.u32 %v10561_v60, 16  ;;  %v8937_v57 = vld [vmem:[%s12372_s1 + $0x58] sm:$0xff]   ;;  %v4160_v36 = vor.u32 %v4159_v52, %v10528_v23  ;;  %v8627_v25 = vld [vmem:[%s9058_s16 + $0x30] sm:$0xff]  }
 0x113   : > { %5529 = vrot.lane.b32.xlu1 %v10551_v54, %s8979_s17  ;;  %v12499_v3 = vld [vmem:[#allocation17_spill] sm:$0xff]  ;;  %v12501_v54 = vshll.u32 %v10428_v62, 16  ;;  %v10620_v52 = vld [vmem:[%s9058_s16 + $0xd4] sm:$0x1] }
 0x114   : > { %5527 = vrot.lane.b32.xlu0 %v10548_v10, %s8979_s17  ;;  %v2429_v28 = vrot.slane %v2428_v33, 4  ;;  %v7575_v10 = vld [vmem:[%s9058_s16 + $0x9c] sm:$0xe] }
 0x115   : > { %8061 = vmatmul.mubr.msk.bf16.vlgmr.msra.gmra.mrb[0].mxu1 %vm782_vm4, %v8625_v42  ;;  %8229 = vmatmul.mubr.msk.bf16.gmra.mrb[16].mxu0 %vm782_vm4, %v10361_v55  ;;  %v4181_v55 = vshll.u32 %v10531_v30, 16  ;;  %v4187_v42 = vshll.u32 %v10561_v60, 16  ;;  %v4170_v30 = vor.u32 %v4169_v26, %v10554_v35  ;;  %v4151_v23 = vrot.slane %v12501_v54, 5 }
 0x116   : > { %8285 = vmatpush3.bf16.msra.mxu1 %v12497_v53  ;;  %8064 = vmatprep.mubr.msk.bf16.mxu1 %vm782_vm4, %v8626_v7  ;;  %v12498_v7 = vld [vmem:[#allocation4_spill] sm:$0xff]  ;;  %v4650_v53 = vrot.slane %v12499_v3, 5  ;;  %v4137_v3 = vrot.slane %v4136_v5, 4 }
 0x117   : > { %8232 = vmatprep.mubr.msk.bf16.mxu0 %vm782_vm4, %v10374_v24  ;;  %8283 = vmatprep.subr.bf16.mxu1 %v8937_v57  ;;  %v2434_v33 = vsel %vm9086_vm3, %v2429_v28, %v12498_v7  ;;  %v12500_v24 = vsel %vm9086_vm3, %v10420_v45, %v10351_v48  ;;  %v4653_v28 = vrot.slane %v10232_v22, 5  ;;  %v8629_v7 = vld [vmem:[%s9058_s16 + $0x3c] sm:$0xff]   ;;  %v4147_v48 = vrot.slane %v4146_v44, 4 }
 0x118   : > { %v7541_v15 = vcombine.low %v12500_v24, %v4128_v14  ;;  %v10622_v26 = vcombine.low %v2434_v33, %v2444_v56  ;;  %5531 = vrot.lane.b32.xlu0 %v10588_v41, %s8979_s17  ;;  %5533 = vrot.lane.b32.xlu1 %v10591_v63, %s8979_s17  ;;  %v10632_v45 = vsel %vm9328_vm7, %v7590_v29, %v4650_v53  ;;  %v4652_v54 = vrot.slane %v4650_v53, 4  ;;  %v10635_v14 = vld [vmem:[%s10198_s15 + $0xb0] sm:$0xff]  ;;  %v10638_v56 = vld [vmem:[%s10198_s15 + $0xb8] sm:$0xff]  ;;  %v12503_v53 = vld [vmem:[#allocation18_spill] sm:$0xff] }
 0x119   : > { %v4180_v22 = vrot.slane %v4178_v39, 4  ;;  %v4183_v33 = vrot.slane %v4181_v55, 5  ;;  %v10640_v24 = vrot.slane %v4187_v42, 5  ;;  %v4193_v41 = vrot.slane %v4191_v61, 4  ;;  %v8940_v39 = vld [vmem:[%s9058_s16 + $0x20] sm:$0x1] }
 0x11a   : > { %8286 = vmatpush3.bf16.msra.mxu1 %v8937_v57  ;;  %v4161_v63 = vrot.slane %v4160_v36, 4  ;;  %v4171_v5 = vrot.slane %v4170_v30, 4  ;;  %v4175_v44 = vrot.slane %v4173_v1, 5  ;;  %v8938_v29 = vld [vmem:[%s12372_s1 + $0x60] ss:$0 sps:$4 sm:$0x33]   ;;  %v10649_v57 = vsel %vm9328_vm7, %v4652_v54, %v4653_v28 }
 0x11b   : > { %8549 = vmatprep.subr.msk.bf16.mxu1 %vm831_vm0, %v8938_v29  ;;  %v4142_v1 = vsel %vm9086_vm3, %v4137_v3, %v10486_v13  ;;  %v4152_v55 = vsel %vm9086_vm3, %v4147_v48, %v4151_v23  ;;  %v4197_v42 = vshll.u32 %v10620_v52, 16  ;;  %v7591_v61 = vrot.slane %v7575_v10, 9  ;;  %v10667_v36 = vld [vmem:[%s10198_s15 + $0xc0] sm:$0xff]  ;;  %v10670_v30 = vld [vmem:[%s10198_s15 + $0xc8] sm:$0xff]  ;;  %v7564_v13 = vld [vmem:[%s9058_s16 + $0x18] sm:$0xe] }
 0x11c   : > { %5535 = vrot.lane.b32.xlu0 %v10635_v14, %s8979_s17  ;;  %5537 = vrot.lane.b32.xlu1 %v10638_v56, %s8979_s17  ;;  %12502 = vst [vmem:[#allocation7_spill] sm:$0xff] %v10670_v30  ;;  %v4657_v28 = vrot.slane %v12503_v53, 5  ;;  %v4660_v23 = vrot.slane %v10259_v20, 5  ;;  %v4166_v10 = vsel %vm9086_vm3, %v4161_v63, %v10554_v35  ;;  %v12504_v48 = vld [vmem:[#allocation2_spill] sm:$0xff]  ;;  %v7576_v20 = vld [vmem:[%s9058_s16 + $0xa8] sm:$0xe]  ;;  %v7542_v63 = vcombine.low %v4142_v1, %v4152_v55 }
 0x11d   : > { %8065 = vmatmul.mubr.msk.bf16.gmra.mrb[4].mxu1 %vm782_vm4, %v8627_v25  ;;  %8233 = vmatmul.mubr.msk.bf16.gmra.mrb[20].mxu0 %vm782_vm4, %v10383_v12  ;;  %v4184_v12 = vor.u32 %v4183_v33, %v4180_v22  ;;  %v4194_v25 = vor.u32 %v4193_v41, %v10640_v24  ;;  %v8630_v35 = vld [vmem:[%s9058_s16 + $0x48] sm:$0xff]   ;;  %v4199_v22 = vrot.slane %v4197_v42, 5  ;;  %v7580_v33 = vrot.slane %v7564_v13, 9  ;;  %v8631_v29 = vld [vmem:[%s9058_s16 + $0x54] sm:$0xff]  }
 0x11e   : > { %8068 = vmatprep.mubr.msk.bf16.mxu1 %vm782_vm4, %v8629_v7  ;;  %8236 = vmatprep.mubr.msk.bf16.mxu0 %vm782_vm4, %v7541_v15  ;;  %v4176_v7 = vsel %vm9086_vm3, %v4171_v5, %v4175_v44  ;;  %v8939_v15 = vld [vmem:[%s9058_s16 + $0x1c] sm:$0xf]  ;;  %v10687_v41 = vsel %vm9328_vm7, %v7591_v61, %v4657_v28  ;;  %v4659_v54 = vrot.slane %v4657_v28, 4  ;;  %v10696_v5 = vld [vmem:[%s10198_s15 + $0xd0] sm:$0xff]  ;;  %v7592_v55 = vrot.slane %v7576_v20, 9 }
 0x11f   : > { %v4580_v3 = vrot.slane %v8939_v15, 5  ;;  %8287 = vmatpush3.bf16.msra.mxu1 %v12504_v48  ;;  %v10699_v44 = vld [vmem:[%s10198_s15 + $0xd8] sm:$0xff]  ;;  %v7543_v61 = vcombine.low %v4166_v10, %v4176_v7  ;;  %v4185_v53 = vrot.slane %v4184_v12, 4  ;;  %v4195_v28 = vrot.slane %v4194_v25, 4  ;;  %v8941_v12 = vld [vmem:[%s9058_s16 + $0x28] sm:$0xf] }
 0x120   : > { %5539 = vrot.lane.b32.xlu0 %v10667_v36, %s8979_s17  ;;  %5541 = vrot.lane.b32.xlu1 %v10670_v30, %s8979_s17  ;;  %12505 = vst [vmem:[#allocation11_spill] sm:$0xff] %v10699_v44  ;;  %v10704_v15 = vsel %vm9328_vm7, %v4659_v54, %v4660_v23  ;;  %v4583_v30 = vrot.slane %v8940_v39, 5  ;;  %v4664_v42 = vrot.slane %v10281_v2, 5  ;;  %v4667_v13 = vrot.slane %v10336_v59, 5  ;;  %v7565_v39 = vld [vmem:[%s9058_s16 + $0x24] sm:$0xe] }
 0x121   : > { %v4582_v48 = vrot.slane %v4580_v3, 4  ;;  %v4587_v25 = vrot.slane %v8941_v12, 5  ;;  %v4190_v2 = vsel %vm9086_vm3, %v4185_v53, %v10640_v24  ;;  %v4200_v59 = vsel %vm9086_vm3, %v4195_v28, %v4199_v22  ;;  %v7577_v7 = vld [vmem:[%s9058_s16 + $0xb4] sm:$0xe]  ;;  %v7566_v24 = vld [vmem:[%s9058_s16 + $0x30] sm:$0xe] }
 0x122   : > { %v10728_v23 = vsel %vm9328_vm7, %v7592_v55, %v4664_v42  ;;  %v4666_v10 = vrot.slane %v4664_v42, 4  ;;  %v4581_v54 = vsel %vm9328_vm7, %v7580_v33, %v4580_v3  ;;  %v7544_v53 = vcombine.low %v4190_v2, %v4200_v59  ;;  %v8943_v28 = vld [vmem:[%s9058_s16 + $0x2c] sm:$0x1]  ;;  %v8945_v2 = vld [vmem:[%s9058_s16 + $0x40] sm:$0xf] }
 0x123   : > { %v4584_v20 = vsel %vm9328_vm7, %v4582_v48, %v4583_v30  ;;  %v4590_v55 = vrot.slane %v8943_v28, 5  ;;  %v7593_v30 = vrot.slane %v7577_v7, 9  ;;  %v8633_v33 = vld [vmem:[%s9058_s16 + $0x6c] sm:$0xff]   ;;  %v4589_v42 = vrot.slane %v4587_v25, 4  ;;  %v7578_v3 = vld [vmem:[%s9058_s16 + $0xc0] sm:$0xe] }
 0x124   : > { %5543 = vrot.lane.b32.xlu0 %v10696_v5, %s8979_s17  ;;  %5545 = vrot.lane.b32.xlu1 %v10699_v44, %s8979_s17  ;;  %v10739_v22 = vsel %vm9328_vm7, %v4666_v10, %v4667_v13  ;;  %v7601_v48 = vcombine.low %v4581_v54, %v4584_v20  ;;  %v4674_v12 = vrot.slane %v10428_v62, 5  ;;  %v7582_v13 = vrot.slane %v7566_v24, 9  ;;  %v7567_v44 = vld [vmem:[%s9058_s16 + $0x3c] sm:$0xe] }
 0x125   : > { %8069 = vmatmul.mubr.msk.bf16.gmra.mrb[8].mxu1 %vm782_vm4, %v8630_v35  ;;  %8237 = vmatmul.mubr.msk.bf16.gmra.mrb[24].mxu0 %vm782_vm4, %v7542_v63  ;;  %v8942_v35 = vld [vmem:[%s9058_s16 + $0x34] sm:$0xf]  ;;  %v4601_v59 = vrot.slane %v8945_v2, 5  ;;  %v4591_v62 = vsel %vm9328_vm7, %v4589_v42, %v4590_v55  ;;  %v7583_v54 = vrot.slane %v7567_v44, 9  ;;  %v4678_v44 = vrot.slane %v10473_v51, 5 }
 0x126   : > { %8072 = vmatprep.mubr.msk.bf16.mxu1 %vm782_vm4, %v8631_v29  ;;  %8240 = vmatprep.mubr.msk.bf16.mxu0 %vm782_vm4, %v7543_v61  ;;  %v4594_v63 = vrot.slane %v8942_v35, 5  ;;  %v7581_v29 = vrot.slane %v7565_v39, 9  ;;  %v8632_v61 = vld [vmem:[%s9058_s16 + $0x60] sm:$0xff]   ;;  %v4671_v39 = vrot.slane %v10379_v4, 5  ;;  %v8944_v35 = vld [vmem:[%s9058_s16 + $0x38] sm:$0x1] }
 0x127   : > { %v4597_v1 = vrot.slane %v8944_v35, 5  ;;  %v4681_v55 = vrot.slane %v10522_v9, 5 }
 0x128   : > { %v4596_v10 = vrot.slane %v4594_v63, 4  ;;  %v10753_v28 = vsel %vm9328_vm7, %v7593_v30, %v4671_v39  ;;  %v4673_v7 = vrot.slane %v4671_v39, 4  ;;  %v4588_v4 = vsel %vm9328_vm7, %v7581_v29, %v4587_v25  ;;  %v8946_v30 = vld [vmem:[%s9058_s16 + $0x44] sm:$0x1]  ;;  %v7268_v39 = vld [vmem:[%s9058_s16 + $0x6c] sm:$0xf] }
 0x129   : > { %v4595_v24 = vsel %vm9328_vm7, %v7582_v13, %v4594_v63  ;;  %v7594_v25 = vrot.slane %v7578_v3, 9  ;;  %v4603_v29 = vrot.slane %v4601_v59, 4  ;;  %v7602_v42 = vcombine.low %v4588_v4, %v4591_v62  ;;  %v8635_v63 = vld [vmem:[%s9058_s16 + $0x84] sm:$0xff]  }
 0x12a   : > { %v10766_v20 = vsel %vm9328_vm7, %v4673_v7, %v4674_v12  ;;  %v4680_v13 = vrot.slane %v4678_v44, 4  ;;  %v4602_v3 = vsel %vm9328_vm7, %v7583_v54, %v4601_v59  ;;  %v2398_v35 = vshrl.u32 %v7268_v39, 16  ;;  %v8947_v7 = vld [vmem:[%s9058_s16 + $0x70] sm:$0xf]  ;;  %v8951_v59 = vld [vmem:[%s9058_s16 + $0xa0] sm:$0xf] }
 0x12b   : > { %v2401_v9 = vshll.u32 %v7268_v39, 16  ;;  %v2407_v4 = vshll.u32 %v8947_v7, 16  ;;  %v2411_v62 = vshrl.u32 %v8947_v7, 16  ;;  %v8637_v39 = vld [vmem:[%s9058_s16 + $0x9c] sm:$0xff]  }
 0x12c   : > { %v10791_v2 = vsel %vm9328_vm7, %v4680_v13, %v4681_v55 }
 0x12d   : > { %8073 = vmatmul.mubr.msk.bf16.gmra.mrb[12].mxu1 %vm782_vm4, %v8632_v61  ;;  %8241 = vmatmul.mubr.msk.bf16.gmra.mrb[28].mxu0 %vm782_vm4, %v7544_v53  ;;  %v4598_v61 = vsel %vm9328_vm7, %v4596_v10, %v4597_v1  ;;  %v10782_v1 = vsel %vm9328_vm7, %v7594_v25, %v4678_v44  ;;  %v7579_v10 = vld [vmem:[%s9058_s16 + $0xcc] sm:$0xe]  ;;  %v2400_v44 = vrot.slane %v2398_v35, 4  ;;  %v2403_v55 = vrot.slane %v2401_v9, 5  ;;  %v8949_v9 = vld [vmem:[%s9058_s16 + $0x88] sm:$0xf] }
 0x12e   : > { %8076 = vmatprep.mubr.msk.bf16.mxu1 %vm782_vm4, %v8633_v33  ;;  %8250 = vmatprep.mubr.msk.bf16.mxu0 %vm782_vm4, %v7601_v48  ;;  %v4604_v33 = vrot.slane %v8946_v30, 5  ;;  %v8634_v48 = vld [vmem:[%s9058_s16 + $0x78] sm:$0xff]   ;;  %v7603_v12 = vcombine.low %v4595_v24, %v4598_v61  ;;  %v7595_v54 = vrot.slane %v7579_v10, 9  ;;  %v4685_v24 = vrot.slane %v10561_v60, 5 }
 0x12f   : > { %v4688_v61 = vrot.slane %v10620_v52, 5  ;;  %v2404_v10 = vor.u32 %v2403_v55, %v2400_v44  ;;  %v2455_v7 = vshll.u32 %v8949_v9, 16  ;;  %v7280_v44 = vld [vmem:[%s9058_s16 + $0x9c] sm:$0xf]  ;;  %v8639_v55 = vld [vmem:[%s9058_s16 + $0xb4] sm:$0xff]   ;;  %v2507_v53 = vshrl.u32 %v8951_v59, 16 }
 0x130   : > { %v4605_v51 = vsel %vm9328_vm7, %v4603_v29, %v4604_v33  ;;  %v10804_v29 = vsel %vm9328_vm7, %v7595_v54, %v4685_v24  ;;  %v4687_v30 = vrot.slane %v4685_v24, 4  ;;  %v8636_v33 = vld [vmem:[%s9058_s16 + $0x90] sm:$0xff]   ;;  %v8638_v54 = vld [vmem:[%s9058_s16 + $0xa8] sm:$0xff]   ;;  %v2497_v52 = vshll.u32 %v7280_v44, 16 }
 0x131   : > { %v7604_v25 = vcombine.low %v4602_v3, %v4605_v51 }
 0x132   : > { %v10811_v60 = vsel %vm9328_vm7, %v4687_v30, %v4688_v61  ;;  %v2405_v61 = vrot.slane %v2404_v10, 4  ;;  %v12507_v10 = vcombine.low %v10417_v50, %v10437_v37 }
 0x135   : > { %8077 = vmatmul.mubr.msk.bf16.gmra.mrb[16].mxu1 %vm782_vm4, %v8634_v48  ;;  %8251 = vmatmul.mubr.msk.bf16.vlgmr.msra.gmra.mrb[0].mxu0 %vm782_vm4, %v7602_v42  ;;  %v2409_v48 = vrot.slane %v2407_v4, 5  ;;  %v2413_v42 = vrot.slane %v2411_v62, 4  ;;  %v2459_v4 = vshrl.u32 %v8949_v9, 16  ;;  %v7277_v62 = vld [vmem:[%s9058_s16 + $0x90] sm:$0xf]  ;;  %v2494_v9 = vshrl.u32 %v7280_v44, 16 }
 0x136   : > { %8080 = vmatprep.mubr.msk.bf16.mxu1 %vm782_vm4, %v8635_v63  ;;  %8254 = vmatprep.mubr.msk.bf16.mxu0 %vm782_vm4, %v7603_v12  ;;  %v7274_v63 = vld [vmem:[%s9058_s16 + $0x84] sm:$0xf]  ;;  %v8948_v12 = vld [vmem:[%s9058_s16 + $0x74] sm:$0x1]  ;;  %v2470_v49 = vshrl.u32 %v7277_v62, 16  ;;  %v2509_v44 = vrot.slane %v2507_v53, 4  ;;  %v12509_v53 = vcombine.low %v10479_v0, %v10503_v32 }
 0x137   : > { %v2417_v13 = vshll.u32 %v8948_v12, 16  ;;  %v2414_v3 = vor.u32 %v2413_v42, %v2409_v48  ;;  %v2446_v51 = vshrl.u32 %v7274_v63, 16  ;;  %v2449_v35 = vshll.u32 %v7274_v63, 16  ;;  %v8950_v63 = vld [vmem:[%s9058_s16 + $0x94] sm:$0xf] }
 0x138   : > { %v10828_v42 = vrot.slane %v2455_v7, 5  ;;  %v2461_v47 = vrot.slane %v2459_v4, 4  ;;  %v2479_v12 = vshll.u32 %v8950_v63, 16  ;;  %v2472_v37 = vrot.slane %v2470_v49, 4  ;;  %v8953_v49 = vld [vmem:[%s9058_s16 + $0x98] sm:$0x1] }
 0x139   : > { %v2419_v24 = vrot.slane %v2417_v13, 5  ;;  %v2448_v30 = vrot.slane %v2446_v51, 4  ;;  %v2503_v13 = vshll.u32 %v8951_v59, 16  ;;  %v12508_v59 = vcombine.low %v10441_v19, %v10467_v21  ;;  %v8640_v19 = vld [vmem:[%s9058_s16 + $0xc0] sm:$0xff]  }
 0x13a   : > { %v2462_v50 = vor.u32 %v2461_v47, %v10828_v42 }
 0x13d   : > { %8081 = vmatmul.mubr.msk.bf16.gmra.mrb[20].mxu1 %vm782_vm4, %v8636_v33  ;;  %8255 = vmatmul.mubr.msk.bf16.gmra.mrb[4].mxu0 %vm782_vm4, %v7604_v25  ;;  %v2415_v25 = vrot.slane %v2414_v3, 4  ;;  %v2451_v33 = vrot.slane %v2449_v35, 5  ;;  %v2410_v3 = vsel %vm9086_vm3, %v2405_v61, %v2409_v48  ;;  %v8952_v35 = vld [vmem:[%s9058_s16 + $0x8c] sm:$0x1]  ;;  %v2499_v61 = vrot.slane %v2497_v52, 5 }
 0x13e   : > { %8084 = vmatprep.mubr.msk.bf16.mxu1 %vm782_vm4, %v8637_v39  ;;  %8258 = vmatprep.mubr.msk.bf16.mxu0 %vm782_vm4, %v12506_v46  ;;  %v2473_v39 = vshll.u32 %v7277_v62, 16  ;;  %v2483_v46 = vshrl.u32 %v8950_v63, 16  ;;  %v2465_v7 = vshll.u32 %v8952_v35, 16  ;;  %v10848_v62 = vrot.slane %v2479_v12, 5  ;;  %v8954_v52 = vld [vmem:[%s9058_s16 + $0xa4] sm:$0x1] }
 0x13f   : > { %v2420_v51 = vsel %vm9086_vm3, %v2415_v25, %v2419_v24  ;;  %v2452_v4 = vor.u32 %v2451_v33, %v2448_v30  ;;  %v2496_v24 = vrot.slane %v2494_v9, 4  ;;  %v10850_v25 = vrot.slane %v2503_v13, 5  ;;  %v8955_v35 = vld [vmem:[%s9058_s16 + $0xac] sm:$0xf] }
 0x140   : > { %v2475_v48 = vrot.slane %v2473_v39, 5  ;;  %v7305_v21 = vcombine.low %v2410_v3, %v2420_v51  ;;  %v2463_v33 = vrot.slane %v2462_v50, 4  ;;  %v2489_v63 = vshll.u32 %v8953_v49, 16  ;;  %v7283_v39 = vld [vmem:[%s9058_s16 + $0xa8] sm:$0xf] }
 0x141   : > { %v2453_v30 = vrot.slane %v2452_v4, 4  ;;  %v2510_v9 = vor.u32 %v2509_v44, %v10850_v25  ;;  %v2513_v13 = vshll.u32 %v8954_v52, 16  ;;  %v2518_v3 = vshrl.u32 %v7283_v39, 16 }
 0x142   : > { %v2476_v47 = vor.u32 %v2475_v48, %v2472_v37  ;;  %v2521_v51 = vshll.u32 %v7283_v39, 16  ;;  %v12510_v4 = vcombine.low %v10526_v31, %v10544_v11  ;;  %v2491_v37 = vrot.slane %v2489_v63, 5  ;;  %v7289_v63 = vld [vmem:[%s9058_s16 + $0xc0] sm:$0xf] }
 0x143   : > { %v2458_v50 = vsel %vm9086_vm3, %v2453_v30, %v10828_v42  ;;  %v2511_v31 = vrot.slane %v2510_v9, 4  ;;  %v2515_v11 = vrot.slane %v2513_v13, 5  ;;  %v2520_v49 = vrot.slane %v2518_v3, 4 }
 0x144   : > { %v2477_v32 = vrot.slane %v2476_v47, 4  ;;  %v2523_v39 = vrot.slane %v2521_v51, 5  ;;  %v12511_v9 = vcombine.low %v10565_v27, %v10585_v17  ;;  %v8957_v51 = vld [vmem:[%s9058_s16 + $0xb0] sm:$0x1]  ;;  %v8958_v27 = vld [vmem:[%s9058_s16 + $0xc4] sm:$0xf] }
 0x145   : > { %8085 = vmatmul.mubr.msk.bf16.gmra.mrb[24].mxu1 %vm782_vm4, %v8638_v54  ;;  %8259 = vmatmul.mubr.msk.bf16.gmra.mrb[8].mxu0 %vm782_vm4, %v12507_v10  ;;  %v2485_v54 = vrot.slane %v2483_v46, 4  ;;  %v2500_v46 = vor.u32 %v2499_v61, %v2496_v24  ;;  %v7286_v10 = vld [vmem:[%s9058_s16 + $0xb4] sm:$0xf]  ;;  %v8956_v24 = vld [vmem:[%s9058_s16 + $0xb8] sm:$0xf]  ;;  %v2516_v13 = vsel %vm9086_vm3, %v2511_v31, %v2515_v11  ;;  %v2575_v17 = vshll.u32 %v8958_v27, 16 }
 0x146   : > { %8088 = vmatprep.mubr.msk.bf16.mxu1 %vm782_vm4, %v8639_v55  ;;  %8262 = vmatprep.mubr.msk.bf16.mxu0 %vm782_vm4, %v12508_v59  ;;  %v2467_v55 = vrot.slane %v2465_v7, 5  ;;  %v2527_v7 = vshll.u32 %v8955_v35, 16  ;;  %v2531_v59 = vshrl.u32 %v8955_v35, 16  ;;  %v2542_v48 = vshrl.u32 %v7286_v10, 16 }
 0x147   : > { %v2486_v12 = vor.u32 %v2485_v54, %v10848_v62  ;;  %v2545_v54 = vshll.u32 %v7286_v10, 16  ;;  %v2551_v61 = vshll.u32 %v8956_v24, 16  ;;  %v2555_v44 = vshrl.u32 %v8956_v24, 16 }
 0x148   : > { %v2468_v0 = vsel %vm9086_vm3, %v2463_v33, %v2467_v55  ;;  %v2529_v52 = vrot.slane %v2527_v7, 5  ;;  %v2533_v42 = vrot.slane %v2531_v59, 4  ;;  %v2482_v10 = vsel %vm9086_vm3, %v2477_v32, %v10848_v62 }
 0x149   : > { %v7307_v30 = vcombine.low %v2458_v50, %v2468_v0  ;;  %v2547_v55 = vrot.slane %v2545_v54, 5  ;;  %v2553_v33 = vrot.slane %v2551_v61, 5  ;;  %v2557_v47 = vrot.slane %v2555_v44, 4  ;;  %v8959_v0 = vld [vmem:[%s9058_s16 + $0xbc] sm:$0x1] }
 0x14a   : > { %v2524_v62 = vor.u32 %v2523_v39, %v2520_v49  ;;  %v2534_v3 = vor.u32 %v2533_v42, %v2529_v52  ;;  %v2537_v35 = vshll.u32 %v8957_v51, 16  ;;  %v2569_v7 = vshll.u32 %v7289_v63, 16 }
 0x14b   : > { %v2579_v59 = vshrl.u32 %v8958_v27, 16  ;;  %v2558_v50 = vor.u32 %v2557_v47, %v2553_v33  ;;  %v2561_v32 = vshll.u32 %v8959_v0, 16  ;;  %v12513_v49 = vcombine.low %v10687_v41, %v10704_v15  ;;  %v8960_v47 = vld [vmem:[%s9058_s16 + $0xc8] sm:$0x1]  ;;  %v5035_v0 = vld [vmem:[%s12375_s4] sm:$0xff] }
 0x14c   : > { %v2525_v54 = vrot.slane %v2524_v62, 4  ;;  %v2535_v24 = vrot.slane %v2534_v3, 4  ;;  %v2539_v61 = vrot.slane %v2537_v35, 5  ;;  %v12514_v42 = vcombine.low %v10728_v23, %v10739_v22  ;;  %v10935_v3 = vld [vmem:[%s10198_s15 + $0xe0] sm:$0xff] }
 0x14d   : > { %8089 = vmatmul.mubr.msk.bf16.gmra.mrb[28].mxu1 %vm782_vm4, %v8640_v19  ;;  %8263 = vmatmul.mubr.msk.bf16.gmra.mrb[12].mxu0 %vm782_vm4, %v12509_v53  ;;  %v2487_v19 = vrot.slane %v2486_v12, 4  ;;  %v2544_v53 = vrot.slane %v2542_v48, 4  ;;  %v2559_v31 = vrot.slane %v2558_v50, 4  ;;  %v2563_v11 = vrot.slane %v2561_v32, 5 }
 0x14e   : > { %8114 = vmatprep.mubr.msk.bf16.mxu1 %vm782_vm4, %v7305_v21  ;;  %8266 = vmatprep.mubr.msk.bf16.mxu0 %vm782_vm4, %v12510_v4  ;;  %v2501_v21 = vrot.slane %v2500_v46, 4  ;;  %v2530_v39 = vsel %vm9086_vm3, %v2525_v54, %v2529_v52  ;;  %v2585_v41 = vshll.u32 %v8960_v47, 16  ;;  %v5042_v47 = vld [vmem:[%s12375_s4 + $0x38] sm:$0xff] }
 0x14f   : > { %v2492_v12 = vsel %vm9086_vm3, %v2487_v19, %v2491_v37  ;;  %v2548_v4 = vor.u32 %v2547_v55, %v2544_v53  ;;  %v2571_v19 = vrot.slane %v2569_v7, 5  ;;  %v2564_v52 = vsel %vm9086_vm3, %v2559_v31, %v2563_v11  ;;  %5547 = vrot.lane.b32.xlu0 %v10935_v3, %s8979_s17  ;;  %v8963_v31 = vld [vmem:[%s10198_s15 + $0x8] sm:$0xff] }
 0x150   : > { %v2506_v46 = vsel %vm9086_vm3, %v2501_v21, %v10850_v25  ;;  %v12512_v25 = vcombine.low %v10632_v45, %v10649_v57  ;;  %v7308_v37 = vcombine.low %v2482_v10, %v2492_v12  ;;  %v2577_v45 = vrot.slane %v2575_v17, 5 }
 0x151   : > { %v7309_v48 = vcombine.low %v2506_v46, %v2516_v13  ;;  %v2581_v57 = vrot.slane %v2579_v59, 4  ;;  %v2549_v21 = vrot.slane %v2548_v4, 4  ;;  %v2587_v12 = vrot.slane %v2585_v41, 5 }
 0x152   : > { %v12515_v46 = vcombine.low %v10753_v28, %v10766_v20  ;;  %v10940_v28 = vld [vmem:[%s10198_s15 + $0xe8] sm:$0xff]  ;;  %v10943_v20 = vld [vmem:[%s10198_s15 + $0xf0] sm:$0xff] }
 0x153   : > { %v2582_v55 = vor.u32 %v2581_v57, %v2577_v45  ;;  %v2554_v15 = vsel %vm9086_vm3, %v2549_v21, %v2553_v33  ;;  %v12516_v33 = vcombine.low %v10782_v1, %v10791_v2  ;;  %5549 = vrot.lane.b32.xlu1 %v10940_v28, %s8979_s17  ;;  %v12517_v1 = vcombine.low %v10804_v29, %v10811_v60  ;;  %v8962_v57 = vld [vmem:[%s10198_s15 + $0x10] sm:$0xff] }
 0x154   : > { %v7311_v23 = vcombine.low %v2554_v15, %v2564_v52  ;;  %5551 = vrot.lane.b32.xlu0 %v10943_v20, %s8979_s17  ;;  %v5043_v15 = vld [vmem:[%s12375_s4 + $0x40] sm:$0xff] }
 0x155   : > { %8115 = vmatmul.mubr.msk.bf16.vlgmr.msra.gmra.mrb[16].mxu1 %vm782_vm4, %v10622_v26  ;;  %8267 = vmatmul.mubr.msk.bf16.gmra.mrb[16].mxu0 %vm782_vm4, %v12511_v9  ;;  %v2566_v26 = vshrl.u32 %v7289_v63, 16  ;;  %v2583_v10 = vrot.slane %v2582_v55, 4  ;;  %v5041_v55 = vld [vmem:[%s12375_s4 + $0x30] sm:$0xff] }
 0x156   : > { %8118 = vmatprep.mubr.msk.bf16.mxu1 %vm782_vm4, %v7307_v30  ;;  %8270 = vmatprep.mubr.msk.bf16.mxu0 %vm782_vm4, %v12512_v25  ;;  %v2540_v30 = vsel %vm9086_vm3, %v2535_v24, %v2539_v61  ;;  %v5038_v24 = vld [vmem:[%s12375_s4 + $0x18] sm:$0xff] }
 0x157   : > { %v2568_v44 = vrot.slane %v2566_v26, 4  ;;  %v7310_v63 = vcombine.low %v2530_v39, %v2540_v30  ;;  %v2588_v13 = vsel %vm9086_vm3, %v2583_v10, %v2587_v12  ;;  %5553 = vrot.lane.b32.xlu1 %v10953_v34, %s8979_s17  ;;  %v8965_v30 = vld [vmem:[%s10198_s15 + $0x20] sm:$0xff]  ;;  %v8966_v10 = vld [vmem:[%s10198_s15 + $0x28] sm:$0xff] }
 0x159   : > { %v2572_v53 = vor.u32 %v2571_v19, %v2568_v44  ;;  %v8961_v44 = vld [vmem:[%s10198_s15] sm:$0xff] }
 0x15a   : > { %v5067_v19 = vmul.f32 %v8961_v44, %v5035_v0 }
 0x15b   : > { %v2573_v22 = vrot.slane %v2572_v53, 4 }
 0x15c   : > { %v5100_v41 = vsel %vm5099_vm8, %v5067_v19, 0.0 }
 0x15d   : > { %8119 = vmatmul.mubr.msk.bf16.gmra.mrb[20].mxu1 %vm782_vm4, %v7308_v37  ;;  %8271 = vmatmul.mubr.msk.bf16.gmra.mrb[20].mxu0 %vm782_vm4, %v12513_v49  ;;  %v2578_v9 = vsel %vm9086_vm3, %v2573_v22, %v2577_v45  ;;  %v5037_v37 = vld [vmem:[%s12375_s4 + $0x10] sm:$0xff]  ;;  %v5039_v45 = vld [vmem:[%s12375_s4 + $0x20] sm:$0xff]  ;;  %v8964_v49 = vld [vmem:[%s10198_s15 + $0x18] sm:$0xff] }
 0x15e   : > { %8122 = vmatprep.mubr.msk.bf16.mxu1 %vm782_vm4, %v7309_v48  ;;  %8274 = vmatprep.mubr.msk.bf16.mxu0 %vm782_vm4, %v12514_v42  ;;  %v7312_v62 = vcombine.low %v2578_v9, %v2588_v13  ;;  %v5036_v48 = vld [vmem:[%s12375_s4 + $0x8] sm:$0xff]  ;;  %v5069_v21 = vmul.f32 %v8962_v57, %v5037_v37  ;;  %v5070_v39 = vmul.f32 %v8964_v49, %v5038_v24  ;;  %v8968_v37 = vld [vmem:[%s10198_s15 + $0x38] sm:$0xff]  ;;  %v8969_v57 = vld [vmem:[%s10198_s15 + $0x40] sm:$0xff] }
 0x15f   : > { %v5068_v11 = vmul.f32 %v8963_v31, %v5036_v48  ;;  %v5040_v42 = vld [vmem:[%s12375_s4 + $0x28] sm:$0xff]  ;;  %v5071_v53 = vmul.f32 %v8965_v30, %v5039_v45  ;;  %v5074_v48 = vmul.f32 %v8968_v37, %v5042_v47  ;;  %v5046_v24 = vld [vmem:[%s12375_s4 + $0x58] sm:$0xff]  ;;  %v5047_v30 = vld [vmem:[%s12375_s4 + $0x60] sm:$0xff] }
 0x160   : > { %v5072_v12 = vmul.f32 %v8966_v10, %v5040_v42  ;;  %v8970_v49 = vld [vmem:[%s10198_s15 + $0x48] sm:$0xff]  ;;  %v5078_v47 = vmul.f32 %v5046_v24, %v10372_v8 }
 0x161   : > { %v5101_v22 = vsel %vm5099_vm8, %v5068_v11, 0.0  ;;  %v11039_v45 = vsel %vm5099_vm8, %v5071_v53, 0.0  ;;  %v5048_v8 = vld [vmem:[%s12375_s4 + $0x68] sm:$0xff] }
 0x162   : > { %v5105_v53 = vsel %vm5099_vm8, %v5072_v12, 0.0 }
 0x165   : > { %8123 = vmatmul.mubr.msk.bf16.gmra.mrb[24].mxu1 %vm782_vm4, %v7310_v63  ;;  %8275 = vmatmul.mubr.msk.bf16.gmra.mrb[24].mxu0 %vm782_vm4, %v12515_v46  ;;  %v11021_v63 = vld [vmem:[%s12373_s2] ss:$0 sm:$0xff]  ;;  %v5044_v46 = vld [vmem:[%s12375_s4 + $0x48] sm:$0xff] }
 0x166   : > { %8126 = vmatprep.mubr.msk.bf16.mxu1 %vm782_vm4, %v7311_v23  ;;  %8278 = vmatprep.mubr.msk.bf16.mxu0 %vm782_vm4, %v12516_v33  ;;  %v5102_v23 = vsel %vm5099_vm8, %v5069_v21, 0.0  ;;  %v5045_v33 = vld [vmem:[%s12375_s4 + $0x50] sm:$0xff]  ;;  %v5075_v21 = vmul.f32 %v8969_v57, %v5043_v15  ;;  %v5080_v57 = vmul.f32 %v5048_v8, %v10407_v16  ;;  %v5054_v16 = vld [vmem:[%s12375_s4 + $0x98] sm:$0xff] }
 0x167   : > { %v5077_v42 = vmul.f32 %v5045_v33, %v10369_v6  ;;  %v5107_v6 = vsel %vm5099_vm8, %v5074_v48, 0.0  ;;  %v11086_v48 = vsel %vm5099_vm8, %v5078_v47, 0.0  ;;  %v12524_v8 = vld [vmem:[#allocation8_spill] sm:$0xff] }
 0x168   : > { %v11061_v33 = vsel %vm5099_vm8, %v5075_v21, 0.0 }
 0x16d   : > { %8127 = vmatmul.mubr.msk.bf16.gmra.mrb[28].mxu1 %vm782_vm4, %v7312_v62  ;;  %8279 = vmatmul.mubr.msk.bf16.gmra.mrb[28].mxu0 %vm782_vm4, %v12517_v1  ;;  %v5103_v62 = vsel %vm5099_vm8, %v5070_v39, 0.0  ;;  %v8967_v1 = vld [vmem:[%s10198_s15 + $0x30] sm:$0xff]  ;;  %v5076_v39 = vmul.f32 %v8970_v49, %v5044_v46  ;;  %v5052_v49 = vld [vmem:[%s12375_s4 + $0x88] sm:$0xff] }
 0x16e   : > { %v5073_v0 = vmul.f32 %v8967_v1, %v5041_v55 }
 0x1e8   : > { %v8062_v2 = vpop.f32.mrb[0].mxu1 }
 0x1e9   : > { %v1998_v51 = vpop.f32.mrb[1].mxu1 }
 0x1ea   : > { %v8063_v35 = vpop.f32.mrb[2].mxu1 }
 0x1eb   : > { %v10959_v25 = vpop.f32.mrb[3].mxu1 }
 0x1f0   : > { %v10961_v26 = vpop.f32.mrb[4].mxu1 }
 0x1f1   : > { %v10963_v7 = vpop.f32.mrb[5].mxu1 }
 0x1f2   : > { %v10965_v29 = vpop.f32.mrb[6].mxu1 }
 0x1f3   : > { %v10967_v60 = vpop.f32.mrb[7].mxu1 }
 0x1f8   : > { %v10969_v27 = vpop.f32.mrb[8].mxu1 }
 0x1f9   : > { %v10971_v17 = vpop.f32.mrb[9].mxu1 }
 0x1fa   : > { %v10973_v59 = vpop.f32.mrb[10].mxu1 }
 0x1fb   : > { %v10975_v4 = vpop.f32.mrb[11].mxu1 }
 0x200   : > { %v10977_v50 = vpop.f32.mrb[12].mxu1 }
 0x201   : > { %v10982_v32 = vpop.f32.mrb[13].mxu1 }
 0x202   : > { %v10990_v54 = vpop.f32.mrb[14].mxu1 }
 0x203   : > { %v10995_v61 = vpop.f32.mrb[15].mxu1 }
 0x208   : > { %v8252_v52 = vpop.f32.mrb[0].mxu0 }
 0x209   : > { %v8288_v9 = vadd.f32 %v8252_v52, %v8062_v2  ;;  %v4844_v13 = vpop.f32.mrb[1].mxu0  ;;  %v5106_v52 = vsel %vm5099_vm8, %v5073_v0, 0.0 }
 0x20a   : > { %v8289_v44 = vadd.f32 %v4844_v13, %v1998_v51  ;;  %v8253_v19 = vpop.f32.mrb[2].mxu0  ;;  %v11077_v13 = vsel %vm5099_vm8, %v5077_v42, 0.0 }
 0x20b   : > { %v5141_v2 = vadd.f32 %v8288_v9, %v11021_v63  ;;  %v8290_v31 = vadd.f32 %v8253_v19, %v8063_v35  ;;  %v4847_v11 = vpop.f32.mrb[3].mxu0 }
 0x20c   : > { %v5139_v51 = vadd.f32 %v8289_v44, %v11021_v63  ;;  %v8291_v55 = vadd.f32 %v4847_v11, %v10959_v25  ;;  %v5079_v25 = vmul.f32 %v5047_v30, %v10404_v18  ;;  %v5050_v18 = vld [vmem:[%s12375_s4 + $0x78] sm:$0xff] }
 0x20d   : > { %v11052_v15 = vadd.f32 %v5141_v2, %v5102_v23  ;;  %v5142_v35 = vadd.f32 %v8290_v31, %v11021_v63  ;;  %v5049_v23 = vld [vmem:[%s12375_s4 + $0x70] sm:$0xff]  ;;  %v5082_v11 = vmul.f32 %v5050_v18, %v10457_v40 }
 0x20e   : > { %v11057_v10 = vadd.f32 %v5139_v51, %v5100_v41  ;;  %v5140_v46 = vadd.f32 %v8291_v55, %v11021_v63  ;;  %v11074_v41 = vsel %vm5099_vm8, %v5076_v39, 0.0  ;;  %v5081_v21 = vmul.f32 %v5049_v23, %v10454_v43 }
 0x20f   : > { %12518 = vst [vmem:[#allocation10_spill] sm:$0xff] %v11052_v15  ;;  %v7639_v12 = vmul.f32 -1.442695, %v11052_v15  ;;  %v11071_v9 = vadd.f32 %v5142_v35, %v5103_v62  ;;  %v5051_v62 = vld [vmem:[%s12375_s4 + $0x80] sm:$0xff]  ;;  %v11113_v51 = vsel %vm5099_vm8, %v5079_v25, 0.0  ;;  %v5084_v35 = vmul.f32 %v5052_v49, %v10511_v38 }
 0x210   : > { %12519 = vst [vmem:[#allocation15_spill] sm:$0xff] %v11057_v10  ;;  %v7637_v1 = vmul.f32 -1.442695, %v11057_v10  ;;  %v11083_v0 = vadd.f32 %v5140_v46, %v5101_v22  ;;  %v8256_v37 = vpop.f32.mrb[4].mxu0  ;;  %v5083_v40 = vmul.f32 %v5051_v62, %v10508_v58  ;;  %v12523_v46 = vld [vmem:[#allocation3_spill] sm:$0xff]  ;;  %v5086_v23 = vmul.f32 %v5054_v16, %v12524_v8  ;;  %v5055_v58 = vld [vmem:[%s12375_s4 + $0xa0] sm:$0xff] }
 0x211   : > { %12520 = vst [vmem:[#allocation14_spill] sm:$0xff] %v11071_v9  ;;  %8641 = vpow2.f32 %v7639_v12  ;;  %v7640_v24 = vmul.f32 -1.442695, %v11071_v9  ;;  %v8292_v44 = vadd.f32 %v8256_v37, %v10961_v26  ;;  %v4860_v19 = vpop.f32.mrb[5].mxu0  ;;  %v5053_v26 = vld [vmem:[%s12375_s4 + $0x90] sm:$0xff]  ;;  %v11126_v25 = vsel %vm5099_vm8, %v5080_v57, 0.0 }
 0x212   : > { %12521 = vst [vmem:[#allocation6_spill] sm:$0xff] %v11083_v0  ;;  %v7638_v22 = vmul.f32 -1.442695, %v11083_v0  ;;  %v8293_v2 = vadd.f32 %v4860_v19, %v10963_v7  ;;  %v8257_v31 = vpop.f32.mrb[6].mxu0  ;;  %v11135_v38 = vsel %vm5099_vm8, %v5081_v21, 0.0  ;;  %v11141_v37 = vsel %vm5099_vm8, %v5083_v40, 0.0 }
 0x213   : > { %8643 = vpow2.f32 %v7640_v24  ;;  %v5145_v43 = vadd.f32 %v8292_v44, %v11021_v63  ;;  %v8294_v7 = vadd.f32 %v8257_v31, %v10965_v29  ;;  %v4863_v39 = vpop.f32.mrb[7].mxu0  ;;  %v5085_v29 = vmul.f32 %v5053_v26, %v12523_v46  ;;  %v12528_v44 = vld [vmem:[#allocation12_spill] sm:$0xff]  ;;  %v12529_v40 = vld [vmem:[#allocation13_spill] sm:$0xff] }
 0x214   : > { %8645 = vpow2.f32 %v7637_v1  ;;  %v5143_v42 = vadd.f32 %v8293_v2, %v11021_v63  ;;  %v8295_v30 = vadd.f32 %v4863_v39, %v10967_v60  ;;  %v11138_v1 = vsel %vm5099_vm8, %v5082_v11, 0.0  ;;  %v5057_v26 = vld [vmem:[%s12375_s4 + $0xb0] sm:$0xff] }
 0x215   : > { %8647 = vpow2.f32 %v7638_v22  ;;  %v11115_v55 = vadd.f32 %v5145_v43, %v5106_v52  ;;  %v5146_v47 = vadd.f32 %v8294_v7, %v11021_v63  ;;  %v5087_v19 = vmul.f32 %v5055_v58, %v12528_v44 }
 0x216   : > { %v5144_v60 = vadd.f32 %v8295_v30, %v11021_v63  ;;  %v11130_v12 = vadd.f32 %v5143_v42, %v11039_v45  ;;  %v5056_v45 = vld [vmem:[%s12375_s4 + $0xa8] sm:$0xff]  ;;  %v11152_v22 = vsel %vm5099_vm8, %v5084_v35, 0.0  ;;  %v11155_v2 = vsel %vm5099_vm8, %v5085_v29, 0.0  ;;  %v5059_v42 = vld [vmem:[%s12375_s4 + $0xc0] sm:$0xff] }
 0x217   : > { %12522 = vst [vmem:[#allocation5_spill] sm:$0xff] %v11115_v55  ;;  %v7643_v52 = vmul.f32 -1.442695, %v11115_v55  ;;  %v11132_v18 = vadd.f32 %v5146_v47, %v5107_v6  ;;  %v11178_v29 = vsel %vm5099_vm8, %v5087_v19, 0.0  ;;  %v5091_v19 = vmul.f32 %v5059_v42, %v10667_v36 }
 0x218   : > { %12525 = vst [vmem:[#allocation16_spill] sm:$0xff] %v11130_v12  ;;  %v11143_v62 = vadd.f32 %v5144_v60, %v5105_v53  ;;  %v8260_v24 = vpop.f32.mrb[8].mxu0  ;;  %v11158_v53 = vsel %vm5099_vm8, %v5086_v23, 0.0  ;;  %v7641_v16 = vmul.f32 -1.442695, %v11130_v12  ;;  %v5089_v60 = vmul.f32 %v5057_v26, %v10635_v14 }
 0x219   : > { %12526 = vst [vmem:[#allocation9_spill] sm:$0xff] %v11132_v18  ;;  %8649 = vpow2.f32 %v7643_v52  ;;  %v7644_v6 = vmul.f32 -1.442695, %v11132_v18  ;;  %v8296_v57 = vadd.f32 %v8260_v24, %v10969_v27  ;;  %v4876_v21 = vpop.f32.mrb[9].mxu0  ;;  %v5058_v27 = vld [vmem:[%s12375_s4 + $0xb8] sm:$0xff] }
 0x21a   : > { %12527 = vst [vmem:[#allocation4_spill] sm:$0xff] %v11143_v62  ;;  %v8297_v31 = vadd.f32 %v4876_v21, %v10971_v17  ;;  %v8261_v11 = vpop.f32.mrb[10].mxu0  ;;  %v5088_v17 = vmul.f32 %v5056_v45, %v12529_v40  ;;  %v7642_v30 = vmul.f32 -1.442695, %v11143_v62  ;;  %v11186_v52 = vmul.f32 %v5058_v27, %v10638_v56 }
 0x21b   : > { %v8642_v49 = vpop.eup %8641  ;;  %8651 = vpow2.f32 %v7644_v6  ;;  %v5149_v43 = vadd.f32 %v8296_v57, %v11021_v63  ;;  %v8298_v7 = vadd.f32 %v8261_v11, %v10973_v59  ;;  %v4879_v39 = vpop.f32.mrb[11].mxu0 }
 0x21c   : > { %v5147_v47 = vadd.f32 %v8297_v31, %v11021_v63  ;;  %v8299_v35 = vadd.f32 %v4879_v39, %v10975_v4  ;;  %v5301_v8 = vadd.f32 1.0, %v8642_v49  ;;  %8653 = vpow2.f32 %v7641_v16  ;;  %v12534_v49 = vld [vmem:[#allocation7_spill] sm:$0xff] }
 0x21d   : > { %v8644_v46 = vpop.eup %8643  ;;  %v11181_v59 = vadd.f32 %v5149_v43, %v11077_v13  ;;  %v5150_v23 = vadd.f32 %v8298_v7, %v11021_v63  ;;  %v5060_v13 = vld [vmem:[%s12375_s4 + $0xc8] sm:$0xff]  ;;  %8655 = vpow2.f32 %v7642_v30  ;;  %v11205_v36 = vsel %vm5099_vm8, %v5088_v17, 0.0 }
 0x21e   : > { %v8646_v58 = vpop.eup %8645  ;;  %v11189_v24 = vadd.f32 %v5147_v47, %v11061_v33  ;;  %v5148_v4 = vadd.f32 %v8299_v35, %v11021_v63  ;;  %v5302_v56 = vadd.f32 1.0, %v8644_v46  ;;  %8657 = vrcp.f32 %v5301_v8  ;;  %v5062_v47 = vld [vmem:[%s12375_s4 + $0xd8] sm:$0xff] }
 0x21f   : > { %12530 = vst [vmem:[#allocation17_spill] sm:$0xff] %v11181_v59  ;;  %v8648_v44 = vpop.eup %8647  ;;  %v7647_v45 = vmul.f32 -1.442695, %v11181_v59  ;;  %v11198_v14 = vadd.f32 %v5150_v23, %v11086_v48  ;;  %v5299_v21 = vadd.f32 1.0, %v8646_v58  ;;  %v11209_v26 = vmul.f32 %v5060_v13, %v12534_v49  ;;  %v12538_v13 = vld [vmem:[#allocation11_spill] sm:$0xff] }
 0x220   : > { %12531 = vst [vmem:[#allocation18_spill] sm:$0xff] %v11189_v24  ;;  %v7645_v33 = vmul.f32 -1.442695, %v11189_v24  ;;  %v11202_v6 = vadd.f32 %v5148_v4, %v11074_v41  ;;  %v8264_v57 = vpop.f32.mrb[12].mxu0  ;;  %v5300_v48 = vadd.f32 1.0, %v8648_v44  ;;  %v5061_v41 = vld [vmem:[%s12375_s4 + $0xd0] sm:$0xff] }
 0x221   : > { %12532 = vst [vmem:[#allocation2_spill] sm:$0xff] %v11198_v14  ;;  %v8300_v31 = vadd.f32 %v8264_v57, %v10977_v50  ;;  %v4892_v11 = vpop.f32.mrb[13].mxu0  ;;  %8659 = vpow2.f32 %v7647_v45  ;;  %v7648_v7 = vmul.f32 -1.442695, %v11198_v14  ;;  %v5093_v8 = vmul.f32 %v5061_v41, %v10696_v5 }
 0x222   : > { %12533 = vst [vmem:[#allocation3_spill] sm:$0xff] %v11202_v6  ;;  %v8301_v27 = vadd.f32 %v4892_v11, %v10982_v32  ;;  %v8265_v16 = vpop.f32.mrb[14].mxu0  ;;  %8661 = vpow2.f32 %v7645_v33  ;;  %v7646_v17 = vmul.f32 -1.442695, %v11202_v6  ;;  %v11245_v57 = vsel %vm5099_vm8, %v5089_v60, 0.0 }
 0x223   : > { %v8650_v43 = vpop.eup %8649  ;;  %v5153_v39 = vadd.f32 %v8300_v31, %v11021_v63  ;;  %v8302_v50 = vadd.f32 %v8265_v16, %v10990_v54  ;;  %v4895_v40 = vpop.f32.mrb[15].mxu0  ;;  %8663 = vrcp.f32 %v5302_v56 }
 0x224   : > { %v5151_v42 = vadd.f32 %v8301_v27, %v11021_v63  ;;  %v8303_v32 = vadd.f32 %v4895_v40, %v10995_v61  ;;  %8665 = vrcp.f32 %v5299_v21  ;;  %v5305_v35 = vadd.f32 1.0, %v8650_v43 }
 0x225   : > { %v8652_v30 = vpop.eup %8651  ;;  %v11225_v46 = vadd.f32 %v5153_v39, %v11135_v38  ;;  %v5154_v54 = vadd.f32 %v8302_v50, %v11021_v63  ;;  %8667 = vrcp.f32 %v5300_v48  ;;  %v11238_v38 = vmul.f32 %v5062_v47, %v12538_v13 }
 0x226   : > { %v11230_v23 = vadd.f32 %v5151_v42, %v11113_v51  ;;  %v5152_v61 = vadd.f32 %v8303_v32, %v11021_v63  ;;  %v5306_v58 = vadd.f32 1.0, %v8652_v30  ;;  %8669 = vpow2.f32 %v7648_v7  ;;  %v8654_v33 = vpop.eup %8653 }
 0x227   : > { %12535 = vst [vmem:[#allocation8_spill] sm:$0xff] %v11225_v46  ;;  %v7651_v4 = vmul.f32 -1.442695, %v11225_v46  ;;  %v11235_v44 = vadd.f32 %v5154_v54, %v11138_v1  ;;  %8671 = vpow2.f32 %v7646_v17  ;;  %v8656_v49 = vpop.eup %8655  ;;  %v11250_v48 = vsel %vm5099_vm8, %v11186_v52, 0.0 }
 0x228   : > { %12536 = vst [vmem:[#allocation12_spill] sm:$0xff] %v11230_v23  ;;  %v7649_v45 = vmul.f32 -1.442695, %v11230_v23  ;;  %v11242_v5 = vadd.f32 %v5152_v61, %v11126_v25  ;;  %v8116_v51 = vpop.f32.mrb[16].mxu1  ;;  %v8268_v56 = vpop.f32.mrb[16].mxu0  ;;  %8673 = vrcp.f32 %v5305_v35  ;;  %v11253_v25 = vsel %vm5099_vm8, %v5091_v19, 0.0 }
 0x229   : > { %12537 = vst [vmem:[#allocation13_spill] sm:$0xff] %v11235_v44  ;;  %v7652_v21 = vmul.f32 -1.442695, %v11235_v44  ;;  %v8304_v1 = vadd.f32 %v8268_v56, %v8116_v51  ;;  %v2807_v31 = vpop.f32.mrb[17].mxu1  ;;  %v4908_v11 = vpop.f32.mrb[17].mxu0  ;;  %8675 = vpow2.f32 %v7651_v4  ;;  %v5303_v52 = vadd.f32 1.0, %v8654_v33 }
 0x22a   : > { %12539 = vst [vmem:[#allocation7_spill] sm:$0xff] %v11242_v5  ;;  %v8305_v27 = vadd.f32 %v4908_v11, %v2807_v31  ;;  %v8117_v16 = vpop.f32.mrb[18].mxu1  ;;  %v8269_v43 = vpop.f32.mrb[18].mxu0  ;;  %8677 = vrcp.f32 %v5306_v58  ;;  %v7650_v41 = vmul.f32 -1.442695, %v11242_v5  ;;  %v5304_v30 = vadd.f32 1.0, %v8656_v49 }
 0x22b   : > { %v11255_v60 = vpop.eup %8657  ;;  %v5157_v7 = vadd.f32 %v8304_v1, %v11021_v63  ;;  %v8306_v39 = vadd.f32 %v8269_v43, %v8117_v16  ;;  %v2810_v50 = vpop.f32.mrb[19].mxu1  ;;  %8679 = vpow2.f32 %v7649_v45  ;;  %v11275_v51 = vsel %vm5099_vm8, %v11209_v26, 0.0 }
 0x22c   : > { %v4911_v40 = vpop.f32.mrb[19].mxu0  ;;  %v8660_v17 = vpop.eup %8659  ;;  %v5155_v19 = vadd.f32 %v8305_v27, %v11021_v63  ;;  %8681 = vpow2.f32 %v7652_v21  ;;  %v5397_v13 = vmul.f32 2.0, %v11255_v60  ;;  %v11287_v21 = vsel %vm5099_vm8, %v5093_v8, 0.0 }
 0x22d   : > { %v8307_v42 = vadd.f32 %v4911_v40, %v2810_v50  ;;  %v8662_v32 = vpop.eup %8661  ;;  %v11261_v47 = vadd.f32 %v5157_v7, %v11155_v2  ;;  %v5158_v35 = vadd.f32 %v8306_v39, %v11021_v63  ;;  %v5309_v61 = vadd.f32 1.0, %v8660_v17  ;;  %v5063_v2 = vld [vmem:[%s12375_s4 + $0xe0] sm:$0xff] }
 0x22e   : > { %v11264_v54 = vpop.eup %8663  ;;  %v11267_v58 = vadd.f32 %v5155_v19, %v11141_v37  ;;  %8683 = vpow2.f32 %v7650_v41  ;;  %v5307_v1 = vadd.f32 1.0, %v8662_v32  ;;  %v7671_v16 = vadd.f32 -1.0, %v5397_v13 }
 0x22f   : > { %12540 = vst [vmem:[#allocation11_spill] sm:$0xff] %v11261_v47  ;;  %v5156_v4 = vadd.f32 %v8307_v42, %v11021_v63  ;;  %v11271_v45 = vpop.eup %8665  ;;  %v7655_v56 = vmul.f32 -1.442695, %v11261_v47  ;;  %v11282_v37 = vadd.f32 %v5158_v35, %v11158_v53  ;;  %8685 = vrcp.f32 %v5303_v52 }
 0x230   : > { %12541 = vst [vmem:[#allocation19_spill] sm:$0xff] %v11267_v58  ;;  %v11284_v33 = vpop.eup %8667  ;;  %v8120_v31 = vpop.f32.mrb[20].mxu1  ;;  %8687 = vrcp.f32 %v5304_v30  ;;  %v5398_v53 = vmul.f32 2.0, %v11264_v54  ;;  %v5095_v8 = vmul.f32 %v5063_v2, %v10935_v3  ;;  %v7653_v39 = vmul.f32 -1.442695, %v11267_v58  ;;  %5655 = vrot.lane.b32.xlu1 %v7671_v16, %s8980_s28  ;;  %v5064_v2 = vld [vmem:[%s12375_s4 + $0xe8] sm:$0xff] }
 0x231   : > { %12542 = vst [vmem:[#allocation20_spill] sm:$0xff] %v11282_v37  ;;  %v11290_v26 = vadd.f32 %v5156_v4, %v11152_v22  ;;  %v8272_v11 = vpop.f32.mrb[20].mxu0  ;;  %v8670_v49 = vpop.eup %8669  ;;  %v7656_v27 = vmul.f32 -1.442695, %v11282_v37  ;;  %8689 = vrcp.f32 %v5309_v61  ;;  %v5395_v42 = vmul.f32 2.0, %v11271_v45 }
 0x232   : > { %v4924_v43 = vpop.f32.mrb[21].mxu0  ;;  %v2823_v41 = vpop.f32.mrb[21].mxu1  ;;  %8691 = vpow2.f32 %v7655_v56  ;;  %v7672_v52 = vadd.f32 -1.0, %v5398_v53  ;;  %v8308_v19 = vadd.f32 %v8272_v11, %v8120_v31  ;;  %v11303_v35 = vsel %vm5099_vm8, %v11238_v38, 0.0 }
 0x233   : > { %12543 = vst [vmem:[#allocation21_spill] sm:$0xff] %v11290_v26  ;;  %v8672_v7 = vpop.eup %8671  ;;  %v7654_v22 = vmul.f32 -1.442695, %v11290_v26  ;;  %v8121_v50 = vpop.f32.mrb[22].mxu1  ;;  %8693 = vrcp.f32 %v5307_v1  ;;  %v5310_v61 = vadd.f32 1.0, %v8670_v49  ;;  %v8309_v4 = vadd.f32 %v4924_v43, %v2823_v41 }
 0x234   : > { %v8273_v40 = vpop.f32.mrb[22].mxu0  ;;  %v11297_v17 = vpop.eup %8673  ;;  %v5308_v56 = vadd.f32 1.0, %v8672_v7  ;;  %8695 = vpow2.f32 %v7656_v27  ;;  %5657 = vrot.lane.b32.xlu0 %v7672_v52, %s8980_s28  ;;  %v5161_v31 = vadd.f32 %v8308_v19, %v11021_v63  ;;  %v7669_v11 = vadd.f32 -1.0, %v5395_v42 }
 0x235   : > { %v4927_v32 = vpop.f32.mrb[23].mxu0  ;;  %v2826_v30 = vpop.f32.mrb[23].mxu1  ;;  %v11313_v38 = vsel %vm5099_vm8, %v5095_v8, 0.0  ;;  %8697 = vpow2.f32 %v7653_v39  ;;  %v5159_v1 = vadd.f32 %v8309_v4, %v11021_v63  ;;  %v8310_v49 = vadd.f32 %v8273_v40, %v8121_v50 }
 0x236   : > { %v8676_v3 = vpop.eup %8675  ;;  %8699 = vpow2.f32 %v7654_v22  ;;  %v11317_v41 = vadd.f32 %v5161_v31, %v11245_v57  ;;  %5651 = vrot.lane.b32.xlu1 %v7669_v11, %s8980_s28  ;;  %v5396_v27 = vmul.f32 2.0, %v11284_v33  ;;  %v5096_v7 = vmul.f32 %v5064_v2, %v10940_v28 }
 0x237   : > { %v11305_v13 = vpop.eup %8677  ;;  %v5313_v43 = vadd.f32 1.0, %v8676_v3  ;;  %8701 = vrcp.f32 %v5310_v61  ;;  %v11323_v8 = vadd.f32 %v5159_v1, %v11178_v29  ;;  %v5162_v39 = vadd.f32 %v8310_v49, %v11021_v63 }
 0x238   : > { %v8680_v16 = vpop.eup %8679  ;;  %12544 = vst [vmem:[#allocation22_spill] sm:$0xff] %v11317_v41  ;;  %v8124_v52 = vpop.f32.mrb[24].mxu1  ;;  %8703 = vrcp.f32 %v5308_v56  ;;  %v7659_v22 = vmul.f32 -1.442695, %v11317_v41  ;;  %v7670_v57 = vadd.f32 -1.0, %v5396_v27  ;;  %v8311_v19 = vadd.f32 %v4927_v32, %v2826_v30  ;;  %v5065_v32 = vld [vmem:[%s12375_s4 + $0xf0] sm:$0xff] }
 0x239   : > { %v8682_v53 = vpop.eup %8681  ;;  %12545 = vst [vmem:[#allocation23_spill] sm:$0xff] %v11323_v8  ;;  %v8276_v50 = vpop.f32.mrb[24].mxu0  ;;  %v5311_v31 = vadd.f32 1.0, %v8680_v16  ;;  %v7657_v28 = vmul.f32 -1.442695, %v11323_v8  ;;  %v11331_v29 = vadd.f32 %v5162_v39, %v11250_v48  ;;  %v5401_v61 = vmul.f32 2.0, %v11297_v17 }
 0x23a   : > { %v8684_v40 = vpop.eup %8683  ;;  %v4940_v42 = vpop.f32.mrb[25].mxu0  ;;  %8705 = vrcp.f32 %v5313_v43  ;;  %v5314_v30 = vadd.f32 1.0, %v8682_v53  ;;  %5653 = vrot.lane.b32.xlu0 %v7670_v57, %s8980_s28  ;;  %v5160_v56 = vadd.f32 %v8311_v19, %v11021_v63  ;;  %v5402_v16 = vmul.f32 2.0, %v11305_v13  ;;  %v5066_v39 = vld [vmem:[%s12375_s4 + $0xf8] sm:$0xff] }
 0x23b   : > { %v2839_v3 = vpop.f32.mrb[25].mxu1  ;;  %v11327_v4 = vpop.eup %8685  ;;  %12546 = vst [vmem:[#allocation24_spill] sm:$0xff] %v11331_v29  ;;  %v5312_v8 = vadd.f32 1.0, %v8684_v40  ;;  %8707 = vpow2.f32 %v7659_v22  ;;  %v7660_v41 = vmul.f32 -1.442695, %v11331_v29  ;;  %v7675_v43 = vadd.f32 -1.0, %v5401_v61 }
 0x23c   : > { %v8125_v2 = vpop.f32.mrb[26].mxu1  ;;  %v8277_v11 = vpop.f32.mrb[26].mxu0  ;;  %8709 = vpow2.f32 %v7657_v28  ;;  %v11349_v57 = vadd.f32 %v5160_v56, %v11205_v36  ;;  %v7676_v19 = vadd.f32 -1.0, %v5402_v16  ;;  %v8312_v26 = vadd.f32 %v8276_v50, %v8124_v52 }
 0x23d   : > { %v11334_v1 = vpop.eup %8687  ;;  %v4943_v48 = vpop.f32.mrb[27].mxu0  ;;  %v5097_v37 = vmul.f32 %v5065_v32, %v10943_v20  ;;  %8711 = vpow2.f32 %v7660_v41  ;;  %5663 = vrot.lane.b32.xlu1 %v7675_v43, %s8980_s28  ;;  %v5399_v40 = vmul.f32 2.0, %v11327_v4  ;;  %v8313_v22 = vadd.f32 %v4940_v42, %v2839_v3 }
 0x23e   : > { %v2842_v49 = vpop.f32.mrb[27].mxu1  ;;  %v11342_v27 = vpop.eup %8689  ;;  %12547 = vst [vmem:[#allocation25_spill] sm:$0xff] %v11349_v57  ;;  %v5098_v61 = vmul.f32 %v5066_v39, %v10953_v34  ;;  %8713 = vrcp.f32 %v5311_v31  ;;  %5665 = vrot.lane.b32.xlu0 %v7676_v19, %s8980_s28  ;;  %v5165_v36 = vadd.f32 %v8312_v26, %v11021_v63  ;;  %v7658_v50 = vmul.f32 -1.442695, %v11349_v57 }
 0x23f   : > { %v8692_v53 = vpop.eup %8691  ;;  %8715 = vrcp.f32 %v5314_v30  ;;  %v7673_v20 = vadd.f32 -1.0, %v5399_v40  ;;  %v5163_v41 = vadd.f32 %v8313_v22, %v11021_v63  ;;  %v11362_v42 = vsel %vm5099_vm8, %v5096_v7, 0.0 }
 0x240   : > { %v11351_v58 = vpop.eup %8693  ;;  %v5317_v28 = vadd.f32 1.0, %v8692_v53  ;;  %v8128_v32 = vpop.f32.mrb[28].mxu1  ;;  %8717 = vrcp.f32 %v5312_v8  ;;  %v11365_v34 = vadd.f32 %v5165_v36, %v11287_v21  ;;  %v8314_v3 = vadd.f32 %v8277_v11, %v8125_v2 }
 0x241   : > { %v8696_v47 = vpop.eup %8695  ;;  %v8280_v56 = vpop.f32.mrb[28].mxu0  ;;  %5659 = vrot.lane.b32.xlu1 %v7673_v20, %s8980_s28  ;;  %v11371_v43 = vadd.f32 %v5163_v41, %v11253_v25  ;;  %v5400_v53 = vmul.f32 2.0, %v11334_v1  ;;  %v8315_v19 = vadd.f32 %v4943_v48, %v2842_v49 }
 0x242   : > { %v8698_v52 = vpop.eup %8697  ;;  %12548 = vst [vmem:[#allocation26_spill] sm:$0xff] %v11365_v34  ;;  %v4956_v31 = vpop.f32.mrb[29].mxu0  ;;  %v5318_v30 = vadd.f32 1.0, %v8696_v47  ;;  %8719 = vrcp.f32 %v5317_v28  ;;  %v7663_v2 = vmul.f32 -1.442695, %v11365_v34  ;;  %v5166_v11 = vadd.f32 %v8314_v3, %v11021_v63 }
 0x243   : > { %v8700_v16 = vpop.eup %8699  ;;  %v2855_v26 = vpop.f32.mrb[29].mxu1  ;;  %12549 = vst [vmem:[#allocation27_spill] sm:$0xff] %v11371_v43  ;;  %v5315_v21 = vadd.f32 1.0, %v8698_v52  ;;  %8721 = vpow2.f32 %v7658_v50  ;;  %v7674_v20 = vadd.f32 -1.0, %v5400_v53  ;;  %v5164_v25 = vadd.f32 %v8315_v19, %v11021_v63 }
 0x244   : > { %v11367_v39 = vpop.eup %8701  ;;  %v8129_v7 = vpop.f32.mrb[30].mxu1  ;;  %v5316_v36 = vadd.f32 1.0, %v8700_v16  ;;  %8723 = vpow2.f32 %v7663_v2  ;;  %v7661_v48 = vmul.f32 -1.442695, %v11371_v43  ;;  %v11383_v49 = vadd.f32 %v5166_v11, %v11303_v35 }
 0x245   : > { %v8281_v40 = vpop.f32.mrb[30].mxu0  ;;  %v11374_v8 = vpop.eup %8703  ;;  %v5405_v28 = vmul.f32 2.0, %v11342_v27  ;;  %v5130_v3 = vsel %vm5099_vm8, %v5097_v37, 0.0  ;;  %8725 = vrcp.f32 %v5318_v30  ;;  %5661 = vrot.lane.b32.xlu0 %v7674_v20, %s8980_s28  ;;  %v11389_v50 = vadd.f32 %v5164_v25, %v11275_v51 }
 0x246   : > { %v4959_v22 = vpop.f32.mrb[31].mxu0  ;;  %v2858_v47 = vpop.f32.mrb[31].mxu1  ;;  %12550 = vst [vmem:[#allocation28_spill] sm:$0xff] %v11383_v49  ;;  %v5406_v16 = vmul.f32 2.0, %v11367_v39  ;;  %v5131_v19 = vsel %vm5099_vm8, %v5098_v61, 0.0  ;;  %8727 = vrcp.f32 %v5315_v21  ;;  %v8316_v20 = vadd.f32 %v8280_v56, %v8128_v32 }
 0x247   : > { %v11379_v41 = vpop.eup %8705  ;;  %12551 = vst [vmem:[#allocation29_spill] sm:$0xff] %v11389_v50  ;;  %v11393_v2 = vpop.permute.xlu1 %5495  ;;  %v7664_v35 = vmul.f32 -1.442695, %v11383_v49  ;;  %v7679_v11 = vadd.f32 -1.0, %v5405_v28  ;;  %8729 = vrcp.f32 %v5316_v36  ;;  %v7662_v37 = vmul.f32 -1.442695, %v11389_v50 }
 0x248   : > { %v8708_v52 = vpop.eup %8707  ;;  %v7680_v30 = vadd.f32 -1.0, %v5406_v16  ;;  %v11399_v51 = vpop.permute.xlu0 %5491  ;;  %8731 = vpow2.f32 %v7661_v48  ;;  %v5403_v61 = vmul.f32 2.0, %v11351_v58  ;;  %v8317_v21 = vadd.f32 %v4956_v31, %v2855_v26 }
 0x249   : > { %v8710_v53 = vpop.eup %8709  ;;  %v5321_v25 = vadd.f32 1.0, %v8708_v52  ;;  %5671 = vrot.lane.b32.xlu1 %v7679_v11, %s8980_s28  ;;  %8733 = vpow2.f32 %v7664_v35  ;;  %v5169_v36 = vadd.f32 %v8316_v20, %v11021_v63  ;;  %v8318_v32 = vadd.f32 %v8281_v40, %v8129_v7 }
 0x24a   : > { %v8712_v43 = vpop.eup %8711  ;;  %5673 = vrot.lane.b32.xlu0 %v7680_v30, %s8980_s28  ;;  %v5319_v16 = vadd.f32 1.0, %v8710_v53  ;;  %v7677_v50 = vadd.f32 -1.0, %v5403_v61  ;;  %v5167_v48 = vadd.f32 %v8317_v21, %v11021_v63  ;;  %v5404_v52 = vmul.f32 2.0, %v11374_v8 }
 0x24b   : > { %v11397_v34 = vpop.eup %8713  ;;  %v5322_v28 = vadd.f32 1.0, %v8712_v43  ;;  %8735 = vpow2.f32 %v7662_v37  ;;  %v11411_v11 = vadd.f32 %v5169_v36, %v5130_v3  ;;  %v5170_v31 = vadd.f32 %v8318_v32, %v11021_v63  ;;  %v11416_v35 = vpop.permute.xlu1 %5497 }
 0x24c   : > { %v11403_v57 = vpop.eup %8715  ;;  %v8319_v26 = vadd.f32 %v4959_v22, %v2858_v47  ;;  %8737 = vrcp.f32 %v5321_v25  ;;  %v11420_v7 = vadd.f32 %v5167_v48, %v11313_v38  ;;  %v7678_v40 = vadd.f32 -1.0, %v5404_v52  ;;  %v11427_v20 = vpop.permute.xlu0 %5493 }
 0x24d   : > { %v11407_v56 = vpop.eup %8717  ;;  %12552 = vst [vmem:[#allocation30_spill] sm:$0xff] %v11411_v11  ;;  %5667 = vrot.lane.b32.xlu1 %v7677_v50, %s8980_s28  ;;  %v5409_v53 = vmul.f32 2.0, %v11379_v41  ;;  %8739 = vrcp.f32 %v5322_v28  ;;  %v7667_v3 = vmul.f32 -1.442695, %v11411_v11  ;;  %v11424_v37 = vadd.f32 %v5170_v31, %v5131_v19 }
 0x24e   : > { %v11414_v43 = vpop.eup %8719  ;;  %12553 = vst [vmem:[#allocation31_spill] sm:$0xff] %v11420_v7  ;;  %v5168_v22 = vadd.f32 %v8319_v26, %v11021_v63  ;;  %5669 = vrot.lane.b32.xlu0 %v7678_v40, %s8980_s28  ;;  %v5410_v38 = vmul.f32 2.0, %v11403_v57  ;;  %v7665_v28 = vmul.f32 -1.442695, %v11420_v7  ;;  %v5407_v31 = vmul.f32 2.0, %v11397_v34 }
 0x24f   : > { %v8722_v30 = vpop.eup %8721  ;;  %12554 = vst [vmem:[#allocation32_spill] sm:$0xff] %v11424_v37  ;;  %v7683_v50 = vadd.f32 -1.0, %v5409_v53  ;;  %8741 = vpow2.f32 %v7667_v3  ;;  %v7668_v63 = vmul.f32 -1.442695, %v11424_v37  ;;  %v11445_v40 = vpop.permute.xlu1 %5501 }
 0x250   : > { %v8724_v47 = vpop.eup %8723  ;;  %v5320_v25 = vadd.f32 1.0, %v8722_v30  ;;  %v11435_v19 = vadd.f32 %v5168_v22, %v11362_v42  ;;  %8743 = vrcp.f32 %v5319_v16  ;;  %v7684_v32 = vadd.f32 -1.0, %v5410_v38  ;;  %v11451_v22 = vpop.permute.xlu0 %5499 }
 0x251   : > { %v11431_v61 = vpop.eup %8725  ;;  %v5325_v21 = vadd.f32 1.0, %v8724_v47  ;;  %5679 = vrot.lane.b32.xlu1 %v7683_v50, %s8980_s28  ;;  %v5408_v42 = vmul.f32 2.0, %v11407_v56  ;;  %v5413_v16 = vmul.f32 2.0, %v11414_v43  ;;  %v7681_v3 = vadd.f32 -1.0, %v5407_v31 }
 0x252   : > { %12555 = vst [vmem:[#allocation33_spill] sm:$0xff] %v11435_v19  ;;  %v11437_v36 = vpop.eup %8727  ;;  %8745 = vrcp.f32 %v5320_v25  ;;  %v7666_v52 = vmul.f32 -1.442695, %v11435_v19  ;;  %5681 = vrot.lane.b32.xlu0 %v7684_v32, %s8980_s28  ;;  %v5414_v53 = vmul.f32 2.0, %v11431_v61 }
 0x253   : > { %v11441_v48 = vpop.eup %8729  ;;  %8747 = vrcp.f32 %v5325_v21  ;;  %v7682_v25 = vadd.f32 -1.0, %v5408_v42  ;;  %v7687_v38 = vadd.f32 -1.0, %v5413_v16  ;;  %v5411_v31 = vmul.f32 2.0, %v11437_v36 }
 0x254   : > { %v8732_v26 = vpop.eup %8731  ;;  %8749 = vpow2.f32 %v7665_v28  ;;  %v7688_v37 = vadd.f32 -1.0, %v5414_v53 }
 0x255   : > { %v8734_v30 = vpop.eup %8733  ;;  %8751 = vpow2.f32 %v7668_v63  ;;  %5675 = vrot.lane.b32.xlu1 %v7681_v3, %s8980_s28  ;;  %v5323_v32 = vadd.f32 1.0, %v8732_v26  ;;  %v5412_v63 = vmul.f32 2.0, %v11441_v48  ;;  %v11467_v26 = vpop.permute.xlu0 %5503 }
 0x256   : > { %v5326_v47 = vadd.f32 1.0, %v8734_v30  ;;  %v8736_v50 = vpop.eup %8735  ;;  %8753 = vpow2.f32 %v7666_v52  ;;  %5677 = vrot.lane.b32.xlu0 %v7682_v25, %s8980_s28  ;;  %v11460_v30 = vpop.permute.xlu1 %5505  ;;  %v7685_v25 = vadd.f32 -1.0, %v5411_v31 }
 0x257   : > { %v11454_v21 = vpop.eup %8737  ;;  %v5324_v28 = vadd.f32 1.0, %v8736_v50 }
 0x258   : > { %8755 = vrcp.f32 %v5326_v47  ;;  %v11457_v11 = vpop.eup %8739  ;;  %v5417_v42 = vmul.f32 2.0, %v11454_v21 }
 0x259   : > { %v8742_v52 = vpop.eup %8741  ;;  %5687 = vrot.lane.b32.xlu1 %v7687_v38, %s8980_s28  ;;  %8757 = vrcp.f32 %v5323_v32  ;;  %v5418_v3 = vmul.f32 2.0, %v11457_v11  ;;  %v7686_v38 = vadd.f32 -1.0, %v5412_v63  ;;  %v11482_v23 = vpop.permute.xlu0 %5507 }
 0x25a   : > { %v11465_v16 = vpop.eup %8743  ;;  %v5329_v53 = vadd.f32 1.0, %v8742_v52  ;;  %5689 = vrot.lane.b32.xlu0 %v7688_v37, %s8980_s28  ;;  %8759 = vrcp.f32 %v5324_v28  ;;  %v7691_v7 = vadd.f32 -1.0, %v5417_v42  ;;  %v11476_v29 = vpop.permute.xlu1 %5509 }
 0x25b   : > { %v7692_v37 = vadd.f32 -1.0, %v5418_v3  ;;  %v5415_v28 = vmul.f32 2.0, %v11465_v16 }
 0x25c   : > { %v11471_v47 = vpop.eup %8745  ;;  %8761 = vrcp.f32 %v5329_v53 }
 0x25d   : > { %v11473_v50 = vpop.eup %8747  ;;  %5683 = vrot.lane.b32.xlu1 %v7685_v25, %s8980_s28  ;;  %v5416_v53 = vmul.f32 2.0, %v11471_v47  ;;  %v11498_v44 = vpop.permute.xlu0 %5511 }
 0x25e   : > { %v8750_v19 = vpop.eup %8749  ;;  %5685 = vrot.lane.b32.xlu0 %v7686_v38, %s8980_s28  ;;  %v5421_v42 = vmul.f32 2.0, %v11473_v50  ;;  %v11491_v25 = vpop.permute.xlu1 %5513 }
 0x25f   : > { %v8752_v49 = vpop.eup %8751  ;;  %v5327_v32 = vadd.f32 1.0, %v8750_v19  ;;  %v7690_v38 = vadd.f32 -1.0, %v5416_v53 }
 0x260   : > { %v8754_v52 = vpop.eup %8753  ;;  %v5330_v5 = vadd.f32 1.0, %v8752_v49  ;;  %v7689_v49 = vadd.f32 -1.0, %v5415_v28 }
 0x261   : > { %v5328_v63 = vadd.f32 1.0, %v8754_v52  ;;  %5695 = vrot.lane.b32.xlu1 %v7691_v7, %s8980_s28  ;;  %v11512_v6 = vpop.permute.xlu0 %5515 }
 0x262   : > { %v11480_v31 = vpop.eup %8755  ;;  %8763 = vrcp.f32 %v5330_v5  ;;  %5697 = vrot.lane.b32.xlu0 %v7692_v37, %s8980_s28  ;;  %v7695_v5 = vadd.f32 -1.0, %v5421_v42  ;;  %v11505_v53 = vpop.permute.xlu1 %5517 }
 0x263   : > { %8765 = vrcp.f32 %v5327_v32  ;;  %v5422_v19 = vmul.f32 2.0, %v11480_v31  ;;  %v11489_v3 = vpop.eup %8757 }
 0x264   : > { %8767 = vrcp.f32 %v5328_v63  ;;  %v11493_v52 = vpop.eup %8759  ;;  %v5419_v37 = vmul.f32 2.0, %v11489_v3 }
 0x265   : > { %5691 = vrot.lane.b32.xlu1 %v7689_v49, %s8980_s28  ;;  %v7696_v32 = vadd.f32 -1.0, %v5422_v19  ;;  %v5420_v28 = vmul.f32 2.0, %v11493_v52  ;;  %v11524_v62 = vpop.permute.xlu0 %5519 }
 0x266   : > { %v11496_v7 = vpop.eup %8761  ;;  %5693 = vrot.lane.b32.xlu0 %v7690_v38, %s8980_s28  ;;  %v7693_v49 = vadd.f32 -1.0, %v5419_v37  ;;  %v11520_v59 = vpop.permute.xlu1 %5521 }
 0x267   : > { %v5425_v63 = vmul.f32 2.0, %v11496_v7  ;;  %v7694_v19 = vadd.f32 -1.0, %v5420_v28 }
 0x269   : > { %5703 = vrot.lane.b32.xlu1 %v7695_v5, %s8980_s28  ;;  %v7699_v5 = vadd.f32 -1.0, %v5425_v63 }
 0x26a   : > { %5705 = vrot.lane.b32.xlu0 %v7696_v32, %s8980_s28  ;;  %v11528_v63 = vpop.permute.xlu1 %5525 }
 0x26c   : > { %v11508_v42 = vpop.eup %8763 }
 0x26d   : > { %v11510_v46 = vpop.eup %8765  ;;  %v5426_v38 = vmul.f32 2.0, %v11508_v42  ;;  %5699 = vrot.lane.b32.xlu1 %v7693_v49, %s8980_s28  ;;  %v11531_v49 = vpop.permute.xlu0 %5523 }
 0x26e   : > { %v11515_v24 = vpop.eup %8767  ;;  %5701 = vrot.lane.b32.xlu0 %v7694_v19, %s8980_s28  ;;  %v5423_v32 = vmul.f32 2.0, %v11510_v46  ;;  %v11533_v19 = vpop.permute.xlu1 %5529 }
 0x26f   : > { %v7700_v14 = vadd.f32 -1.0, %v5426_v38  ;;  %v5424_v37 = vmul.f32 2.0, %v11515_v24 }
 0x270   : > { %v7697_v28 = vadd.f32 -1.0, %v5423_v32 }
 0x271   : > { %5711 = vrot.lane.b32.xlu1 %v7699_v5, %s8980_s28  ;;  %v7698_v12 = vadd.f32 -1.0, %v5424_v37  ;;  %v11535_v38 = vpop.permute.xlu0 %5527 }
 0x272   : > { %5713 = vrot.lane.b32.xlu0 %v7700_v14, %s8980_s28  ;;  %v11537_v18 = vpop.permute.xlu1 %5533 }
 0x273   : > { %12556 = vst [vmem:[#allocation34_spill] sm:$0xff] %v11537_v18 }
 0x275   : > { %5707 = vrot.lane.b32.xlu1 %v7697_v28, %s8980_s28  ;;  %v11539_v5 = vpop.permute.xlu0 %5531 }
 0x276   : > { %5709 = vrot.lane.b32.xlu0 %v7698_v12, %s8980_s28  ;;  %12557 = vst [vmem:[#allocation35_spill] sm:$0xff] %v11539_v5  ;;  %v11541_v55 = vpop.permute.xlu1 %5537 }
 0x277   : > { %12558 = vst [vmem:[#allocation36_spill] sm:$0xff] %v11541_v55 }
 0x279   : > { %v11543_v14 = vpop.permute.xlu0 %5535 }
 0x27a   : > { %v11545_v32 = vpop.permute.xlu1 %5541 }
 0x27b   : > { %12559 = vst [vmem:[#allocation37_spill] sm:$0xff] %v11545_v32 }
 0x27d   : > { %v11547_v37 = vpop.permute.xlu0 %5539 }
 0x27e   : > { %12560 = vst [vmem:[#allocation38_spill] sm:$0xff] %v11547_v37  ;;  %v11549_v28 = vpop.permute.xlu1 %5545 }
 0x27f   : > { %12561 = vst [vmem:[#allocation39_spill] sm:$0xff] %v11549_v28 }
 0x281   : > { %v11551_v12 = vpop.permute.xlu0 %5543 }
 0x282   : > { %v11553_v0 = vpop.permute.xlu1 %5549 }
 0x283   : > { %12562 = vst [vmem:[#allocation40_spill] sm:$0xff] %v11553_v0 }
 0x285   : > { %v11555_v10 = vpop.permute.xlu0 %5547 }
 0x286   : > { %12563 = vst [vmem:[#allocation41_spill] sm:$0xff] %v11555_v10  ;;  %v11557_v9 = vpop.permute.xlu1 %5553 }
 0x287   : > { %12564 = vst [vmem:[#allocation42_spill] sm:$0xff] %v11557_v9 }
 0x289   : > { %v11559_v15 = vpop.permute.xlu0 %5551 }
 0x28a   : > { %12565 = vst [vmem:[#allocation43_spill] sm:$0xff] %v11559_v15 }
 0x2a2   : > { %v5656_v18 = vpop.permute.xlu1 %5655 }
 0x2a3   : > { %v5749_v5 = vmul.f32 %v11255_v60, %v5656_v18 }
 0x2a5   : > { %5815 = vrot.lane.b32.xlu0 %v5749_v5, %s8979_s17 }
 0x2a6   : > { %v5658_v55 = vpop.permute.xlu0 %5657 }
 0x2a7   : > { %v5750_v32 = vmul.f32 %v11264_v54, %v5658_v55 }
 0x2a8   : > { %v5652_v37 = vpop.permute.xlu1 %5651 }
 0x2a9   : > { %v5747_v28 = vmul.f32 %v11271_v45, %v5652_v37  ;;  %5817 = vrot.lane.b32.xlu1 %v5750_v32, %s8979_s17 }
 0x2ab   : > { %5811 = vrot.lane.b32.xlu0 %v5747_v28, %s8979_s17 }
 0x2ac   : > { %v5654_v0 = vpop.permute.xlu0 %5653 }
 0x2ad   : > { %v5748_v10 = vmul.f32 %v11284_v33, %v5654_v0 }
 0x2af   : > { %v5664_v9 = vpop.permute.xlu1 %5663  ;;  %5813 = vrot.lane.b32.xlu1 %v5748_v10, %s8979_s17 }
 0x2b0   : > { %v5753_v18 = vmul.f32 %v11297_v17, %v5664_v9  ;;  %v5666_v15 = vpop.permute.xlu0 %5665 }
 0x2b1   : > { %v5754_v55 = vmul.f32 %v11305_v13, %v5666_v15 }
 0x2b2   : > { %5823 = vrot.lane.b32.xlu0 %v5753_v18, %s8979_s17 }
 0x2b3   : > { %v5660_v5 = vpop.permute.xlu1 %5659  ;;  %5825 = vrot.lane.b32.xlu1 %v5754_v55, %s8979_s17 }
 0x2b4   : > { %v5751_v32 = vmul.f32 %v11327_v4, %v5660_v5 }
 0x2b6   : > { %5819 = vrot.lane.b32.xlu0 %v5751_v32, %s8979_s17 }
 0x2b7   : > { %v5662_v37 = vpop.permute.xlu0 %5661 }
 0x2b8   : > { %v5752_v0 = vmul.f32 %v11334_v1, %v5662_v37 }
 0x2ba   : > { %5821 = vrot.lane.b32.xlu1 %v5752_v0, %s8979_s17 }
 0x2bb   : > { %v5672_v28 = vpop.permute.xlu1 %5671 }
 0x2bc   : > { %v5757_v10 = vmul.f32 %v11342_v27, %v5672_v28  ;;  %v5674_v9 = vpop.permute.xlu0 %5673 }
 0x2bd   : > { %v5758_v15 = vmul.f32 %v11367_v39, %v5674_v9 }
 0x2be   : > { %5831 = vrot.lane.b32.xlu0 %v5757_v10, %s8979_s17 }
 0x2bf   : > { %v5668_v18 = vpop.permute.xlu1 %5667  ;;  %5833 = vrot.lane.b32.xlu1 %v5758_v15, %s8979_s17 }
 0x2c0   : > { %v5755_v55 = vmul.f32 %v11351_v58, %v5668_v18  ;;  %v5670_v5 = vpop.permute.xlu0 %5669 }
 0x2c1   : > { %v5756_v32 = vmul.f32 %v11374_v8, %v5670_v5 }
 0x2c2   : > { %5827 = vrot.lane.b32.xlu0 %v5755_v55, %s8979_s17 }
 0x2c3   : > { %v5680_v37 = vpop.permute.xlu1 %5679  ;;  %5829 = vrot.lane.b32.xlu1 %v5756_v32, %s8979_s17 }
 0x2c4   : > { %v5761_v0 = vmul.f32 %v11379_v41, %v5680_v37  ;;  %v5682_v28 = vpop.permute.xlu0 %5681 }
 0x2c5   : > { %v5762_v9 = vmul.f32 %v11403_v57, %v5682_v28 }
 0x2c6   : > { %5839 = vrot.lane.b32.xlu0 %v5761_v0, %s8979_s17 }
 0x2c7   : > { %v5676_v10 = vpop.permute.xlu1 %5675  ;;  %5841 = vrot.lane.b32.xlu1 %v5762_v9, %s8979_s17 }
 0x2c8   : > { %v5759_v15 = vmul.f32 %v11397_v34, %v5676_v10  ;;  %v5678_v18 = vpop.permute.xlu0 %5677 }
 0x2c9   : > { %v5760_v5 = vmul.f32 %v11407_v56, %v5678_v18 }
 0x2ca   : > { %5835 = vrot.lane.b32.xlu0 %v5759_v15, %s8979_s17 }
 0x2cb   : > { %v5688_v55 = vpop.permute.xlu1 %5687  ;;  %5837 = vrot.lane.b32.xlu1 %v5760_v5, %s8979_s17 }
 0x2cc   : > { %v5765_v32 = vmul.f32 %v11414_v43, %v5688_v55  ;;  %v5690_v37 = vpop.permute.xlu0 %5689 }
 0x2cd   : > { %v5766_v28 = vmul.f32 %v11431_v61, %v5690_v37 }
 0x2ce   : > { %5847 = vrot.lane.b32.xlu0 %v5765_v32, %s8979_s17 }
 0x2cf   : > { %v5684_v0 = vpop.permute.xlu1 %5683  ;;  %5849 = vrot.lane.b32.xlu1 %v5766_v28, %s8979_s17 }
 0x2d0   : > { %v5763_v9 = vmul.f32 %v11437_v36, %v5684_v0  ;;  %v5686_v10 = vpop.permute.xlu0 %5685 }
 0x2d1   : > { %v5764_v18 = vmul.f32 %v11441_v48, %v5686_v10 }
 0x2d2   : > { %5843 = vrot.lane.b32.xlu0 %v5763_v9, %s8979_s17 }
 0x2d3   : > { %v5696_v15 = vpop.permute.xlu1 %5695  ;;  %5845 = vrot.lane.b32.xlu1 %v5764_v18, %s8979_s17 }
 0x2d4   : > { %v5769_v5 = vmul.f32 %v11454_v21, %v5696_v15  ;;  %v5698_v55 = vpop.permute.xlu0 %5697 }
 0x2d5   : > { %v5770_v37 = vmul.f32 %v11457_v11, %v5698_v55 }
 0x2d6   : > { %5855 = vrot.lane.b32.xlu0 %v5769_v5, %s8979_s17 }
 0x2d7   : > { %v5692_v32 = vpop.permute.xlu1 %5691  ;;  %5857 = vrot.lane.b32.xlu1 %v5770_v37, %s8979_s17 }
 0x2d8   : > { %v5767_v28 = vmul.f32 %v11465_v16, %v5692_v32  ;;  %v5694_v0 = vpop.permute.xlu0 %5693 }
 0x2d9   : > { %v5768_v10 = vmul.f32 %v11471_v47, %v5694_v0 }
 0x2da   : > { %5851 = vrot.lane.b32.xlu0 %v5767_v28, %s8979_s17 }
 0x2db   : > { %v5704_v9 = vpop.permute.xlu1 %5703  ;;  %5853 = vrot.lane.b32.xlu1 %v5768_v10, %s8979_s17 }
 0x2dc   : > { %v5773_v18 = vmul.f32 %v11473_v50, %v5704_v9  ;;  %v5706_v15 = vpop.permute.xlu0 %5705 }
 0x2dd   : > { %v5774_v55 = vmul.f32 %v11480_v31, %v5706_v15 }
 0x2de   : > { %5863 = vrot.lane.b32.xlu0 %v5773_v18, %s8979_s17 }
 0x2df   : > { %v5700_v5 = vpop.permute.xlu1 %5699  ;;  %5865 = vrot.lane.b32.xlu1 %v5774_v55, %s8979_s17 }
 0x2e0   : > { %v5771_v37 = vmul.f32 %v11489_v3, %v5700_v5  ;;  %v5702_v32 = vpop.permute.xlu0 %5701 }
 0x2e1   : > { %v5772_v0 = vmul.f32 %v11493_v52, %v5702_v32 }
 0x2e2   : > { %5859 = vrot.lane.b32.xlu0 %v5771_v37, %s8979_s17  ;;  %v5589_v37 = vmul.f32 %v11255_v60, %v11393_v2  ;;  %v5588_v60 = vmul.f32 %v11284_v33, %v11427_v20  ;;  %v5593_v2 = vmul.f32 %v11297_v17, %v11467_v26  ;;  %v5591_v20 = vmul.f32 %v11327_v4, %v11451_v22 }
 0x2e3   : > { %v5712_v28 = vpop.permute.xlu1 %5711  ;;  %5861 = vrot.lane.b32.xlu1 %v5772_v0, %s8979_s17  ;;  %v5597_v4 = vmul.f32 %v11342_v27, %v11498_v44  ;;  %v5598_v22 = vmul.f32 %v11367_v39, %v11491_v25  ;;  %v5596_v44 = vmul.f32 %v11374_v8, %v11476_v29  ;;  %v5601_v25 = vmul.f32 %v11379_v41, %v11524_v62 }
 0x2e4   : > { %v5777_v10 = vmul.f32 %v11496_v7, %v5712_v28  ;;  %v5714_v9 = vpop.permute.xlu0 %5713  ;;  %v5590_v28 = vmul.f32 %v11264_v54, %v11416_v35  ;;  %v5599_v62 = vmul.f32 %v11397_v34, %v11512_v6  ;;  %v5600_v41 = vmul.f32 %v11407_v56, %v11505_v53 }
 0x2e5   : > { %v5778_v15 = vmul.f32 %v11508_v42, %v5714_v9  ;;  %v5606_v6 = vmul.f32 %v11431_v61, %v11533_v19 }
 0x2e6   : > { %5871 = vrot.lane.b32.xlu0 %v5777_v10, %s8979_s17 }
 0x2e7   : > { %v5708_v18 = vpop.permute.xlu1 %5707  ;;  %5873 = vrot.lane.b32.xlu1 %v5778_v15, %s8979_s17  ;;  %v5587_v15 = vmul.f32 %v11271_v45, %v11399_v51  ;;  %v5594_v51 = vmul.f32 %v11305_v13, %v11460_v30  ;;  %v5592_v13 = vmul.f32 %v11334_v1, %v11445_v40  ;;  %v5595_v40 = vmul.f32 %v11351_v58, %v11482_v23 }
 0x2e8   : > { %v5775_v55 = vmul.f32 %v11510_v46, %v5708_v18  ;;  %v5710_v5 = vpop.permute.xlu0 %5709  ;;  %v5602_v58 = vmul.f32 %v11403_v57, %v11520_v59 }
 0x2e9   : > { %v5776_v32 = vmul.f32 %v11515_v24, %v5710_v5 }
 0x2ea   : > { %5867 = vrot.lane.b32.xlu0 %v5775_v55, %s8979_s17 }
 0x2eb   : > { %5869 = vrot.lane.b32.xlu1 %v5776_v32, %s8979_s17 }
 0x317   : > { %v5816_v0 = vpop.permute.xlu0 %5815 }
 0x318   : > { %v11629_v10 = vadd.f32 %v5816_v0, %v5589_v37 }
 0x31a   : > { %6007 = vrot.lane.b32.xlu0 %v11629_v10, %s8981_s11 }
 0x31b   : > { %v5818_v9 = vpop.permute.xlu1 %5817 }
 0x31c   : > { %v11633_v18 = vadd.f32 %v5818_v9, %v5590_v28 }
 0x31d   : > { %v5812_v55 = vpop.permute.xlu0 %5811 }
 0x31e   : > { %v11637_v5 = vadd.f32 %v5812_v55, %v5587_v15  ;;  %6009 = vrot.lane.b32.xlu1 %v11633_v18, %s8981_s11 }
 0x320   : > { %6003 = vrot.lane.b32.xlu0 %v11637_v5, %s8981_s11 }
 0x321   : > { %v5814_v54 = vpop.permute.xlu1 %5813 }
 0x322   : > { %v11645_v45 = vadd.f32 %v5814_v54, %v5588_v60 }
 0x324   : > { %v5824_v35 = vpop.permute.xlu0 %5823  ;;  %6005 = vrot.lane.b32.xlu1 %v11645_v45, %s8981_s11 }
 0x325   : > { %v11653_v32 = vadd.f32 %v5824_v35, %v5593_v2  ;;  %v5826_v37 = vpop.permute.xlu1 %5825  ;;  %v5605_v35 = vmul.f32 %v11414_v43, %v11535_v38  ;;  %v5604_v43 = vmul.f32 %v11441_v48, %v11528_v63 }
 0x326   : > { %v11655_v33 = vadd.f32 %v5826_v37, %v5594_v51 }
 0x327   : > { %6015 = vrot.lane.b32.xlu0 %v11653_v32, %s8981_s11 }
 0x328   : > { %v5820_v0 = vpop.permute.xlu0 %5819  ;;  %6017 = vrot.lane.b32.xlu1 %v11655_v33, %s8981_s11 }
 0x329   : > { %v11663_v17 = vadd.f32 %v5820_v0, %v5591_v20  ;;  %v5603_v20 = vmul.f32 %v11437_v36, %v11531_v49  ;;  %v12566_v36 = vld [vmem:[#allocation36_spill] sm:$0xff] }
 0x32a   : > { %v5610_v49 = vmul.f32 %v11457_v11, %v12566_v36 }
 0x32b   : > { %6011 = vrot.lane.b32.xlu0 %v11663_v17, %s8981_s11 }
 0x32c   : > { %v5822_v30 = vpop.permute.xlu1 %5821 }
 0x32d   : > { %v11669_v26 = vadd.f32 %v5822_v30, %v5592_v13  ;;  %v5609_v13 = vmul.f32 %v11454_v21, %v11543_v14  ;;  %v12568_v21 = vld [vmem:[#allocation34_spill] sm:$0xff] }
 0x32e   : > { %v5608_v14 = vmul.f32 %v11471_v47, %v12568_v21  ;;  %v5939_v21 = vld [vmem:[%s12376_s5] sm:$0xff] }
 0x32f   : > { %6013 = vrot.lane.b32.xlu1 %v11669_v26, %s8981_s11 }
 0x330   : > { %v5832_v28 = vpop.permute.xlu0 %5831 }
 0x331   : > { %v11677_v9 = vadd.f32 %v5832_v28, %v5597_v4  ;;  %v5834_v15 = vpop.permute.xlu1 %5833 }
 0x332   : > { %v11679_v1 = vadd.f32 %v5834_v15, %v5598_v22  ;;  %v12567_v22 = vld [vmem:[#allocation35_spill] sm:$0xff] }
 0x333   : > { %6023 = vrot.lane.b32.xlu0 %v11677_v9, %s8981_s11  ;;  %v5607_v28 = vmul.f32 %v11465_v16, %v12567_v22  ;;  %v12569_v16 = vld [vmem:[#allocation39_spill] sm:$0xff] }
 0x334   : > { %v5828_v55 = vpop.permute.xlu0 %5827  ;;  %6025 = vrot.lane.b32.xlu1 %v11679_v1, %s8981_s11 }
 0x335   : > { %v11689_v27 = vadd.f32 %v5828_v55, %v5595_v40  ;;  %v5830_v39 = vpop.permute.xlu1 %5829 }
 0x336   : > { %v11693_v60 = vadd.f32 %v5830_v39, %v5596_v44  ;;  %v5613_v44 = vmul.f32 %v11473_v50, %v11551_v12  ;;  %v5614_v39 = vmul.f32 %v11480_v31, %v12569_v16  ;;  %v12572_v50 = vld [vmem:[#allocation37_spill] sm:$0xff] }
 0x337   : > { %6019 = vrot.lane.b32.xlu0 %v11689_v27, %s8981_s11  ;;  %v5612_v12 = vmul.f32 %v11493_v52, %v12572_v50 }
 0x338   : > { %v5840_v23 = vpop.permute.xlu0 %5839  ;;  %6021 = vrot.lane.b32.xlu1 %v11693_v60, %s8981_s11 }
 0x339   : > { %v11699_v54 = vadd.f32 %v5840_v23, %v5601_v25  ;;  %v5842_v29 = vpop.permute.xlu1 %5841 }
 0x33a   : > { %v11703_v8 = vadd.f32 %v5842_v29, %v5602_v58  ;;  %v12571_v29 = vld [vmem:[#allocation38_spill] sm:$0xff] }
 0x33b   : > { %6031 = vrot.lane.b32.xlu0 %v11699_v54, %s8981_s11 }
 0x33c   : > { %v5836_v2 = vpop.permute.xlu0 %5835  ;;  %6033 = vrot.lane.b32.xlu1 %v11703_v8, %s8981_s11 }
 0x33d   : > { %v11713_v59 = vadd.f32 %v5836_v2, %v5599_v62  ;;  %v5838_v57 = vpop.permute.xlu1 %5837  ;;  %v5611_v62 = vmul.f32 %v11489_v3, %v12571_v29  ;;  %v12576_v3 = vld [vmem:[#allocation42_spill] sm:$0xff] }
 0x33e   : > { %v11715_v51 = vadd.f32 %v5838_v57, %v5600_v41 }
 0x33f   : > { %6027 = vrot.lane.b32.xlu0 %v11713_v59, %s8981_s11 }
 0x340   : > { %v5848_v34 = vpop.permute.xlu0 %5847  ;;  %6029 = vrot.lane.b32.xlu1 %v11715_v51, %s8981_s11 }
 0x341   : > { %v11725_v56 = vadd.f32 %v5848_v34, %v5605_v35  ;;  %v5850_v53 = vpop.permute.xlu1 %5849  ;;  %v12575_v35 = vld [vmem:[#allocation43_spill] sm:$0xff]  ;;  %v5618_v34 = vmul.f32 %v11508_v42, %v12576_v3 }
 0x342   : > { %v11727_v37 = vadd.f32 %v5850_v53, %v5606_v6  ;;  %v5617_v6 = vmul.f32 %v11496_v7, %v12575_v35  ;;  %v12580_v7 = vld [vmem:[#allocation40_spill] sm:$0xff] }
 0x343   : > { %6039 = vrot.lane.b32.xlu0 %v11725_v56, %s8981_s11 }
 0x344   : > { %v5844_v38 = vpop.permute.xlu0 %5843  ;;  %6041 = vrot.lane.b32.xlu1 %v11727_v37, %s8981_s11 }
 0x345   : > { %v11737_v61 = vadd.f32 %v5844_v38, %v5603_v20  ;;  %v5846_v19 = vpop.permute.xlu1 %5845  ;;  %v12579_v38 = vld [vmem:[#allocation41_spill] sm:$0xff] }
 0x346   : > { %v11739_v0 = vadd.f32 %v5846_v19, %v5604_v43  ;;  %v5615_v19 = vmul.f32 %v11510_v46, %v12579_v38  ;;  %v5941_v46 = vld [vmem:[%s12376_s5 + $0x10] sm:$0xff] }
 0x347   : > { %6035 = vrot.lane.b32.xlu0 %v11737_v61, %s8981_s11 }
 0x348   : > { %v5856_v30 = vpop.permute.xlu0 %5855  ;;  %6037 = vrot.lane.b32.xlu1 %v11739_v0, %s8981_s11 }
 0x349   : > { %v11749_v48 = vadd.f32 %v5856_v30, %v5609_v13  ;;  %v5858_v63 = vpop.permute.xlu1 %5857  ;;  %v5616_v13 = vmul.f32 %v11515_v24, %v12580_v7 }
 0x34a   : > { %v11751_v4 = vadd.f32 %v5858_v63, %v5610_v49  ;;  %v5942_v63 = vld [vmem:[%s12376_s5 + $0x18] sm:$0xff] }
 0x34b   : > { %6047 = vrot.lane.b32.xlu0 %v11749_v48, %s8981_s11 }
 0x34c   : > { %v5852_v15 = vpop.permute.xlu0 %5851  ;;  %6049 = vrot.lane.b32.xlu1 %v11751_v4, %s8981_s11 }
 0x34d   : > { %v11761_v11 = vadd.f32 %v5852_v15, %v5607_v28  ;;  %v5854_v40 = vpop.permute.xlu1 %5853 }
 0x34e   : > { %v11763_v55 = vadd.f32 %v5854_v40, %v5608_v14 }
 0x34f   : > { %6043 = vrot.lane.b32.xlu0 %v11761_v11, %s8981_s11 }
 0x350   : > { %v5864_v25 = vpop.permute.xlu0 %5863  ;;  %6045 = vrot.lane.b32.xlu1 %v11763_v55, %s8981_s11 }
 0x351   : > { %v11773_v47 = vadd.f32 %v5864_v25, %v5613_v44  ;;  %v5866_v23 = vpop.permute.xlu1 %5865  ;;  %v5940_v44 = vld [vmem:[%s12376_s5 + $0x8] sm:$0xff]  ;;  %v5945_v25 = vld [vmem:[%s12376_s5 + $0x30] sm:$0xff] }
 0x352   : > { %v11775_v58 = vadd.f32 %v5866_v23, %v5614_v39  ;;  %v5946_v23 = vld [vmem:[%s12376_s5 + $0x38] sm:$0xff] }
 0x353   : > { %6055 = vrot.lane.b32.xlu0 %v11773_v47, %s8981_s11 }
 0x354   : > { %12570 = vst [vmem:[#allocation36_spill] sm:$0xff] %v11775_v58  ;;  %v5860_v41 = vpop.permute.xlu0 %5859  ;;  %6057 = vrot.lane.b32.xlu1 %v11775_v58, %s8981_s11 }
 0x355   : > { %v11785_v31 = vadd.f32 %v5860_v41, %v5611_v62  ;;  %v5862_v2 = vpop.permute.xlu1 %5861  ;;  %v5943_v41 = vld [vmem:[%s12376_s5 + $0x20] sm:$0xff] }
 0x356   : > { %v11787_v57 = vadd.f32 %v5862_v2, %v5612_v12 }
 0x357   : > { %12573 = vst [vmem:[#allocation35_spill] sm:$0xff] %v11785_v31  ;;  %6051 = vrot.lane.b32.xlu0 %v11785_v31, %s8981_s11 }
 0x358   : > { %12574 = vst [vmem:[#allocation34_spill] sm:$0xff] %v11787_v57  ;;  %v5872_v53 = vpop.permute.xlu0 %5871  ;;  %6053 = vrot.lane.b32.xlu1 %v11787_v57, %s8981_s11 }
 0x359   : > { %v11797_v52 = vadd.f32 %v5872_v53, %v5617_v6  ;;  %v5874_v20 = vpop.permute.xlu1 %5873  ;;  %v5944_v6 = vld [vmem:[%s12376_s5 + $0x28] sm:$0xff]  ;;  %v5949_v53 = vld [vmem:[%s12376_s5 + $0x50] sm:$0xff] }
 0x35a   : > { %v11799_v43 = vadd.f32 %v5874_v20, %v5618_v34  ;;  %v5950_v20 = vld [vmem:[%s12376_s5 + $0x58] sm:$0xff] }
 0x35b   : > { %12577 = vst [vmem:[#allocation39_spill] sm:$0xff] %v11797_v52  ;;  %6063 = vrot.lane.b32.xlu0 %v11797_v52, %s8981_s11 }
 0x35c   : > { %12578 = vst [vmem:[#allocation38_spill] sm:$0xff] %v11799_v43  ;;  %v5868_v36 = vpop.permute.xlu0 %5867  ;;  %6065 = vrot.lane.b32.xlu1 %v11799_v43, %s8981_s11 }
 0x35d   : > { %v11809_v42 = vadd.f32 %v5868_v36, %v5615_v19  ;;  %v5870_v49 = vpop.permute.xlu1 %5869  ;;  %v5947_v36 = vld [vmem:[%s12376_s5 + $0x40] sm:$0xff] }
 0x35e   : > { %v11811_v30 = vadd.f32 %v5870_v49, %v5616_v13 }
 0x35f   : > { %12581 = vst [vmem:[#allocation37_spill] sm:$0xff] %v11809_v42  ;;  %6059 = vrot.lane.b32.xlu0 %v11809_v42, %s8981_s11 }
 0x360   : > { %12582 = vst [vmem:[#allocation43_spill] sm:$0xff] %v11811_v30  ;;  %6061 = vrot.lane.b32.xlu1 %v11811_v30, %s8981_s11 }
 0x38c   : > { %v6008_v24 = vpop.permute.xlu0 %6007 }
 0x38d   : > { %v6101_v22 = vmul.f32 %v6008_v24, %v5941_v46  ;;  %v5948_v46 = vld [vmem:[%s12376_s5 + $0x48] sm:$0xff] }
 0x38f   : > { %6167 = vrot.lane.b32.xlu0 %v6101_v22, %s8981_s11  ;;  %v5953_v22 = vld [vmem:[%s12376_s5 + $0x70] sm:$0xff] }
 0x390   : > { %v6010_v28 = vpop.permute.xlu1 %6009 }
 0x391   : > { %v6102_v14 = vmul.f32 %v6010_v28, %v5942_v63 }
 0x392   : > { %v6004_v15 = vpop.permute.xlu0 %6003 }
 0x393   : > { %v6099_v40 = vmul.f32 %v6004_v15, %v5939_v21  ;;  %6169 = vrot.lane.b32.xlu1 %v6102_v14, %s8981_s11  ;;  %v5954_v14 = vld [vmem:[%s12376_s5 + $0x78] sm:$0xff] }
 0x395   : > { %6163 = vrot.lane.b32.xlu0 %v6099_v40, %s8981_s11 }
 0x396   : > { %v6006_v16 = vpop.permute.xlu1 %6005 }
 0x397   : > { %v6100_v39 = vmul.f32 %v6006_v16, %v5940_v44  ;;  %v5951_v16 = vld [vmem:[%s12376_s5 + $0x60] sm:$0xff] }
 0x399   : > { %v6016_v29 = vpop.permute.xlu0 %6015  ;;  %6165 = vrot.lane.b32.xlu1 %v6100_v39, %s8981_s11  ;;  %v5952_v39 = vld [vmem:[%s12376_s5 + $0x68] sm:$0xff] }
 0x39a   : > { %v6105_v62 = vmul.f32 %v6016_v29, %v5945_v25  ;;  %v6018_v50 = vpop.permute.xlu1 %6017 }
 0x39b   : > { %v6106_v12 = vmul.f32 %v6018_v50, %v5946_v23  ;;  %v5957_v50 = vld [vmem:[%s12376_s5 + $0x90] sm:$0xff] }
 0x39c   : > { %6175 = vrot.lane.b32.xlu0 %v6105_v62, %s8981_s11 }
 0x39d   : > { %v6012_v2 = vpop.permute.xlu0 %6011  ;;  %6177 = vrot.lane.b32.xlu1 %v6106_v12, %s8981_s11  ;;  %v5958_v12 = vld [vmem:[%s12376_s5 + $0x98] sm:$0xff] }
 0x39e   : > { %v6103_v35 = vmul.f32 %v6012_v2, %v5943_v41 }
 0x3a0   : > { %6171 = vrot.lane.b32.xlu0 %v6103_v35, %s8981_s11 }
 0x3a1   : > { %v6014_v3 = vpop.permute.xlu1 %6013 }
 0x3a2   : > { %v6104_v34 = vmul.f32 %v6014_v3, %v5944_v6  ;;  %v5955_v3 = vld [vmem:[%s12376_s5 + $0x80] sm:$0xff] }
 0x3a4   : > { %6173 = vrot.lane.b32.xlu1 %v6104_v34, %s8981_s11  ;;  %v5956_v34 = vld [vmem:[%s12376_s5 + $0x88] sm:$0xff] }
 0x3a5   : > { %v6024_v38 = vpop.permute.xlu0 %6023 }
 0x3a6   : > { %v6109_v19 = vmul.f32 %v6024_v38, %v5949_v53  ;;  %v6026_v7 = vpop.permute.xlu1 %6025 }
 0x3a7   : > { %v6110_v13 = vmul.f32 %v6026_v7, %v5950_v20  ;;  %v5961_v7 = vld [vmem:[%s12376_s5 + $0xb0] sm:$0xff] }
 0x3a8   : > { %6183 = vrot.lane.b32.xlu0 %v6109_v19, %s8981_s11 }
 0x3a9   : > { %v6020_v49 = vpop.permute.xlu0 %6019  ;;  %6185 = vrot.lane.b32.xlu1 %v6110_v13, %s8981_s11  ;;  %v5962_v13 = vld [vmem:[%s12376_s5 + $0xb8] sm:$0xff] }
 0x3aa   : > { %v6107_v24 = vmul.f32 %v6020_v49, %v5947_v36  ;;  %v6022_v63 = vpop.permute.xlu1 %6021 }
 0x3ab   : > { %v6108_v28 = vmul.f32 %v6022_v63, %v5948_v46  ;;  %v5959_v63 = vld [vmem:[%s12376_s5 + $0xa0] sm:$0xff] }
 0x3ac   : > { %6179 = vrot.lane.b32.xlu0 %v6107_v24, %s8981_s11 }
 0x3ad   : > { %v6032_v21 = vpop.permute.xlu0 %6031  ;;  %6181 = vrot.lane.b32.xlu1 %v6108_v28, %s8981_s11 }
 0x3ae   : > { %v6113_v15 = vmul.f32 %v6032_v21, %v5953_v22  ;;  %v6034_v40 = vpop.permute.xlu1 %6033  ;;  %v5960_v22 = vld [vmem:[%s12376_s5 + $0xa8] sm:$0xff] }
 0x3af   : > { %v6114_v44 = vmul.f32 %v6034_v40, %v5954_v14  ;;  %v5965_v40 = vld [vmem:[%s12376_s5 + $0xd0] sm:$0xff] }
 0x3b0   : > { %6191 = vrot.lane.b32.xlu0 %v6113_v15, %s8981_s11 }
 0x3b1   : > { %v6028_v25 = vpop.permute.xlu0 %6027  ;;  %6193 = vrot.lane.b32.xlu1 %v6114_v44, %s8981_s11  ;;  %v5966_v44 = vld [vmem:[%s12376_s5 + $0xd8] sm:$0xff] }
 0x3b2   : > { %v6111_v23 = vmul.f32 %v6028_v25, %v5951_v16  ;;  %v6030_v29 = vpop.permute.xlu1 %6029 }
 0x3b3   : > { %v6112_v62 = vmul.f32 %v6030_v29, %v5952_v39  ;;  %v5963_v29 = vld [vmem:[%s12376_s5 + $0xc0] sm:$0xff] }
 0x3b4   : > { %6187 = vrot.lane.b32.xlu0 %v6111_v23, %s8981_s11 }
 0x3b5   : > { %v6040_v41 = vpop.permute.xlu0 %6039  ;;  %6189 = vrot.lane.b32.xlu1 %v6112_v62, %s8981_s11  ;;  %v5964_v62 = vld [vmem:[%s12376_s5 + $0xc8] sm:$0xff] }
 0x3b6   : > { %v6117_v2 = vmul.f32 %v6040_v41, %v5957_v50  ;;  %v6042_v35 = vpop.permute.xlu1 %6041 }
 0x3b7   : > { %v6118_v6 = vmul.f32 %v6042_v35, %v5958_v12  ;;  %v5969_v35 = vld [vmem:[%s12376_s5 + $0xf0] sm:$0xff] }
 0x3b8   : > { %6199 = vrot.lane.b32.xlu0 %v6117_v2, %s8981_s11 }
 0x3b9   : > { %v6036_v53 = vpop.permute.xlu0 %6035  ;;  %6201 = vrot.lane.b32.xlu1 %v6118_v6, %s8981_s11  ;;  %v5970_v6 = vld [vmem:[%s12376_s5 + $0xf8] sm:$0xff] }
 0x3ba   : > { %v6115_v20 = vmul.f32 %v6036_v53, %v5955_v3  ;;  %v6038_v38 = vpop.permute.xlu1 %6037 }
 0x3bb   : > { %v6116_v19 = vmul.f32 %v6038_v38, %v5956_v34  ;;  %v5967_v38 = vld [vmem:[%s12376_s5 + $0xe0] sm:$0xff] }
 0x3bc   : > { %6195 = vrot.lane.b32.xlu0 %v6115_v20, %s8981_s11 }
 0x3bd   : > { %v6048_v36 = vpop.permute.xlu0 %6047  ;;  %6197 = vrot.lane.b32.xlu1 %v6116_v19, %s8981_s11  ;;  %v5968_v19 = vld [vmem:[%s12376_s5 + $0xe8] sm:$0xff] }
 0x3be   : > { %v6121_v49 = vmul.f32 %v6048_v36, %v5961_v7  ;;  %v6050_v46 = vpop.permute.xlu1 %6049 }
 0x3bf   : > { %v6122_v24 = vmul.f32 %v6050_v46, %v5962_v13 }
 0x3c0   : > { %6207 = vrot.lane.b32.xlu0 %v6121_v49, %s8981_s11 }
 0x3c1   : > { %v6044_v28 = vpop.permute.xlu0 %6043  ;;  %6209 = vrot.lane.b32.xlu1 %v6122_v24, %s8981_s11  ;;  %v12583_v24 = vld [vmem:[#allocation10_spill] sm:$0xff] }
 0x3c2   : > { %v6119_v21 = vmul.f32 %v6044_v28, %v5959_v63  ;;  %v6046_v14 = vpop.permute.xlu1 %6045  ;;  %v12584_v28 = vld [vmem:[#allocation14_spill] sm:$0xff] }
 0x3c3   : > { %v6120_v15 = vmul.f32 %v6046_v14, %v5960_v22 }
 0x3c4   : > { %6203 = vrot.lane.b32.xlu0 %v6119_v21, %s8981_s11 }
 0x3c5   : > { %v6056_v16 = vpop.permute.xlu0 %6055  ;;  %6205 = vrot.lane.b32.xlu1 %v6120_v15, %s8981_s11  ;;  %v12585_v15 = vld [vmem:[#allocation15_spill] sm:$0xff] }
 0x3c6   : > { %v6125_v39 = vmul.f32 %v6056_v16, %v5965_v40  ;;  %v6058_v25 = vpop.permute.xlu1 %6057  ;;  %v12586_v16 = vld [vmem:[#allocation6_spill] sm:$0xff] }
 0x3c7   : > { %v6126_v23 = vmul.f32 %v6058_v25, %v5966_v44 }
 0x3c8   : > { %6215 = vrot.lane.b32.xlu0 %v6125_v39, %s8981_s11 }
 0x3c9   : > { %v6052_v50 = vpop.permute.xlu0 %6051  ;;  %6217 = vrot.lane.b32.xlu1 %v6126_v23, %s8981_s11  ;;  %v12587_v23 = vld [vmem:[#allocation5_spill] sm:$0xff] }
 0x3ca   : > { %v6123_v12 = vmul.f32 %v6052_v50, %v5963_v29  ;;  %v6054_v41 = vpop.permute.xlu1 %6053  ;;  %v12588_v50 = vld [vmem:[#allocation9_spill] sm:$0xff] }
 0x3cb   : > { %v6124_v2 = vmul.f32 %v6054_v41, %v5964_v62 }
 0x3cc   : > { %6211 = vrot.lane.b32.xlu0 %v6123_v12, %s8981_s11 }
 0x3cd   : > { %v6064_v3 = vpop.permute.xlu0 %6063  ;;  %6213 = vrot.lane.b32.xlu1 %v6124_v2, %s8981_s11  ;;  %v12589_v2 = vld [vmem:[#allocation16_spill] sm:$0xff] }
 0x3ce   : > { %v6129_v34 = vmul.f32 %v6064_v3, %v5969_v35  ;;  %v6066_v53 = vpop.permute.xlu1 %6065  ;;  %v12590_v3 = vld [vmem:[#allocation4_spill] sm:$0xff] }
 0x3cf   : > { %v6130_v20 = vmul.f32 %v6066_v53, %v5970_v6 }
 0x3d0   : > { %6223 = vrot.lane.b32.xlu0 %v6129_v34, %s8981_s11 }
 0x3d1   : > { %v6060_v7 = vpop.permute.xlu0 %6059  ;;  %6225 = vrot.lane.b32.xlu1 %v6130_v20, %s8981_s11  ;;  %v12591_v20 = vld [vmem:[#allocation17_spill] sm:$0xff] }
 0x3d2   : > { %v6127_v13 = vmul.f32 %v6060_v7, %v5967_v38  ;;  %v6062_v36 = vpop.permute.xlu1 %6061  ;;  %v12592_v7 = vld [vmem:[#allocation2_spill] sm:$0xff] }
 0x3d3   : > { %v6128_v49 = vmul.f32 %v6062_v36, %v5968_v19 }
 0x3d4   : > { %6219 = vrot.lane.b32.xlu0 %v6127_v13, %s8981_s11 }
 0x3d5   : > { %6221 = vrot.lane.b32.xlu1 %v6128_v49, %s8981_s11  ;;  %v12593_v49 = vld [vmem:[#allocation18_spill] sm:$0xff] }
 0x401   : > { %v6168_v46 = vpop.permute.xlu0 %6167 }
 0x402   : > { %v6261_v63 = vadd.f32 %v6168_v46, %v12583_v24 }
 0x404   : > { %6359 = vrot.lane.b32.xlu0 %v6261_v63, %s8979_s17  ;;  %v12594_v63 = vld [vmem:[#allocation3_spill] sm:$0xff] }
 0x405   : > { %v6170_v22 = vpop.permute.xlu1 %6169 }
 0x406   : > { %v6262_v21 = vadd.f32 %v6170_v22, %v12584_v28 }
 0x407   : > { %v6164_v14 = vpop.permute.xlu0 %6163 }
 0x408   : > { %v6259_v40 = vadd.f32 %v6164_v14, %v12585_v15  ;;  %6361 = vrot.lane.b32.xlu1 %v6262_v21, %s8979_s17  ;;  %v12595_v21 = vld [vmem:[#allocation8_spill] sm:$0xff] }
 0x40a   : > { %6355 = vrot.lane.b32.xlu0 %v6259_v40, %s8979_s17  ;;  %v12596_v40 = vld [vmem:[#allocation13_spill] sm:$0xff] }
 0x40b   : > { %v6166_v44 = vpop.permute.xlu1 %6165 }
 0x40c   : > { %v6260_v39 = vadd.f32 %v6166_v44, %v12586_v16 }
 0x40e   : > { %v6176_v25 = vpop.permute.xlu0 %6175  ;;  %6357 = vrot.lane.b32.xlu1 %v6260_v39, %s8979_s17  ;;  %v12597_v39 = vld [vmem:[#allocation12_spill] sm:$0xff] }
 0x40f   : > { %v6265_v29 = vadd.f32 %v6176_v25, %v12587_v23  ;;  %v6178_v62 = vpop.permute.xlu1 %6177 }
 0x410   : > { %v6266_v12 = vadd.f32 %v6178_v62, %v12588_v50 }
 0x411   : > { %6367 = vrot.lane.b32.xlu0 %v6265_v29, %s8979_s17  ;;  %v12598_v29 = vld [vmem:[#allocation7_spill] sm:$0xff] }
 0x412   : > { %v6172_v41 = vpop.permute.xlu0 %6171  ;;  %6369 = vrot.lane.b32.xlu1 %v6266_v12, %s8979_s17  ;;  %v12599_v12 = vld [vmem:[#allocation11_spill] sm:$0xff] }
 0x413   : > { %v6263_v35 = vadd.f32 %v6172_v41, %v12589_v2 }
 0x415   : > { %6363 = vrot.lane.b32.xlu0 %v6263_v35, %s8979_s17  ;;  %v12600_v35 = vld [vmem:[#allocation20_spill] sm:$0xff] }
 0x416   : > { %v6174_v6 = vpop.permute.xlu1 %6173 }
 0x417   : > { %v6264_v34 = vadd.f32 %v6174_v6, %v12590_v3 }
 0x419   : > { %6365 = vrot.lane.b32.xlu1 %v6264_v34, %s8979_s17  ;;  %v12601_v34 = vld [vmem:[#allocation19_spill] sm:$0xff] }
 0x41a   : > { %v6184_v53 = vpop.permute.xlu0 %6183 }
 0x41b   : > { %v6269_v38 = vadd.f32 %v6184_v53, %v12591_v20  ;;  %v6186_v19 = vpop.permute.xlu1 %6185 }
 0x41c   : > { %v6270_v13 = vadd.f32 %v6186_v19, %v12592_v7 }
 0x41d   : > { %6375 = vrot.lane.b32.xlu0 %v6269_v38, %s8979_s17  ;;  %v12602_v38 = vld [vmem:[#allocation21_spill] sm:$0xff] }
 0x41e   : > { %v6180_v36 = vpop.permute.xlu0 %6179  ;;  %6377 = vrot.lane.b32.xlu1 %v6270_v13, %s8979_s17  ;;  %v12603_v13 = vld [vmem:[#allocation22_spill] sm:$0xff] }
 0x41f   : > { %v6267_v46 = vadd.f32 %v6180_v36, %v12593_v49  ;;  %v6182_v24 = vpop.permute.xlu1 %6181 }
 0x420   : > { %v6268_v22 = vadd.f32 %v6182_v24, %v12594_v63 }
 0x421   : > { %6371 = vrot.lane.b32.xlu0 %v6267_v46, %s8979_s17  ;;  %v12604_v46 = vld [vmem:[#allocation24_spill] sm:$0xff] }
 0x422   : > { %v6192_v28 = vpop.permute.xlu0 %6191  ;;  %6373 = vrot.lane.b32.xlu1 %v6268_v22, %s8979_s17  ;;  %v12605_v22 = vld [vmem:[#allocation23_spill] sm:$0xff] }
 0x423   : > { %v6273_v14 = vadd.f32 %v6192_v28, %v12595_v21  ;;  %v6194_v15 = vpop.permute.xlu1 %6193 }
 0x424   : > { %v6274_v44 = vadd.f32 %v6194_v15, %v12596_v40 }
 0x425   : > { %6383 = vrot.lane.b32.xlu0 %v6273_v14, %s8979_s17  ;;  %v12606_v14 = vld [vmem:[#allocation25_spill] sm:$0xff] }
 0x426   : > { %v6188_v16 = vpop.permute.xlu0 %6187  ;;  %6385 = vrot.lane.b32.xlu1 %v6274_v44, %s8979_s17  ;;  %v12607_v44 = vld [vmem:[#allocation26_spill] sm:$0xff] }
 0x427   : > { %v6271_v25 = vadd.f32 %v6188_v16, %v12597_v39  ;;  %v6190_v23 = vpop.permute.xlu1 %6189 }
 0x428   : > { %v6272_v62 = vadd.f32 %v6190_v23, %v12598_v29 }
 0x429   : > { %6379 = vrot.lane.b32.xlu0 %v6271_v25, %s8979_s17  ;;  %v12608_v25 = vld [vmem:[#allocation28_spill] sm:$0xff] }
 0x42a   : > { %v6200_v50 = vpop.permute.xlu0 %6199  ;;  %6381 = vrot.lane.b32.xlu1 %v6272_v62, %s8979_s17  ;;  %v12609_v62 = vld [vmem:[#allocation27_spill] sm:$0xff] }
 0x42b   : > { %v6277_v41 = vadd.f32 %v6200_v50, %v12599_v12  ;;  %v6202_v2 = vpop.permute.xlu1 %6201 }
 0x42c   : > { %v6278_v6 = vadd.f32 %v6202_v2, %v12600_v35 }
 0x42d   : > { %6391 = vrot.lane.b32.xlu0 %v6277_v41, %s8979_s17  ;;  %v12610_v41 = vld [vmem:[#allocation29_spill] sm:$0xff] }
 0x42e   : > { %v6196_v3 = vpop.permute.xlu0 %6195  ;;  %6393 = vrot.lane.b32.xlu1 %v6278_v6, %s8979_s17 }
 0x42f   : > { %v6275_v53 = vadd.f32 %v6196_v3, %v12601_v34  ;;  %v6198_v20 = vpop.permute.xlu1 %6197  ;;  %v12611_v34 = vld [vmem:[#allocation31_spill] sm:$0xff] }
 0x430   : > { %v6276_v19 = vadd.f32 %v6198_v20, %v12602_v38  ;;  %v12612_v38 = vld [vmem:[#allocation33_spill] sm:$0xff] }
 0x431   : > { %6387 = vrot.lane.b32.xlu0 %v6275_v53, %s8979_s17 }
 0x432   : > { %v6208_v7 = vpop.permute.xlu0 %6207  ;;  %6389 = vrot.lane.b32.xlu1 %v6276_v19, %s8979_s17 }
 0x433   : > { %v6281_v36 = vadd.f32 %v6208_v7, %v12603_v13  ;;  %v6210_v49 = vpop.permute.xlu1 %6209  ;;  %v12613_v7 = vld [vmem:[#allocation30_spill] sm:$0xff] }
 0x434   : > { %v6282_v24 = vadd.f32 %v6210_v49, %v12604_v46  ;;  %v6293_v46 = vmul.f32 2.0, %v11629_v10 }
 0x435   : > { %6399 = vrot.lane.b32.xlu0 %v6281_v36, %s8979_s17  ;;  %v12614_v36 = vld [vmem:[#allocation32_spill] sm:$0xff] }
 0x436   : > { %v6204_v63 = vpop.permute.xlu0 %6203  ;;  %6401 = vrot.lane.b32.xlu1 %v6282_v24, %s8979_s17 }
 0x437   : > { %v6279_v28 = vadd.f32 %v6204_v63, %v12605_v22  ;;  %v6206_v21 = vpop.permute.xlu1 %6205  ;;  %v6294_v22 = vmul.f32 2.0, %v11633_v18 }
 0x438   : > { %v6280_v15 = vadd.f32 %v6206_v21, %v12606_v14 }
 0x439   : > { %6395 = vrot.lane.b32.xlu0 %v6279_v28, %s8979_s17 }
 0x43a   : > { %v6216_v40 = vpop.permute.xlu0 %6215  ;;  %6397 = vrot.lane.b32.xlu1 %v6280_v15, %s8979_s17  ;;  %v6291_v15 = vmul.f32 2.0, %v11637_v5 }
 0x43b   : > { %v6285_v16 = vadd.f32 %v6216_v40, %v12607_v44  ;;  %v6218_v39 = vpop.permute.xlu1 %6217 }
 0x43c   : > { %v6286_v23 = vadd.f32 %v6218_v39, %v12608_v25  ;;  %v6292_v25 = vmul.f32 2.0, %v11645_v45 }
 0x43d   : > { %6407 = vrot.lane.b32.xlu0 %v6285_v16, %s8979_s17 }
 0x43e   : > { %v6212_v29 = vpop.permute.xlu0 %6211  ;;  %6409 = vrot.lane.b32.xlu1 %v6286_v23, %s8979_s17 }
 0x43f   : > { %v6283_v50 = vadd.f32 %v6212_v29, %v12609_v62  ;;  %v6214_v12 = vpop.permute.xlu1 %6213 }
 0x440   : > { %v6284_v2 = vadd.f32 %v6214_v12, %v12610_v41  ;;  %v6298_v41 = vmul.f32 2.0, %v11655_v33 }
 0x441   : > { %6403 = vrot.lane.b32.xlu0 %v6283_v50, %s8979_s17  ;;  %v6297_v50 = vmul.f32 2.0, %v11653_v32 }
 0x442   : > { %v6224_v35 = vpop.permute.xlu0 %6223  ;;  %6405 = vrot.lane.b32.xlu1 %v6284_v2, %s8979_s17 }
 0x443   : > { %v6226_v6 = vpop.permute.xlu1 %6225  ;;  %v6289_v13 = vadd.f32 %v6224_v35, %v12613_v7 }
 0x444   : > { %v6290_v49 = vadd.f32 %v6226_v6, %v12614_v36 }
 0x446   : > { %v6220_v3 = vpop.permute.xlu0 %6219 }
 0x447   : > { %v6287_v53 = vadd.f32 %v6220_v3, %v12611_v34  ;;  %v6222_v20 = vpop.permute.xlu1 %6221 }
 0x448   : > { %v6288_v19 = vadd.f32 %v6222_v20, %v12612_v38  ;;  %v6295_v20 = vmul.f32 2.0, %v11663_v17 }
 0x449   : > { %6411 = vrot.lane.b32.xlu0 %v6287_v53, %s8979_s17 }
 0x44a   : > { %6413 = vrot.lane.b32.xlu1 %v6288_v19, %s8979_s17 }
 0x44d   : > { %6415 = vrot.lane.b32.xlu0 %v6289_v13, %s8979_s17 }
 0x44e   : > { %6417 = vrot.lane.b32.xlu1 %v6290_v49, %s8979_s17 }
 0x476   : > { %v6360_v24 = vpop.permute.xlu0 %6359 }
 0x477   : > { %v6453_v63 = vsel %vm5099_vm8, %v6360_v24, %v6293_v46  ;;  %v6296_v24 = vmul.f32 2.0, %v11669_v26 }
 0x478   : > { %v7703_v28 = vmul.f32 -1.442695, %v6453_v63 }
 0x47a   : > { %v6362_v21 = vpop.permute.xlu1 %6361  ;;  %8769 = vpow2.f32 %v7703_v28 }
 0x47b   : > { %v6454_v14 = vsel %vm5099_vm8, %v6362_v21, %v6294_v22 }
 0x47c   : > { %v7704_v40 = vmul.f32 -1.442695, %v6454_v14  ;;  %v6356_v44 = vpop.permute.xlu0 %6355  ;;  %v6301_v14 = vmul.f32 2.0, %v11677_v9 }
 0x47d   : > { %v6451_v16 = vsel %vm5099_vm8, %v6356_v44, %v6291_v15  ;;  %v6302_v44 = vmul.f32 2.0, %v11679_v1 }
 0x47e   : > { %8771 = vpow2.f32 %v7704_v40  ;;  %v7701_v39 = vmul.f32 -1.442695, %v6451_v16 }
 0x480   : > { %8773 = vpow2.f32 %v7701_v39  ;;  %v6358_v23 = vpop.permute.xlu1 %6357 }
 0x481   : > { %v6452_v29 = vsel %vm5099_vm8, %v6358_v23, %v6292_v25 }
 0x482   : > { %v7702_v62 = vmul.f32 -1.442695, %v6452_v29 }
 0x483   : > { %v6368_v12 = vpop.permute.xlu0 %6367 }
 0x484   : > { %8775 = vpow2.f32 %v7702_v62  ;;  %v6457_v2 = vsel %vm5099_vm8, %v6368_v12, %v6297_v50  ;;  %v6370_v35 = vpop.permute.xlu1 %6369  ;;  %v8770_v34 = vpop.eup %8769  ;;  %v6299_v12 = vmul.f32 2.0, %v11689_v27 }
 0x485   : > { %v7707_v6 = vmul.f32 -1.442695, %v6457_v2  ;;  %v6458_v3 = vsel %vm5099_vm8, %v6370_v35, %v6298_v41  ;;  %v6581_v38 = vadd.f32 1.0, %v8770_v34 }
 0x486   : > { %v7708_v53 = vmul.f32 -1.442695, %v6458_v3 }
 0x487   : > { %8777 = vpow2.f32 %v7707_v6  ;;  %v6364_v19 = vpop.permute.xlu0 %6363 }
 0x488   : > { %v8772_v7 = vpop.eup %8771  ;;  %8779 = vpow2.f32 %v7708_v53  ;;  %v6455_v13 = vsel %vm5099_vm8, %v6364_v19, %v6295_v20  ;;  %v6300_v53 = vmul.f32 2.0, %v11693_v60 }
 0x489   : > { %8781 = vrcp.f32 %v6581_v38  ;;  %v6582_v36 = vadd.f32 1.0, %v8772_v7  ;;  %v7705_v49 = vmul.f32 -1.442695, %v6455_v13 }
 0x48a   : > { %v8774_v46 = vpop.eup %8773 }
 0x48b   : > { %8783 = vrcp.f32 %v6582_v36  ;;  %v6579_v63 = vadd.f32 1.0, %v8774_v46  ;;  %v6366_v22 = vpop.permute.xlu1 %6365  ;;  %v6305_v36 = vmul.f32 2.0, %v11699_v54 }
 0x48c   : > { %8785 = vpow2.f32 %v7705_v49  ;;  %v6456_v28 = vsel %vm5099_vm8, %v6366_v22, %v6296_v24 }
 0x48d   : > { %8787 = vrcp.f32 %v6579_v63  ;;  %v7706_v21 = vmul.f32 -1.442695, %v6456_v28 }
 0x48e   : > { %v8776_v15 = vpop.eup %8775 }
 0x48f   : > { %v6376_v40 = vpop.permute.xlu0 %6375  ;;  %v6580_v16 = vadd.f32 1.0, %v8776_v15  ;;  %8789 = vpow2.f32 %v7706_v21  ;;  %v6306_v15 = vmul.f32 2.0, %v11703_v8 }
 0x490   : > { %v6461_v39 = vsel %vm5099_vm8, %v6376_v40, %v6301_v14  ;;  %v6378_v25 = vpop.permute.xlu1 %6377 }
 0x491   : > { %v7711_v23 = vmul.f32 -1.442695, %v6461_v39  ;;  %v6462_v29 = vsel %vm5099_vm8, %v6378_v25, %v6302_v44  ;;  %v8778_v62 = vpop.eup %8777  ;;  %8791 = vrcp.f32 %v6580_v16 }
 0x492   : > { %v7712_v50 = vmul.f32 -1.442695, %v6462_v29  ;;  %v8780_v41 = vpop.eup %8779  ;;  %v6585_v2 = vadd.f32 1.0, %v8778_v62  ;;  %v6303_v29 = vmul.f32 2.0, %v11713_v59 }
 0x493   : > { %8793 = vpow2.f32 %v7711_v23  ;;  %v6372_v35 = vpop.permute.xlu0 %6371  ;;  %v12030_v6 = vpop.eup %8781  ;;  %v6586_v3 = vadd.f32 1.0, %v8780_v41 }
 0x494   : > { %8795 = vpow2.f32 %v7712_v50  ;;  %v6459_v34 = vsel %vm5099_vm8, %v6372_v35, %v6299_v12  ;;  %v6374_v38 = vpop.permute.xlu1 %6373  ;;  %v6677_v19 = vmul.f32 2.0, %v12030_v6  ;;  %v6304_v35 = vmul.f32 2.0, %v11715_v51 }
 0x495   : > { %8797 = vrcp.f32 %v6585_v2  ;;  %v7709_v20 = vmul.f32 -1.442695, %v6459_v34  ;;  %v12035_v7 = vpop.eup %8783  ;;  %v6460_v13 = vsel %vm5099_vm8, %v6374_v38, %v6300_v53 }
 0x496   : > { %8799 = vrcp.f32 %v6586_v3  ;;  %v8786_v49 = vpop.eup %8785  ;;  %v7710_v46 = vmul.f32 -1.442695, %v6460_v13  ;;  %v7735_v63 = vadd.f32 -1.0, %v6677_v19  ;;  %v6678_v22 = vmul.f32 2.0, %v12035_v7 }
 0x497   : > { %8801 = vpow2.f32 %v7709_v20  ;;  %v6384_v24 = vpop.permute.xlu0 %6383  ;;  %v12040_v28 = vpop.eup %8787  ;;  %v6583_v21 = vadd.f32 1.0, %v8786_v49 }
 0x498   : > { %v6465_v14 = vsel %vm5099_vm8, %v6384_v24, %v6305_v36  ;;  %8803 = vpow2.f32 %v7710_v46  ;;  %v6386_v44 = vpop.permute.xlu1 %6385  ;;  %6775 = vrot.lane.b32.xlu0 %v7735_v63, %s8981_s11  ;;  %v7736_v16 = vadd.f32 -1.0, %v6678_v22  ;;  %v6675_v39 = vmul.f32 2.0, %v12040_v28 }
 0x499   : > { %v7715_v40 = vmul.f32 -1.442695, %v6465_v14  ;;  %v8790_v25 = vpop.eup %8789  ;;  %8805 = vrcp.f32 %v6583_v21  ;;  %v6466_v23 = vsel %vm5099_vm8, %v6386_v44, %v6306_v15  ;;  %v6309_v63 = vmul.f32 2.0, %v11725_v56 }
 0x49a   : > { %v6584_v62 = vadd.f32 1.0, %v8790_v25  ;;  %v7716_v50 = vmul.f32 -1.442695, %v6466_v23  ;;  %6777 = vrot.lane.b32.xlu1 %v7736_v16, %s8981_s11  ;;  %v7733_v12 = vadd.f32 -1.0, %v6675_v39  ;;  %v6310_v15 = vmul.f32 2.0, %v11727_v37 }
 0x49b   : > { %8807 = vpow2.f32 %v7715_v40  ;;  %v12049_v41 = vpop.eup %8791  ;;  %v6380_v2 = vpop.permute.xlu0 %6379  ;;  %v6307_v25 = vmul.f32 2.0, %v11737_v61 }
 0x49c   : > { %8809 = vrcp.f32 %v6584_v62  ;;  %v6463_v34 = vsel %vm5099_vm8, %v6380_v2, %v6303_v29  ;;  %v6382_v53 = vpop.permute.xlu1 %6381  ;;  %6771 = vrot.lane.b32.xlu0 %v7733_v12, %s8981_s11  ;;  %v6676_v20 = vmul.f32 2.0, %v12049_v41 }
 0x49d   : > { %v8794_v3 = vpop.eup %8793  ;;  %8811 = vpow2.f32 %v7716_v50  ;;  %v7713_v13 = vmul.f32 -1.442695, %v6463_v34  ;;  %v6464_v36 = vsel %vm5099_vm8, %v6382_v53, %v6304_v35 }
 0x49e   : > { %v8796_v38 = vpop.eup %8795  ;;  %v6589_v19 = vadd.f32 1.0, %v8794_v3  ;;  %v7714_v24 = vmul.f32 -1.442695, %v6464_v36  ;;  %v7734_v22 = vadd.f32 -1.0, %v6676_v20 }
 0x49f   : > { %v12056_v49 = vpop.eup %8797  ;;  %v6590_v46 = vadd.f32 1.0, %v8796_v38  ;;  %v6392_v14 = vpop.permute.xlu0 %6391  ;;  %v6308_v38 = vmul.f32 2.0, %v11739_v0 }
 0x4a0   : > { %v12059_v21 = vpop.eup %8799  ;;  %8813 = vrcp.f32 %v6589_v19  ;;  %v6681_v40 = vmul.f32 2.0, %v12056_v49  ;;  %v6469_v16 = vsel %vm5099_vm8, %v6392_v14, %v6309_v63  ;;  %v6394_v39 = vpop.permute.xlu1 %6393  ;;  %6773 = vrot.lane.b32.xlu1 %v7734_v22, %s8981_s11 }
 0x4a1   : > { %v8802_v44 = vpop.eup %8801  ;;  %8815 = vrcp.f32 %v6590_v46  ;;  %v6682_v23 = vmul.f32 2.0, %v12059_v21  ;;  %v7719_v62 = vmul.f32 -1.442695, %v6469_v16  ;;  %v6470_v50 = vsel %vm5099_vm8, %v6394_v39, %v6310_v15 }
 0x4a2   : > { %v6587_v29 = vadd.f32 1.0, %v8802_v44  ;;  %8817 = vpow2.f32 %v7713_v13  ;;  %v8804_v12 = vpop.eup %8803  ;;  %v7720_v2 = vmul.f32 -1.442695, %v6470_v50  ;;  %v7739_v35 = vadd.f32 -1.0, %v6681_v40 }
 0x4a3   : > { %8819 = vpow2.f32 %v7714_v24  ;;  %v7740_v3 = vadd.f32 -1.0, %v6682_v23  ;;  %v12068_v34 = vpop.eup %8805  ;;  %v6588_v53 = vadd.f32 1.0, %v8804_v12  ;;  %v6388_v20 = vpop.permute.xlu0 %6387  ;;  %v6313_v40 = vmul.f32 2.0, %v11749_v48 }
 0x4a4   : > { %8821 = vrcp.f32 %v6587_v29  ;;  %v6467_v36 = vsel %vm5099_vm8, %v6388_v20, %v6307_v25  ;;  %v6390_v13 = vpop.permute.xlu1 %6389  ;;  %6783 = vrot.lane.b32.xlu0 %v7739_v35, %s8981_s11  ;;  %v6679_v46 = vmul.f32 2.0, %v12068_v34  ;;  %v6314_v25 = vmul.f32 2.0, %v11751_v4 }
 0x4a5   : > { %v8808_v19 = vpop.eup %8807  ;;  %8823 = vpow2.f32 %v7719_v62  ;;  %6785 = vrot.lane.b32.xlu1 %v7740_v3, %s8981_s11  ;;  %v7717_v63 = vmul.f32 -1.442695, %v6467_v36  ;;  %v6468_v22 = vsel %vm5099_vm8, %v6390_v13, %v6308_v38  ;;  %v6311_v38 = vmul.f32 2.0, %v11761_v11 }
 0x4a6   : > { %8825 = vrcp.f32 %v6588_v53  ;;  %v6593_v24 = vadd.f32 1.0, %v8808_v19  ;;  %v12076_v14 = vpop.eup %8809  ;;  %v7718_v15 = vmul.f32 -1.442695, %v6468_v22  ;;  %v7737_v44 = vadd.f32 -1.0, %v6679_v46 }
 0x4a7   : > { %8827 = vpow2.f32 %v7720_v2  ;;  %v8812_v16 = vpop.eup %8811  ;;  %v6400_v39 = vpop.permute.xlu0 %6399  ;;  %v6680_v23 = vmul.f32 2.0, %v12076_v14  ;;  %v6312_v46 = vmul.f32 2.0, %v11763_v55 }
 0x4a8   : > { %8829 = vrcp.f32 %v6593_v24  ;;  %v6594_v29 = vadd.f32 1.0, %v8812_v16  ;;  %v6473_v62 = vsel %vm5099_vm8, %v6400_v39, %v6313_v40  ;;  %v6402_v50 = vpop.permute.xlu1 %6401  ;;  %6779 = vrot.lane.b32.xlu0 %v7737_v44, %s8981_s11 }
 0x4a9   : > { %8831 = vpow2.f32 %v7717_v63  ;;  %v7723_v2 = vmul.f32 -1.442695, %v6473_v62  ;;  %v6474_v35 = vsel %vm5099_vm8, %v6402_v50, %v6314_v25  ;;  %v7738_v3 = vadd.f32 -1.0, %v6680_v23 }
 0x4aa   : > { %v12083_v12 = vpop.eup %8813  ;;  %8833 = vpow2.f32 %v7718_v15  ;;  %v7724_v20 = vmul.f32 -1.442695, %v6474_v35 }
 0x4ab   : > { %v12086_v53 = vpop.eup %8815  ;;  %8835 = vrcp.f32 %v6594_v29  ;;  %v6685_v19 = vmul.f32 2.0, %v12083_v12  ;;  %v6396_v13 = vpop.permute.xlu0 %6395  ;;  %6781 = vrot.lane.b32.xlu1 %v7738_v3, %s8981_s11 }
 0x4ac   : > { %v8818_v36 = vpop.eup %8817  ;;  %8837 = vpow2.f32 %v7723_v2  ;;  %v6686_v24 = vmul.f32 2.0, %v12086_v53  ;;  %v6471_v15 = vsel %vm5099_vm8, %v6396_v13, %v6311_v38  ;;  %v6398_v40 = vpop.permute.xlu1 %6397  ;;  %v6317_v2 = vmul.f32 2.0, %v11773_v47 }
 0x4ad   : > { %v8820_v63 = vpop.eup %8819  ;;  %v6591_v22 = vadd.f32 1.0, %v8818_v36  ;;  %8839 = vpow2.f32 %v7724_v20  ;;  %v7743_v44 = vadd.f32 -1.0, %v6685_v19  ;;  %v7721_v25 = vmul.f32 -1.442695, %v6471_v15 }
 0x4ae   : > { %v12094_v16 = vpop.eup %8821  ;;  %v6592_v39 = vadd.f32 1.0, %v8820_v63  ;;  %v6472_v23 = vsel %vm5099_vm8, %v6398_v40, %v6312_v46  ;;  %v7744_v29 = vadd.f32 -1.0, %v6686_v24  ;;  %v6318_v19 = vmul.f32 2.0, %v11775_v58 }
 0x4af   : > { %v8824_v62 = vpop.eup %8823  ;;  %8841 = vrcp.f32 %v6591_v22  ;;  %v7722_v50 = vmul.f32 -1.442695, %v6472_v23  ;;  %6791 = vrot.lane.b32.xlu0 %v7743_v44, %s8981_s11  ;;  %v6683_v35 = vmul.f32 2.0, %v12094_v16  ;;  %v6408_v38 = vpop.permute.xlu0 %6407  ;;  %v6315_v23 = vmul.f32 2.0, %v11785_v31 }
 0x4b0   : > { %v12100_v3 = vpop.eup %8825  ;;  %8843 = vrcp.f32 %v6592_v39  ;;  %v6597_v20 = vadd.f32 1.0, %v8824_v62  ;;  %6793 = vrot.lane.b32.xlu1 %v7744_v29, %s8981_s11  ;;  %v6477_v13 = vsel %vm5099_vm8, %v6408_v38, %v6317_v2  ;;  %v6410_v46 = vpop.permute.xlu1 %6409 }
 0x4b1   : > { %v8828_v36 = vpop.eup %8827  ;;  %8845 = vpow2.f32 %v7721_v25  ;;  %v7741_v24 = vadd.f32 -1.0, %v6683_v35  ;;  %v6684_v63 = vmul.f32 2.0, %v12100_v3  ;;  %v7727_v40 = vmul.f32 -1.442695, %v6477_v13 }
 0x4b2   : > { %v12106_v22 = vpop.eup %8829  ;;  %8847 = vrcp.f32 %v6597_v20  ;;  %v6598_v15 = vadd.f32 1.0, %v8828_v36  ;;  %v6478_v44 = vsel %vm5099_vm8, %v6410_v46, %v6318_v19  ;;  %v6316_v20 = vmul.f32 2.0, %v11787_v57 }
 0x4b3   : > { %v8832_v39 = vpop.eup %8831  ;;  %8849 = vpow2.f32 %v7722_v50  ;;  %6787 = vrot.lane.b32.xlu0 %v7741_v24, %s8981_s11  ;;  %v7742_v25 = vadd.f32 -1.0, %v6684_v63  ;;  %v6689_v29 = vmul.f32 2.0, %v12106_v22  ;;  %v7728_v35 = vmul.f32 -1.442695, %v6478_v44  ;;  %v6404_v38 = vpop.permute.xlu0 %6403 }
 0x4b4   : > { %v8834_v62 = vpop.eup %8833  ;;  %8851 = vrcp.f32 %v6598_v15  ;;  %v6595_v2 = vadd.f32 1.0, %v8832_v39  ;;  %v6475_v50 = vsel %vm5099_vm8, %v6404_v38, %v6315_v23  ;;  %v6406_v19 = vpop.permute.xlu1 %6405 }
 0x4b5   : > { %v12113_v36 = vpop.eup %8835  ;;  %v6596_v13 = vadd.f32 1.0, %v8834_v62  ;;  %8853 = vpow2.f32 %v7727_v40  ;;  %6789 = vrot.lane.b32.xlu1 %v7742_v25, %s8981_s11  ;;  %v7747_v46 = vadd.f32 -1.0, %v6689_v29  ;;  %v6476_v63 = vsel %vm5099_vm8, %v6406_v19, %v6316_v20 }
 0x4b6   : > { %v8838_v24 = vpop.eup %8837  ;;  %8855 = vrcp.f32 %v6595_v2  ;;  %v6690_v15 = vmul.f32 2.0, %v12113_v36  ;;  %v7725_v57 = vmul.f32 -1.442695, %v6475_v50  ;;  %v7726_v40 = vmul.f32 -1.442695, %v6476_v63 }
 0x4b7   : > { %v8840_v44 = vpop.eup %8839  ;;  %8857 = vrcp.f32 %v6596_v13  ;;  %v6601_v39 = vadd.f32 1.0, %v8838_v24  ;;  %6799 = vrot.lane.b32.xlu0 %v7747_v46, %s8981_s11  ;;  %v6319_v20 = vmul.f32 2.0, %v11809_v42  ;;  %v6320_v24 = vmul.f32 2.0, %v11811_v30 }
 0x4b8   : > { %v6602_v62 = vadd.f32 1.0, %v8840_v44  ;;  %8859 = vpow2.f32 %v7728_v35  ;;  %v7748_v23 = vadd.f32 -1.0, %v6690_v15 }
 0x4b9   : > { %v12120_v38 = vpop.eup %8841  ;;  %8861 = vrcp.f32 %v6601_v39 }
 0x4ba   : > { %v12122_v25 = vpop.eup %8843  ;;  %8863 = vrcp.f32 %v6602_v62  ;;  %6801 = vrot.lane.b32.xlu1 %v7748_v23, %s8981_s11  ;;  %v6687_v29 = vmul.f32 2.0, %v12120_v38 }
 0x4bb   : > { %v8846_v2 = vpop.eup %8845  ;;  %8865 = vpow2.f32 %v7725_v57  ;;  %v6688_v13 = vmul.f32 2.0, %v12122_v25  ;;  %v6412_v46 = vpop.permute.xlu0 %6411 }
 0x4bc   : > { %v12128_v50 = vpop.eup %8847  ;;  %v6599_v35 = vadd.f32 1.0, %v8846_v2  ;;  %8867 = vpow2.f32 %v7726_v40  ;;  %v7745_v19 = vadd.f32 -1.0, %v6687_v29  ;;  %v6479_v15 = vsel %vm5099_vm8, %v6412_v46, %v6319_v20  ;;  %v6414_v39 = vpop.permute.xlu1 %6413 }
 0x4bd   : > { %v8850_v63 = vpop.eup %8849  ;;  %v7746_v44 = vadd.f32 -1.0, %v6688_v13  ;;  %v6693_v62 = vmul.f32 2.0, %v12128_v50  ;;  %v7729_v42 = vmul.f32 -1.442695, %v6479_v15  ;;  %v6480_v40 = vsel %vm5099_vm8, %v6414_v39, %v6320_v24 }
 0x4be   : > { %v12133_v57 = vpop.eup %8851  ;;  %8869 = vrcp.f32 %v6599_v35  ;;  %v6600_v23 = vadd.f32 1.0, %v8850_v63  ;;  %6795 = vrot.lane.b32.xlu0 %v7745_v19, %s8981_s11  ;;  %v7730_v2 = vmul.f32 -1.442695, %v6480_v40  ;;  %v6321_v20 = vmul.f32 2.0, %v11797_v52 }
 0x4bf   : > { %v8854_v29 = vpop.eup %8853  ;;  %6797 = vrot.lane.b32.xlu1 %v7746_v44, %s8981_s11  ;;  %v7751_v30 = vadd.f32 -1.0, %v6693_v62  ;;  %v6694_v13 = vmul.f32 2.0, %v12133_v57  ;;  %v6416_v35 = vpop.permute.xlu0 %6415  ;;  %v6322_v63 = vmul.f32 2.0, %v11799_v43 }
 0x4c0   : > { %v12140_v46 = vpop.eup %8855  ;;  %8871 = vrcp.f32 %v6600_v23  ;;  %v6605_v31 = vadd.f32 1.0, %v8854_v29  ;;  %v6481_v24 = vsel %vm5099_vm8, %v6416_v35, %v6321_v20  ;;  %v6418_v44 = vpop.permute.xlu1 %6417 }
 0x4c1   : > { %v12143_v19 = vpop.eup %8857  ;;  %8873 = vpow2.f32 %v7729_v42  ;;  %v7752_v15 = vadd.f32 -1.0, %v6694_v13  ;;  %v6691_v39 = vmul.f32 2.0, %v12140_v46  ;;  %v7731_v40 = vmul.f32 -1.442695, %v6481_v24 }
 0x4c2   : > { %v8860_v62 = vpop.eup %8859  ;;  %8875 = vrcp.f32 %v6605_v31  ;;  %6807 = vrot.lane.b32.xlu0 %v7751_v30, %s8981_s11  ;;  %v6482_v23 = vsel %vm5099_vm8, %v6418_v44, %v6322_v63  ;;  %v6692_v29 = vmul.f32 2.0, %v12143_v19 }
 0x4c3   : > { %v12150_v52 = vpop.eup %8861  ;;  %v6606_v43 = vadd.f32 1.0, %v8860_v62  ;;  %8877 = vpow2.f32 %v7730_v2  ;;  %6809 = vrot.lane.b32.xlu1 %v7752_v15, %s8981_s11  ;;  %v7732_v42 = vmul.f32 -1.442695, %v6482_v23  ;;  %v7749_v20 = vadd.f32 -1.0, %v6691_v39 }
 0x4c4   : > { %v12153_v13 = vpop.eup %8863  ;;  %8879 = vpow2.f32 %v7731_v40  ;;  %v7750_v35 = vadd.f32 -1.0, %v6692_v29  ;;  %v6697_v31 = vmul.f32 2.0, %v12150_v52 }
 0x4c5   : > { %v8866_v30 = vpop.eup %8865  ;;  %8881 = vrcp.f32 %v6606_v43  ;;  %v6698_v63 = vmul.f32 2.0, %v12153_v13 }
 0x4c6   : > { %v8868_v24 = vpop.eup %8867  ;;  %v6603_v44 = vadd.f32 1.0, %v8866_v30  ;;  %8883 = vpow2.f32 %v7732_v42  ;;  %6803 = vrot.lane.b32.xlu0 %v7749_v20, %s8981_s11  ;;  %v7755_v2 = vadd.f32 -1.0, %v6697_v31 }
 0x4c7   : > { %v6604_v62 = vadd.f32 1.0, %v8868_v24  ;;  %6805 = vrot.lane.b32.xlu1 %v7750_v35, %s8981_s11  ;;  %v7756_v15 = vadd.f32 -1.0, %v6698_v63 }
 0x4c8   : > { %v12159_v39 = vpop.eup %8869  ;;  %8885 = vrcp.f32 %v6603_v44 }
 0x4c9   : > { %8887 = vrcp.f32 %v6604_v62  ;;  %v6695_v40 = vmul.f32 2.0, %v12159_v39 }
 0x4ca   : > { %v12162_v23 = vpop.eup %8871  ;;  %6815 = vrot.lane.b32.xlu0 %v7755_v2, %s8981_s11 }
 0x4cb   : > { %v8874_v43 = vpop.eup %8873  ;;  %6817 = vrot.lane.b32.xlu1 %v7756_v15, %s8981_s11  ;;  %v7753_v29 = vadd.f32 -1.0, %v6695_v40  ;;  %v6696_v42 = vmul.f32 2.0, %v12162_v23 }
 0x4cc   : > { %v12167_v20 = vpop.eup %8875  ;;  %v6607_v35 = vadd.f32 1.0, %v8874_v43 }
 0x4cd   : > { %v8878_v31 = vpop.eup %8877  ;;  %v7754_v30 = vadd.f32 -1.0, %v6696_v42  ;;  %v6701_v63 = vmul.f32 2.0, %v12167_v20 }
 0x4ce   : > { %v8880_v24 = vpop.eup %8879  ;;  %8889 = vrcp.f32 %v6607_v35  ;;  %v6608_v44 = vadd.f32 1.0, %v8878_v31  ;;  %6811 = vrot.lane.b32.xlu0 %v7753_v29, %s8981_s11 }
 0x4cf   : > { %v12171_v62 = vpop.eup %8881  ;;  %v6609_v2 = vadd.f32 1.0, %v8880_v24  ;;  %6813 = vrot.lane.b32.xlu1 %v7754_v30, %s8981_s11  ;;  %v7759_v15 = vadd.f32 -1.0, %v6701_v63 }
 0x4d0   : > { %v8884_v40 = vpop.eup %8883  ;;  %8891 = vrcp.f32 %v6608_v44  ;;  %v6702_v58 = vmul.f32 2.0, %v12171_v62 }
 0x4d1   : > { %8893 = vrcp.f32 %v6609_v2  ;;  %v6610_v43 = vadd.f32 1.0, %v8884_v40 }
 0x4d2   : > { %v12175_v42 = vpop.eup %8885  ;;  %6823 = vrot.lane.b32.xlu0 %v7759_v15, %s8981_s11  ;;  %v7760_v35 = vadd.f32 -1.0, %v6702_v58 }
 0x4d3   : > { %v12178_v31 = vpop.eup %8887  ;;  %8895 = vrcp.f32 %v6610_v43  ;;  %v6699_v29 = vmul.f32 2.0, %v12175_v42 }
 0x4d4   : > { %6825 = vrot.lane.b32.xlu1 %v7760_v35, %s8981_s11  ;;  %v6700_v30 = vmul.f32 2.0, %v12178_v31 }
 0x4d5   : > { %v7757_v63 = vadd.f32 -1.0, %v6699_v29 }
 0x4d6   : > { %v7758_v24 = vadd.f32 -1.0, %v6700_v30 }
 0x4d7   : > { %6819 = vrot.lane.b32.xlu0 %v7757_v63, %s8981_s11 }
 0x4d8   : > { %v12184_v44 = vpop.eup %8889  ;;  %6821 = vrot.lane.b32.xlu1 %v7758_v24, %s8981_s11 }
 0x4d9   : > { %12615 = vst [vmem:[#allocation42_spill] sm:$0xff] %v12184_v44  ;;  %v6703_v2 = vmul.f32 2.0, %v12184_v44 }
 0x4da   : > { %v12188_v58 = vpop.eup %8891 }
 0x4db   : > { %v12190_v15 = vpop.eup %8893  ;;  %v7761_v40 = vadd.f32 -1.0, %v6703_v2  ;;  %v6704_v43 = vmul.f32 2.0, %v12188_v58 }
 0x4dc   : > { %v6705_v35 = vmul.f32 2.0, %v12190_v15 }
 0x4dd   : > { %v12194_v29 = vpop.eup %8895  ;;  %6827 = vrot.lane.b32.xlu0 %v7761_v40, %s8981_s11  ;;  %v7762_v30 = vadd.f32 -1.0, %v6704_v43 }
 0x4de   : > { %v7763_v63 = vadd.f32 -1.0, %v6705_v35  ;;  %v6706_v24 = vmul.f32 2.0, %v12194_v29 }
 0x4df   : > { %6829 = vrot.lane.b32.xlu1 %v7762_v30, %s8981_s11 }
 0x4e0   : > { %v7764_v44 = vadd.f32 -1.0, %v6706_v24 }
 0x4e1   : > { %6831 = vrot.lane.b32.xlu0 %v7763_v63, %s8981_s11 }
 0x4e3   : > { %6833 = vrot.lane.b32.xlu1 %v7764_v44, %s8981_s11 }
 0x50a   : > { %v6776_v2 = vpop.permute.xlu0 %6775 }
 0x50b   : > { %v6869_v40 = vmul.f32 %v12030_v6, %v6776_v2 }
 0x50c   : > { %v6778_v43 = vpop.permute.xlu1 %6777 }
 0x50d   : > { %v6901_v35 = vsel %vm5099_vm8, %v6869_v40, %v11629_v10  ;;  %v6870_v44 = vmul.f32 %v12035_v7, %v6778_v43 }
 0x50e   : > { %6934 = vst.msk [vmem:[%s12206_s25 + $0x10] sm:$0xff] %vm6931_vm9, %v6901_v35  ;;  %v6772_v30 = vpop.permute.xlu0 %6771 }
 0x50f   : > { %v6902_v63 = vsel %vm5099_vm8, %v6870_v44, %v11633_v18  ;;  %v6867_v24 = vmul.f32 %v12040_v28, %v6772_v30 }
 0x510   : > { %6935 = vst.msk [vmem:[%s12206_s25 + $0x18] sm:$0xff] %vm6931_vm9, %v6902_v63 }
 0x511   : > { %v6899_v6 = vsel %vm5099_vm8, %v6867_v24, %v11637_v5 }
 0x512   : > { %6932 = vst.msk [vmem:[%s12206_s25] sm:$0xff] %vm6931_vm9, %v6899_v6  ;;  %v6774_v10 = vpop.permute.xlu1 %6773 }
 0x513   : > { %v6868_v7 = vmul.f32 %v12049_v41, %v6774_v10 }
 0x515   : > { %v6900_v2 = vsel %vm5099_vm8, %v6868_v7, %v11645_v45 }
 0x516   : > { %6933 = vst.msk [vmem:[%s12206_s25 + $0x8] sm:$0xff] %vm6931_vm9, %v6900_v2  ;;  %v6784_v18 = vpop.permute.xlu0 %6783 }
 0x517   : > { %v6786_v40 = vpop.permute.xlu1 %6785  ;;  %v6873_v28 = vmul.f32 %v12056_v49, %v6784_v18 }
 0x518   : > { %v6874_v43 = vmul.f32 %v12059_v21, %v6786_v40 }
 0x519   : > { %v6905_v5 = vsel %vm5099_vm8, %v6873_v28, %v11653_v32 }
 0x51a   : > { %v6906_v35 = vsel %vm5099_vm8, %v6874_v43, %v11655_v33  ;;  %6938 = vst.msk [vmem:[%s12206_s25 + $0x30] sm:$0xff] %vm6931_vm9, %v6905_v5  ;;  %v6780_v45 = vpop.permute.xlu0 %6779 }
 0x51b   : > { %6939 = vst.msk [vmem:[%s12206_s25 + $0x38] sm:$0xff] %vm6931_vm9, %v6906_v35  ;;  %v6871_v41 = vmul.f32 %v12068_v34, %v6780_v45 }
 0x51d   : > { %v6903_v49 = vsel %vm5099_vm8, %v6871_v41, %v11663_v17  ;;  %v6782_v44 = vpop.permute.xlu1 %6781 }
 0x51e   : > { %6936 = vst.msk [vmem:[%s12206_s25 + $0x20] sm:$0xff] %vm6931_vm9, %v6903_v49  ;;  %v6872_v32 = vmul.f32 %v12076_v14, %v6782_v44 }
 0x520   : > { %v6904_v33 = vsel %vm5099_vm8, %v6872_v32, %v11669_v26 }
 0x521   : > { %v6792_v21 = vpop.permute.xlu0 %6791  ;;  %6937 = vst.msk [vmem:[%s12206_s25 + $0x28] sm:$0xff] %vm6931_vm9, %v6904_v33 }
 0x522   : > { %v6877_v30 = vmul.f32 %v12083_v12, %v6792_v21  ;;  %v6794_v63 = vpop.permute.xlu1 %6793 }
 0x523   : > { %v6878_v34 = vmul.f32 %v12086_v53, %v6794_v63  ;;  %v12617_v63 = vld [vmem:[#allocation35_spill] sm:$0xff] }
 0x524   : > { %v6909_v17 = vsel %vm5099_vm8, %v6877_v30, %v11677_v9 }
 0x525   : > { %6942 = vst.msk [vmem:[%s12206_s25 + $0x50] sm:$0xff] %vm6931_vm9, %v6909_v17  ;;  %v6910_v14 = vsel %vm5099_vm8, %v6878_v34, %v11679_v1  ;;  %v6788_v24 = vpop.permute.xlu0 %6787 }
 0x526   : > { %6943 = vst.msk [vmem:[%s12206_s25 + $0x58] sm:$0xff] %vm6931_vm9, %v6910_v14  ;;  %v6875_v26 = vmul.f32 %v12094_v16, %v6788_v24  ;;  %v12619_v14 = vld [vmem:[#allocation42_spill] sm:$0xff] }
 0x527   : > { %v6790_v12 = vpop.permute.xlu1 %6789 }
 0x528   : > { %v6907_v6 = vsel %vm5099_vm8, %v6875_v26, %v11689_v27  ;;  %v6876_v53 = vmul.f32 %v12100_v3, %v6790_v12  ;;  %v12620_v26 = vld [vmem:[#allocation37_spill] sm:$0xff] }
 0x529   : > { %6940 = vst.msk [vmem:[%s12206_s25 + $0x40] sm:$0xff] %vm6931_vm9, %v6907_v6  ;;  %v6800_v9 = vpop.permute.xlu0 %6799 }
 0x52a   : > { %v6908_v10 = vsel %vm5099_vm8, %v6876_v53, %v11693_v60  ;;  %v6881_v1 = vmul.f32 %v12106_v22, %v6800_v9  ;;  %v12621_v53 = vld [vmem:[#allocation43_spill] sm:$0xff] }
 0x52b   : > { %6941 = vst.msk [vmem:[%s12206_s25 + $0x48] sm:$0xff] %vm6931_vm9, %v6908_v10 }
 0x52c   : > { %v6913_v16 = vsel %vm5099_vm8, %v6881_v1, %v11699_v54  ;;  %v6802_v7 = vpop.permute.xlu1 %6801 }
 0x52d   : > { %6946 = vst.msk [vmem:[%s12206_s25 + $0x70] sm:$0xff] %vm6931_vm9, %v6913_v16  ;;  %v6882_v27 = vmul.f32 %v12113_v36, %v6802_v7  ;;  %v12622_v16 = vld [vmem:[#allocation39_spill] sm:$0xff] }
 0x52f   : > { %v6914_v3 = vsel %vm5099_vm8, %v6882_v27, %v11703_v8 }
 0x530   : > { %6947 = vst.msk [vmem:[%s12206_s25 + $0x78] sm:$0xff] %vm6931_vm9, %v6914_v3  ;;  %v6796_v60 = vpop.permute.xlu0 %6795  ;;  %v12623_v3 = vld [vmem:[#allocation38_spill] sm:$0xff] }
 0x531   : > { %v6879_v22 = vmul.f32 %v12120_v38, %v6796_v60  ;;  %v6798_v2 = vpop.permute.xlu1 %6797 }
 0x532   : > { %v6880_v18 = vmul.f32 %v12122_v25, %v6798_v2 }
 0x533   : > { %v6911_v54 = vsel %vm5099_vm8, %v6879_v22, %v11713_v59 }
 0x534   : > { %6944 = vst.msk [vmem:[%s12206_s25 + $0x60] sm:$0xff] %vm6931_vm9, %v6911_v54  ;;  %v6912_v36 = vsel %vm5099_vm8, %v6880_v18, %v11715_v51  ;;  %v6808_v40 = vpop.permute.xlu0 %6807 }
 0x535   : > { %6945 = vst.msk [vmem:[%s12206_s25 + $0x68] sm:$0xff] %vm6931_vm9, %v6912_v36  ;;  %v6885_v8 = vmul.f32 %v12128_v50, %v6808_v40  ;;  %v6810_v28 = vpop.permute.xlu1 %6809 }
 0x536   : > { %v6886_v38 = vmul.f32 %v12133_v57, %v6810_v28 }
 0x537   : > { %v6917_v25 = vsel %vm5099_vm8, %v6885_v8, %v11725_v56 }
 0x538   : > { %6950 = vst.msk [vmem:[%s12206_s25 + $0x90] sm:$0xff] %vm6931_vm9, %v6917_v25  ;;  %v6918_v59 = vsel %vm5099_vm8, %v6886_v38, %v11727_v37  ;;  %v6804_v43 = vpop.permute.xlu0 %6803 }
 0x539   : > { %6951 = vst.msk [vmem:[%s12206_s25 + $0x98] sm:$0xff] %vm6931_vm9, %v6918_v59  ;;  %v6883_v51 = vmul.f32 %v12140_v46, %v6804_v43  ;;  %v6806_v5 = vpop.permute.xlu1 %6805 }
 0x53a   : > { %v6884_v50 = vmul.f32 %v12143_v19, %v6806_v5 }
 0x53b   : > { %v6915_v57 = vsel %vm5099_vm8, %v6883_v51, %v11737_v61 }
 0x53c   : > { %6948 = vst.msk [vmem:[%s12206_s25 + $0x80] sm:$0xff] %vm6931_vm9, %v6915_v57  ;;  %v6916_v56 = vsel %vm5099_vm8, %v6884_v50, %v11739_v0  ;;  %v6816_v35 = vpop.permute.xlu0 %6815 }
 0x53d   : > { %6949 = vst.msk [vmem:[%s12206_s25 + $0x88] sm:$0xff] %vm6931_vm9, %v6916_v56  ;;  %v6889_v37 = vmul.f32 %v12150_v52, %v6816_v35  ;;  %v6818_v45 = vpop.permute.xlu1 %6817 }
 0x53e   : > { %v6890_v46 = vmul.f32 %v12153_v13, %v6818_v45 }
 0x53f   : > { %v6921_v19 = vsel %vm5099_vm8, %v6889_v37, %v11749_v48 }
 0x540   : > { %6954 = vst.msk [vmem:[%s12206_s25 + $0xb0] sm:$0xff] %vm6931_vm9, %v6921_v19  ;;  %v6922_v61 = vsel %vm5099_vm8, %v6890_v46, %v11751_v4  ;;  %v6812_v41 = vpop.permute.xlu0 %6811 }
 0x541   : > { %6955 = vst.msk [vmem:[%s12206_s25 + $0xb8] sm:$0xff] %vm6931_vm9, %v6922_v61  ;;  %v6887_v0 = vmul.f32 %v12159_v39, %v6812_v41  ;;  %v6814_v49 = vpop.permute.xlu1 %6813 }
 0x542   : > { %v6888_v52 = vmul.f32 %v12162_v23, %v6814_v49 }
 0x543   : > { %v6919_v13 = vsel %vm5099_vm8, %v6887_v0, %v11761_v11  ;;  %v12616_v11 = vld [vmem:[#allocation36_spill] sm:$0xff] }
 0x544   : > { %6952 = vst.msk [vmem:[%s12206_s25 + $0xa0] sm:$0xff] %vm6931_vm9, %v6919_v13  ;;  %v6920_v48 = vsel %vm5099_vm8, %v6888_v52, %v11763_v55  ;;  %v6824_v44 = vpop.permute.xlu0 %6823 }
 0x545   : > { %6953 = vst.msk [vmem:[%s12206_s25 + $0xa8] sm:$0xff] %vm6931_vm9, %v6920_v48  ;;  %v6893_v4 = vmul.f32 %v12167_v20, %v6824_v44 }
 0x546   : > { %v6826_v32 = vpop.permute.xlu1 %6825 }
 0x547   : > { %v6925_v39 = vsel %vm5099_vm8, %v6893_v4, %v11773_v47  ;;  %v6894_v23 = vmul.f32 %v12171_v62, %v6826_v32  ;;  %v12618_v62 = vld [vmem:[#allocation34_spill] sm:$0xff] }
 0x548   : > { %6958 = vst.msk [vmem:[%s12206_s25 + $0xd0] sm:$0xff] %vm6931_vm9, %v6925_v39 }
 0x549   : > { %v6926_v33 = vsel %vm5099_vm8, %v6894_v23, %v12616_v11  ;;  %v6820_v21 = vpop.permute.xlu0 %6819 }
 0x54a   : > { %6959 = vst.msk [vmem:[%s12206_s25 + $0xd8] sm:$0xff] %vm6931_vm9, %v6926_v33  ;;  %v6891_v55 = vmul.f32 %v12175_v42, %v6820_v21  ;;  %v6822_v30 = vpop.permute.xlu1 %6821 }
 0x54b   : > { %v6892_v20 = vmul.f32 %v12178_v31, %v6822_v30 }
 0x54c   : > { %v6923_v47 = vsel %vm5099_vm8, %v6891_v55, %v12617_v63 }
 0x54d   : > { %6956 = vst.msk [vmem:[%s12206_s25 + $0xc0] sm:$0xff] %vm6931_vm9, %v6923_v47  ;;  %v6924_v34 = vsel %vm5099_vm8, %v6892_v20, %v12618_v62 }
 0x54e   : > { %6957 = vst.msk [vmem:[%s12206_s25 + $0xc8] sm:$0xff] %vm6931_vm9, %v6924_v34 }
 0x54f   : > { %v6828_v17 = vpop.permute.xlu0 %6827 }
 0x550   : > { %v6895_v24 = vmul.f32 %v12619_v14, %v6828_v17 }
 0x551   : > { %v6830_v42 = vpop.permute.xlu1 %6829 }
 0x552   : > { %v6927_v12 = vsel %vm5099_vm8, %v6895_v24, %v12620_v26  ;;  %v6896_v31 = vmul.f32 %v12188_v58, %v6830_v42 }
 0x553   : > { %6960 = vst.msk [vmem:[%s12206_s25 + $0xe0] sm:$0xff] %vm6931_vm9, %v6927_v12  ;;  %v6832_v6 = vpop.permute.xlu0 %6831 }
 0x554   : > { %v6928_v9 = vsel %vm5099_vm8, %v6896_v31, %v12621_v53  ;;  %v6897_v10 = vmul.f32 %v12190_v15, %v6832_v6 }
 0x555   : > { %6961 = vst.msk [vmem:[%s12206_s25 + $0xe8] sm:$0xff] %vm6931_vm9, %v6928_v9  ;;  %v6834_v1 = vpop.permute.xlu1 %6833 }
 0x556   : > { %v6929_v7 = vsel %vm5099_vm8, %v6897_v10, %v12622_v16  ;;  %v6898_v27 = vmul.f32 %v12194_v29, %v6834_v1 }
 0x557   : > { %6962 = vst.msk [vmem:[%s12206_s25 + $0xf0] sm:$0xff] %vm6931_vm9, %v6929_v7 }
 0x558   : > { %v6930_v58 = vsel %vm5099_vm8, %v6898_v27, %v12623_v3 }
 0x559   : > { %6963 = vst.msk [vmem:[%s12206_s25 + $0xf8] sm:$0xff] %vm6931_vm9, %v6930_v58 }
 0x55a PF: > { %s16_s21 = sadd.s32 1, %s8977_s21  }
 0x55b   : > { %p13_p4 = scmp.ge.s32.totalorder %s16_s21, 4  }
 0x55d   :  { %15 = sbr.rel (!%p13_p4) target bundleno = 1 (0x1), region = 87 }

</bundles_post_ra>
